<compile_context>
chip_gen: v7x
topology: tpu7x:2x2x1
jax: 0.10.0
libtpu: 0.0.40
codegen_flags: <defaults>
</compile_context>

<pallas_src>
import functools
import math

import jax
import jax.numpy as jnp
from jax.experimental import pallas as pl
from jax.experimental.pallas import tpu as pltpu


HID_PAD = 128  # lane-dense padded classification-head width


# ----------------------------------------------------------------------------- kernel
def _bert_forward_kernel(ids_col_ref, ids_row_ref, word_emb_ref, pos_ref,
                         vec_ref, ib_ref, qkvw_ref, ow_ref, iw_ref, fw_ref,
                         headw_ref, out_ref, *, n_layers, H, Dh, S, B, V, eps):
    D = H * Dh
    BS = B * S

    def layernorm(x, g, b):
        mu = jnp.mean(x, axis=-1, keepdims=True)
        var = jnp.mean(jnp.square(x - mu), axis=-1, keepdims=True)
        return (x - mu) * jax.lax.rsqrt(var + eps) * g + b

    def row(r):  # (1, 128) f32 row from the packed vector table
        return vec_ref[r:r + 1, :]

    # ---- embeddings: one-hot gather on the MXU + pos/type table, then LN ----
    ids_col = ids_col_ref[...]                                        # (BS, 1) i32
    onehot = (ids_col == jax.lax.broadcasted_iota(jnp.int32, (BS, V), 1)
              ).astype(jnp.bfloat16)                                  # (BS, V)
    word = jnp.dot(onehot, word_emb_ref[...],
                   preferred_element_type=jnp.float32)                # (BS, D) f32
    pos = jnp.concatenate([pos_ref[0:S, :]] * B, axis=0)              # (BS, D) f32
    h = layernorm(word + pos, row(0), row(1))                         # (BS, D) f32

    # additive attention bias built in-kernel from the ids:  0 / -1e4 per key
    bias2d = jnp.where(ids_row_ref[...] != 0, 0.0, -10000.0).astype(jnp.float32)

    for l in range(n_layers):
        base = 2 + 9 * l
        qkv_w = qkvw_ref[l]          # (D, 3D) bf16, Q columns pre-scaled by 1/sqrt(Dh)
        o_w = ow_ref[l]              # (D, D)  bf16
        i_w = iw_ref[l]              # (D, I)  bf16
        f_w = fw_ref[l]              # (I, D)  bf16

        # fused QKV projection on the flattened batch
        qkv = jnp.dot(h.astype(jnp.bfloat16), qkv_w,
                      preferred_element_type=jnp.float32)             # (BS, 3D) f32
        q = (qkv[:, 0:D] + row(base + 0)).astype(jnp.bfloat16)        # scale pre-folded
        k = (qkv[:, D:2 * D] + row(base + 1)).astype(jnp.bfloat16)
        v = (qkv[:, 2 * D:3 * D] + row(base + 2)).astype(jnp.bfloat16)

        # per-batch, per-head attention; output projection folded into the head loop
        attn_rows = []
        for b in range(B):
            r0 = b * S
            bias_b = bias2d[b:b + 1, :]                                # (1, S)
            acc = jnp.zeros((S, D), jnp.float32)
            for hh in range(H):
                c0 = hh * Dh
                qh = q[r0:r0 + S, c0:c0 + Dh]
                kh = k[r0:r0 + S, c0:c0 + Dh]
                vh = v[r0:r0 + S, c0:c0 + Dh]
                s = jax.lax.dot_general(qh, kh, (((1,), (1,)), ((), ())),
                                        preferred_element_type=jnp.float32)
                s = s + bias_b
                s = s - jnp.max(s, axis=-1, keepdims=True)
                p = jnp.exp(s)
                p = p * pl.reciprocal(jnp.sum(p, axis=-1, keepdims=True), approx=True)
                ctx = jnp.dot(p.astype(jnp.bfloat16), vh,
                              preferred_element_type=jnp.float32)      # (S, Dh)
                # fold output projection per head: (S,Dh)@(Dh,D) -> full-lane tile
                acc = acc + jnp.dot(ctx.astype(jnp.bfloat16), o_w[c0:c0 + Dh, :],
                                    preferred_element_type=jnp.float32)
            attn_rows.append(acc)
        attn = jnp.concatenate(attn_rows, axis=0) + row(base + 3)      # (BS, D)
        h1 = layernorm(attn + h, row(base + 4), row(base + 5))

        inter = jnp.dot(h1.astype(jnp.bfloat16), i_w,
                        preferred_element_type=jnp.float32) + ib_ref[l:l + 1, :]
        # tanh-approx GELU (EUP-friendly); BERT's erf-GELU is numerically very close.
        inter = 0.5 * inter * (1.0 + jnp.tanh(
            0.7978845608028654 * (inter + 0.044715 * inter * inter * inter)))
        ffn = jnp.dot(inter.astype(jnp.bfloat16), f_w,
                      preferred_element_type=jnp.float32) + row(base + 6)
        h = layernorm(ffn + h1, row(base + 7), row(base + 8))

    # classification head: Linear(D -> 128-padded) + ReLU (Dropout p=0 == identity)
    head_b = row(2 + 9 * n_layers)
    proj = jnp.dot(h.astype(jnp.bfloat16), headw_ref[...],
                   preferred_element_type=jnp.float32) + head_b
    out_ref[...] = jnp.maximum(proj, 0.0)


# -------------------------------------------------------------------------- BERT model
class Config:
    vocab = 64
    max_pos = 16
    embed_dim = 128        # BERT hidden size (model_params['embed_dim'])
    heads = 4
    head_dim = embed_dim // heads
    intermediate = 256
    layers = 2
    hidden_size = 32       # model_params['hidden_size'] (projection head)
    dropout_ratio = 0.0    # eval / ratio 0 -> identity


def init_params(key, cfg):
    """Random 'PyTorch-layout' parameters.
    TODO(synk): real model loads pretrained 'bert-base-cased' weights; a small
    random-init 2-layer BERT stands in (no file/network access allowed)."""
    scale = 0.02
    p = {}

    def nrm(k, shape):
        return scale * jax.random.normal(k, shape, dtype=jnp.float32)

    keys = iter(jax.random.split(key, 8 + cfg.layers * 16))
    p["word_emb"] = nrm(next(keys), (cfg.vocab, cfg.embed_dim))
    p["pos_emb"] = nrm(next(keys), (cfg.max_pos, cfg.embed_dim))
    p["type_emb"] = nrm(next(keys), (2, cfg.embed_dim))
    p["emb_ln_g"] = jnp.ones((cfg.embed_dim,), jnp.float32)
    p["emb_ln_b"] = jnp.zeros((cfg.embed_dim,), jnp.float32)

    p["layers"] = []
    D, I = cfg.embed_dim, cfg.intermediate
    for _ in range(cfg.layers):
        lp = {
            "q_w": nrm(next(keys), (D, D)), "q_b": jnp.zeros((D,), jnp.float32),
            "k_w": nrm(next(keys), (D, D)), "k_b": jnp.zeros((D,), jnp.float32),
            "v_w": nrm(next(keys), (D, D)), "v_b": jnp.zeros((D,), jnp.float32),
            "o_w": nrm(next(keys), (D, D)), "o_b": jnp.zeros((D,), jnp.float32),
            "ln1_g": jnp.ones((D,), jnp.float32), "ln1_b": jnp.zeros((D,), jnp.float32),
            "i_w": nrm(next(keys), (D, I)), "i_b": jnp.zeros((I,), jnp.float32),
            "f_w": nrm(next(keys), (I, D)), "f_b": jnp.zeros((D,), jnp.float32),
            "ln2_g": jnp.ones((D,), jnp.float32), "ln2_b": jnp.zeros((D,), jnp.float32),
        }
        p["layers"].append(lp)

    p["head_w"] = nrm(next(keys), (cfg.embed_dim, cfg.hidden_size))
    p["head_b"] = jnp.zeros((cfg.hidden_size,), jnp.float32)
    return p


def pack_params(params, cfg):
    """One-time packing of weights into kernel-friendly layout (hoisted out of
    the forward path): QKV fusion + scale folding, bf16 matmul weights, stacked
    per-layer tensors, one (rows,128) vector table, padded head, pos+type fold."""
    D, I = cfg.embed_dim, cfg.intermediate
    scale = 1.0 / math.sqrt(cfg.head_dim)

    vec_rows = [params["emb_ln_g"], params["emb_ln_b"]]
    qkv_ws, o_ws, i_ws, f_ws, i_bs = [], [], [], [], []
    for lp in params["layers"]:
        qkv_ws.append(jnp.concatenate(
            [lp["q_w"] * scale, lp["k_w"], lp["v_w"]], axis=1))        # (D, 3D)
        o_ws.append(lp["o_w"])
        i_ws.append(lp["i_w"])
        f_ws.append(lp["f_w"])
        i_bs.append(lp["i_b"])
        vec_rows += [lp["q_b"] * scale, lp["k_b"], lp["v_b"], lp["o_b"],
                     lp["ln1_g"], lp["ln1_b"], lp["f_b"], lp["ln2_g"], lp["ln2_b"]]
    head_b_pad = jnp.zeros((HID_PAD,), jnp.float32).at[:cfg.hidden_size].set(
        params["head_b"])
    vec_rows.append(head_b_pad)

    head_w_pad = jnp.zeros((D, HID_PAD), jnp.float32).at[:, :cfg.hidden_size].set(
        params["head_w"])

    packed = {
        "word_emb": params["word_emb"].astype(jnp.bfloat16),           # (V, D)
        # token_type_ids are all zero -> fold type_emb[0] into the position table
        "pos_type": (params["pos_emb"] + params["type_emb"][0][None, :]),  # (P, D) f32
        "vec128": jnp.stack(vec_rows, axis=0),                         # (3+9L, D) f32
        "i_b": jnp.stack(i_bs, axis=0),                                # (L, I) f32
        "qkv_w": jnp.stack(qkv_ws, axis=0).astype(jnp.bfloat16),       # (L, D, 3D)
        "o_w": jnp.stack(o_ws, axis=0).astype(jnp.bfloat16),           # (L, D, D)
        "i_w": jnp.stack(i_ws, axis=0).astype(jnp.bfloat16),           # (L, D, I)
        "f_w": jnp.stack(f_ws, axis=0).astype(jnp.bfloat16),           # (L, I, D)
        "head_w": head_w_pad.astype(jnp.bfloat16),                     # (D, 128)
    }
    return jax.tree_util.tree_map(jnp.asarray, packed)


def _full_spec(x):
    nd = x.ndim
    return pl.BlockSpec(x.shape, lambda i, _nd=nd: (0,) * _nd)


def bert_sequence_model_forward(packed, cfg, input_ids, input_len):
    """Mirror of BERTSequenceModel.forward (eval mode).  input_ids: (B, S) int32."""
    del input_len  # unused in the PyTorch forward as well
    B, S = input_ids.shape
    ids_row = input_ids.astype(jnp.int32)              # (B, S)  -> in-kernel mask
    ids_col = ids_row.reshape(B * S, 1)                 # (B*S,1) -> in-kernel gather

    inputs = [ids_col, ids_row, packed["word_emb"], packed["pos_type"],
              packed["vec128"], packed["i_b"], packed["qkv_w"], packed["o_w"],
              packed["i_w"], packed["f_w"], packed["head_w"]]

    out = pl.pallas_call(
        functools.partial(_bert_forward_kernel, n_layers=cfg.layers, H=cfg.heads,
                          Dh=cfg.head_dim, S=S, B=B, V=cfg.vocab, eps=1e-12),
        out_shape=jax.ShapeDtypeStruct((B * S, HID_PAD), jnp.float32),
        grid=(1,),  # batch folded into one block: better MXU fill, no grid-step overhead
        in_specs=[_full_spec(x) for x in inputs],
        out_specs=pl.BlockSpec((B * S, HID_PAD), lambda i: (0, 0)),
        compiler_params=pltpu.CompilerParams(dimension_semantics=("arbitrary",)),
    )(*inputs)

    out = out.reshape(B, S, HID_PAD)
    # cls_token = output[:, 0, :] is computed but unused in the PyTorch forward.
    # output = output[:, 1:-1, :]; linear head already applied in-kernel.
    return out[:, 1:S - 1, :cfg.hidden_size]


# ------------------------------------------------------------------------------- main
if __name__ == "__main__":
    cfg = Config()
    key = jax.random.PRNGKey(0)
    pkey, ikey = jax.random.split(key)

    params = init_params(pkey, cfg)
    packed = pack_params(params, cfg)          # one-time packing (not per call)

    B, S = 2, 8
    input_ids = jax.random.randint(ikey, (B, S), 1, cfg.vocab, dtype=jnp.int32)
    # add some padding (id 0) so the attention mask path is exercised
    input_ids = input_ids.at[1, 6:].set(0)
    input_len = jnp.array([S, 6], dtype=jnp.int32)

    fwd = jax.jit(functools.partial(bert_sequence_model_forward, packed, cfg))
    out = jax.block_until_ready(fwd(input_ids, input_len))

    assert out.shape == (B, S - 2, cfg.hidden_size), out.shape
    assert bool(jnp.all(jnp.isfinite(out)))
    print("KERNEL_OK")
</pallas_src>

<mosaic_0001>
module attributes {stable_mosaic.version = 11 : i64} {
  func.func @_bert_forward_kernel(%arg0: i32, %arg1: memref<16x1xi32, #tpu.memory_space<vmem>>, %arg2: memref<2x8xi32, #tpu.memory_space<vmem>>, %arg3: memref<64x128xbf16, #tpu.memory_space<vmem>>, %arg4: memref<16x128xf32, #tpu.memory_space<vmem>>, %arg5: memref<21x128xf32, #tpu.memory_space<vmem>>, %arg6: memref<2x256xf32, #tpu.memory_space<vmem>>, %arg7: memref<2x128x384xbf16, #tpu.memory_space<vmem>>, %arg8: memref<2x128x128xbf16, #tpu.memory_space<vmem>>, %arg9: memref<2x128x256xbf16, #tpu.memory_space<vmem>>, %arg10: memref<2x256x128xbf16, #tpu.memory_space<vmem>>, %arg11: memref<128x128xbf16, #tpu.memory_space<vmem>>, %arg12: memref<16x128xf32, #tpu.memory_space<vmem>>) attributes {dimension_semantics = [#tpu.dimension_semantics<arbitrary>], iteration_bounds = array<i64: 1>, scalar_prefetch = 0 : i64, scratch_operands = 0 : i64, tpu.core_type = #tpu.core_type<tc>, window_params = [{pipeline_mode = #tpu.pipeline_mode<synchronous>, transform_indices = @transform_0, window_bounds = array<i64: 16, 1>}, {pipeline_mode = #tpu.pipeline_mode<synchronous>, transform_indices = @transform_1, window_bounds = array<i64: 2, 8>}, {pipeline_mode = #tpu.pipeline_mode<synchronous>, transform_indices = @transform_2, window_bounds = array<i64: 64, 128>}, {pipeline_mode = #tpu.pipeline_mode<synchronous>, transform_indices = @transform_3, window_bounds = array<i64: 16, 128>}, {pipeline_mode = #tpu.pipeline_mode<synchronous>, transform_indices = @transform_4, window_bounds = array<i64: 21, 128>}, {pipeline_mode = #tpu.pipeline_mode<synchronous>, transform_indices = @transform_5, window_bounds = array<i64: 2, 256>}, {pipeline_mode = #tpu.pipeline_mode<synchronous>, transform_indices = @transform_6, window_bounds = array<i64: 2, 128, 384>}, {pipeline_mode = #tpu.pipeline_mode<synchronous>, transform_indices = @transform_7, window_bounds = array<i64: 2, 128, 128>}, {pipeline_mode = #tpu.pipeline_mode<synchronous>, transform_indices = @transform_8, window_bounds = array<i64: 2, 128, 256>}, {pipeline_mode = #tpu.pipeline_mode<synchronous>, transform_indices = @transform_9, window_bounds = array<i64: 2, 256, 128>}, {pipeline_mode = #tpu.pipeline_mode<synchronous>, transform_indices = @transform_10, window_bounds = array<i64: 128, 128>}, {pipeline_mode = #tpu.pipeline_mode<synchronous>, transform_indices = @transform_11, window_bounds = array<i64: 16, 128>}]} {
    %c0 = arith.constant 0 : index
    %c0_0 = arith.constant 0 : index
    %0 = vector.load %arg1[%c0, %c0_0] : memref<16x1xi32, #tpu.memory_space<vmem>>, vector<16x1xi32>
    %1 = tpu.iota {dimensions = array<i32: 1>} : vector<16x64xi32>
    %2 = vector.broadcast %0 : vector<16x1xi32> to vector<16x64xi32>
    %3 = arith.cmpi eq, %2, %1 : vector<16x64xi32>
    %4 = arith.extui %3 : vector<16x64xi1> to vector<16x64xi32>
    %5 = arith.sitofp %4 : vector<16x64xi32> to vector<16x64xf32>
    %6 = arith.truncf %5 : vector<16x64xf32> to vector<16x64xbf16>
    %c0_1 = arith.constant 0 : index
    %c0_2 = arith.constant 0 : index
    %7 = vector.load %arg3[%c0_1, %c0_2] : memref<64x128xbf16, #tpu.memory_space<vmem>>, vector<64x128xbf16>
    %cst = arith.constant dense<0.000000e+00> : vector<16x128xf32>
    %8 = tpu.matmul %6, %7, %cst {dimension_numbers = #tpu.dot_dimension_numbers<[1], [0], [0], [1], [0, 0, 1, 1], [], []>} : vector<16x64xbf16>, vector<64x128xbf16>, vector<16x128xf32> -> vector<16x128xf32>
    %c0_3 = arith.constant 0 : index
    %c0_4 = arith.constant 0 : index
    %9 = vector.load %arg4[%c0_3, %c0_4] : memref<16x128xf32, #tpu.memory_space<vmem>>, vector<8x128xf32>
    %10 = tpu.concatenate %9, %9 in 0 : vector<8x128xf32>, vector<8x128xf32> -> vector<16x128xf32>
    %11 = arith.addf %8, %10 : vector<16x128xf32>
    %c0_5 = arith.constant 0 : index
    %c0_6 = arith.constant 0 : index
    %12 = vector.load %arg5[%c0_5, %c0_6] : memref<21x128xf32, #tpu.memory_space<vmem>>, vector<1x128xf32>
    %c1 = arith.constant 1 : index
    %c0_7 = arith.constant 0 : index
    %13 = vector.load %arg5[%c1, %c0_7] : memref<21x128xf32, #tpu.memory_space<vmem>>, vector<1x128xf32>
    %cst_8 = arith.constant dense<0.000000e+00> : vector<16xf32>
    %14 = vector.multi_reduction <add>, %11, %cst_8 [1] : vector<16x128xf32> to vector<16xf32>
    %15 = vector.shape_cast %14 : vector<16xf32> to vector<16x1xf32>
    %cst_9 = arith.constant 1.280000e+02 : f32
    %16 = vector.broadcast %cst_9 : f32 to vector<16x1xf32>
    %17 = arith.divf %15, %16 : vector<16x1xf32>
    %18 = vector.broadcast %17 : vector<16x1xf32> to vector<16x128xf32>
    %19 = arith.subf %11, %18 : vector<16x128xf32>
    %20 = arith.mulf %19, %19 : vector<16x128xf32>
    %cst_10 = arith.constant dense<0.000000e+00> : vector<16xf32>
    %21 = vector.multi_reduction <add>, %20, %cst_10 [1] : vector<16x128xf32> to vector<16xf32>
    %22 = vector.shape_cast %21 : vector<16xf32> to vector<16x1xf32>
    %cst_11 = arith.constant 1.280000e+02 : f32
    %23 = vector.broadcast %cst_11 : f32 to vector<16x1xf32>
    %24 = arith.divf %22, %23 : vector<16x1xf32>
    %25 = vector.broadcast %17 : vector<16x1xf32> to vector<16x128xf32>
    %26 = arith.subf %11, %25 : vector<16x128xf32>
    %cst_12 = arith.constant 9.99999996E-13 : f32
    %27 = vector.broadcast %cst_12 : f32 to vector<16x1xf32>
    %28 = arith.addf %24, %27 : vector<16x1xf32>
    %29 = math.rsqrt %28 : vector<16x1xf32>
    %30 = vector.broadcast %29 : vector<16x1xf32> to vector<16x128xf32>
    %31 = arith.mulf %26, %30 : vector<16x128xf32>
    %32 = vector.broadcast %12 : vector<1x128xf32> to vector<16x128xf32>
    %33 = arith.mulf %31, %32 : vector<16x128xf32>
    %34 = vector.broadcast %13 : vector<1x128xf32> to vector<16x128xf32>
    %35 = arith.addf %33, %34 : vector<16x128xf32>
    %c0_13 = arith.constant 0 : index
    %c0_14 = arith.constant 0 : index
    %36 = vector.load %arg2[%c0_13, %c0_14] : memref<2x8xi32, #tpu.memory_space<vmem>>, vector<2x8xi32>
    %c0_i32 = arith.constant 0 : i32
    %37 = vector.broadcast %c0_i32 : i32 to vector<2x8xi32>
    %38 = arith.cmpi ne, %36, %37 : vector<2x8xi32>
    %cst_15 = arith.constant 0.000000e+00 : f32
    %cst_16 = arith.constant -1.000000e+04 : f32
    %39 = vector.broadcast %cst_15 : f32 to vector<2x8xf32>
    %40 = vector.broadcast %cst_16 : f32 to vector<2x8xf32>
    %41 = arith.select %38, %39, %40 : vector<2x8xi1>, vector<2x8xf32>
    %c0_17 = arith.constant 0 : index
    %c0_18 = arith.constant 0 : index
    %c0_19 = arith.constant 0 : index
    %42 = vector.load %arg7[%c0_17, %c0_18, %c0_19] : memref<2x128x384xbf16, #tpu.memory_space<vmem>>, vector<1x128x384xbf16>
    %43 = vector.shape_cast %42 : vector<1x128x384xbf16> to vector<128x384xbf16>
    %c0_20 = arith.constant 0 : index
    %c0_21 = arith.constant 0 : index
    %c0_22 = arith.constant 0 : index
    %44 = vector.load %arg8[%c0_20, %c0_21, %c0_22] : memref<2x128x128xbf16, #tpu.memory_space<vmem>>, vector<1x128x128xbf16>
    %45 = vector.shape_cast %44 : vector<1x128x128xbf16> to vector<128x128xbf16>
    %c0_23 = arith.constant 0 : index
    %c0_24 = arith.constant 0 : index
    %c0_25 = arith.constant 0 : index
    %46 = vector.load %arg9[%c0_23, %c0_24, %c0_25] : memref<2x128x256xbf16, #tpu.memory_space<vmem>>, vector<1x128x256xbf16>
    %47 = vector.shape_cast %46 : vector<1x128x256xbf16> to vector<128x256xbf16>
    %c0_26 = arith.constant 0 : index
    %c0_27 = arith.constant 0 : index
    %c0_28 = arith.constant 0 : index
    %48 = vector.load %arg10[%c0_26, %c0_27, %c0_28] : memref<2x256x128xbf16, #tpu.memory_space<vmem>>, vector<1x256x128xbf16>
    %49 = vector.shape_cast %48 : vector<1x256x128xbf16> to vector<256x128xbf16>
    %50 = arith.truncf %35 : vector<16x128xf32> to vector<16x128xbf16>
    %cst_29 = arith.constant dense<0.000000e+00> : vector<16x384xf32>
    %51 = tpu.matmul %50, %43, %cst_29 {dimension_numbers = #tpu.dot_dimension_numbers<[1], [0], [0], [1], [0, 0, 1, 1], [], []>} : vector<16x128xbf16>, vector<128x384xbf16>, vector<16x384xf32> -> vector<16x384xf32>
    %52 = vector.extract_strided_slice %51 {offsets = [0, 0], sizes = [16, 128], strides = [1, 1]} : vector<16x384xf32> to vector<16x128xf32>
    %c2 = arith.constant 2 : index
    %c0_30 = arith.constant 0 : index
    %53 = vector.load %arg5[%c2, %c0_30] : memref<21x128xf32, #tpu.memory_space<vmem>>, vector<1x128xf32>
    %54 = vector.broadcast %53 : vector<1x128xf32> to vector<16x128xf32>
    %55 = arith.addf %52, %54 : vector<16x128xf32>
    %56 = arith.truncf %55 : vector<16x128xf32> to vector<16x128xbf16>
    %57 = vector.extract_strided_slice %51 {offsets = [0, 128], sizes = [16, 128], strides = [1, 1]} : vector<16x384xf32> to vector<16x128xf32>
    %c3 = arith.constant 3 : index
    %c0_31 = arith.constant 0 : index
    %58 = vector.load %arg5[%c3, %c0_31] : memref<21x128xf32, #tpu.memory_space<vmem>>, vector<1x128xf32>
    %59 = vector.broadcast %58 : vector<1x128xf32> to vector<16x128xf32>
    %60 = arith.addf %57, %59 : vector<16x128xf32>
    %61 = arith.truncf %60 : vector<16x128xf32> to vector<16x128xbf16>
    %62 = vector.extract_strided_slice %51 {offsets = [0, 256], sizes = [16, 128], strides = [1, 1]} : vector<16x384xf32> to vector<16x128xf32>
    %c4 = arith.constant 4 : index
    %c0_32 = arith.constant 0 : index
    %63 = vector.load %arg5[%c4, %c0_32] : memref<21x128xf32, #tpu.memory_space<vmem>>, vector<1x128xf32>
    %64 = vector.broadcast %63 : vector<1x128xf32> to vector<16x128xf32>
    %65 = arith.addf %62, %64 : vector<16x128xf32>
    %66 = arith.truncf %65 : vector<16x128xf32> to vector<16x128xbf16>
    %67 = vector.extract_strided_slice %41 {offsets = [0, 0], sizes = [1, 8], strides = [1, 1]} : vector<2x8xf32> to vector<1x8xf32>
    %cst_33 = arith.constant 0.000000e+00 : f32
    %68 = vector.broadcast %cst_33 : f32 to vector<8x128xf32>
    %69 = vector.extract_strided_slice %56 {offsets = [0, 0], sizes = [8, 32], strides = [1, 1]} : vector<16x128xbf16> to vector<8x32xbf16>
    %70 = vector.extract_strided_slice %61 {offsets = [0, 0], sizes = [8, 32], strides = [1, 1]} : vector<16x128xbf16> to vector<8x32xbf16>
    %71 = vector.extract_strided_slice %66 {offsets = [0, 0], sizes = [8, 32], strides = [1, 1]} : vector<16x128xbf16> to vector<8x32xbf16>
    %cst_34 = arith.constant dense<0.000000e+00> : vector<8x8xf32>
    %72 = tpu.matmul %69, %70, %cst_34 {dimension_numbers = #tpu.dot_dimension_numbers<[1], [1], [0], [0], [0, 0, 1, 0], [], []>} : vector<8x32xbf16>, vector<8x32xbf16>, vector<8x8xf32> -> vector<8x8xf32>
    %73 = vector.broadcast %67 : vector<1x8xf32> to vector<8x8xf32>
    %74 = arith.addf %72, %73 : vector<8x8xf32>
    %cst_35 = arith.constant dense<0xFF800000> : vector<8xf32>
    %75 = vector.multi_reduction <maximumf>, %74, %cst_35 [1] : vector<8x8xf32> to vector<8xf32>
    %76 = vector.shape_cast %75 : vector<8xf32> to vector<8x1xf32>
    %77 = vector.broadcast %76 : vector<8x1xf32> to vector<8x8xf32>
    %78 = arith.subf %74, %77 : vector<8x8xf32>
    %79 = math.exp %78 : vector<8x8xf32>
    %cst_36 = arith.constant dense<0.000000e+00> : vector<8xf32>
    %80 = vector.multi_reduction <add>, %79, %cst_36 [1] : vector<8x8xf32> to vector<8xf32>
    %81 = vector.shape_cast %80 : vector<8xf32> to vector<8x1xf32>
    %82 = tpu.reciprocal %81 {approx = true} : vector<8x1xf32> -> vector<8x1xf32>
    %83 = vector.broadcast %82 : vector<8x1xf32> to vector<8x8xf32>
    %84 = arith.mulf %79, %83 : vector<8x8xf32>
    %85 = arith.truncf %84 : vector<8x8xf32> to vector<8x8xbf16>
    %cst_37 = arith.constant dense<0.000000e+00> : vector<8x32xf32>
    %86 = tpu.matmul %85, %71, %cst_37 {dimension_numbers = #tpu.dot_dimension_numbers<[1], [0], [0], [1], [0, 0, 1, 1], [], []>} : vector<8x8xbf16>, vector<8x32xbf16>, vector<8x32xf32> -> vector<8x32xf32>
    %87 = arith.truncf %86 : vector<8x32xf32> to vector<8x32xbf16>
    %88 = vector.extract_strided_slice %45 {offsets = [0, 0], sizes = [32, 128], strides = [1, 1]} : vector<128x128xbf16> to vector<32x128xbf16>
    %cst_38 = arith.constant dense<0.000000e+00> : vector<8x128xf32>
    %89 = tpu.matmul %87, %88, %cst_38 {dimension_numbers = #tpu.dot_dimension_numbers<[1], [0], [0], [1], [0, 0, 1, 1], [], []>} : vector<8x32xbf16>, vector<32x128xbf16>, vector<8x128xf32> -> vector<8x128xf32>
    %90 = arith.addf %68, %89 : vector<8x128xf32>
    %91 = vector.extract_strided_slice %56 {offsets = [0, 32], sizes = [8, 32], strides = [1, 1]} : vector<16x128xbf16> to vector<8x32xbf16>
    %92 = vector.extract_strided_slice %61 {offsets = [0, 32], sizes = [8, 32], strides = [1, 1]} : vector<16x128xbf16> to vector<8x32xbf16>
    %93 = vector.extract_strided_slice %66 {offsets = [0, 32], sizes = [8, 32], strides = [1, 1]} : vector<16x128xbf16> to vector<8x32xbf16>
    %cst_39 = arith.constant dense<0.000000e+00> : vector<8x8xf32>
    %94 = tpu.matmul %91, %92, %cst_39 {dimension_numbers = #tpu.dot_dimension_numbers<[1], [1], [0], [0], [0, 0, 1, 0], [], []>} : vector<8x32xbf16>, vector<8x32xbf16>, vector<8x8xf32> -> vector<8x8xf32>
    %95 = vector.broadcast %67 : vector<1x8xf32> to vector<8x8xf32>
    %96 = arith.addf %94, %95 : vector<8x8xf32>
    %cst_40 = arith.constant dense<0xFF800000> : vector<8xf32>
    %97 = vector.multi_reduction <maximumf>, %96, %cst_40 [1] : vector<8x8xf32> to vector<8xf32>
    %98 = vector.shape_cast %97 : vector<8xf32> to vector<8x1xf32>
    %99 = vector.broadcast %98 : vector<8x1xf32> to vector<8x8xf32>
    %100 = arith.subf %96, %99 : vector<8x8xf32>
    %101 = math.exp %100 : vector<8x8xf32>
    %cst_41 = arith.constant dense<0.000000e+00> : vector<8xf32>
    %102 = vector.multi_reduction <add>, %101, %cst_41 [1] : vector<8x8xf32> to vector<8xf32>
    %103 = vector.shape_cast %102 : vector<8xf32> to vector<8x1xf32>
    %104 = tpu.reciprocal %103 {approx = true} : vector<8x1xf32> -> vector<8x1xf32>
    %105 = vector.broadcast %104 : vector<8x1xf32> to vector<8x8xf32>
    %106 = arith.mulf %101, %105 : vector<8x8xf32>
    %107 = arith.truncf %106 : vector<8x8xf32> to vector<8x8xbf16>
    %cst_42 = arith.constant dense<0.000000e+00> : vector<8x32xf32>
    %108 = tpu.matmul %107, %93, %cst_42 {dimension_numbers = #tpu.dot_dimension_numbers<[1], [0], [0], [1], [0, 0, 1, 1], [], []>} : vector<8x8xbf16>, vector<8x32xbf16>, vector<8x32xf32> -> vector<8x32xf32>
    %109 = arith.truncf %108 : vector<8x32xf32> to vector<8x32xbf16>
    %110 = vector.extract_strided_slice %45 {offsets = [32, 0], sizes = [32, 128], strides = [1, 1]} : vector<128x128xbf16> to vector<32x128xbf16>
    %cst_43 = arith.constant dense<0.000000e+00> : vector<8x128xf32>
    %111 = tpu.matmul %109, %110, %cst_43 {dimension_numbers = #tpu.dot_dimension_numbers<[1], [0], [0], [1], [0, 0, 1, 1], [], []>} : vector<8x32xbf16>, vector<32x128xbf16>, vector<8x128xf32> -> vector<8x128xf32>
    %112 = arith.addf %90, %111 : vector<8x128xf32>
    %113 = vector.extract_strided_slice %56 {offsets = [0, 64], sizes = [8, 32], strides = [1, 1]} : vector<16x128xbf16> to vector<8x32xbf16>
    %114 = vector.extract_strided_slice %61 {offsets = [0, 64], sizes = [8, 32], strides = [1, 1]} : vector<16x128xbf16> to vector<8x32xbf16>
    %115 = vector.extract_strided_slice %66 {offsets = [0, 64], sizes = [8, 32], strides = [1, 1]} : vector<16x128xbf16> to vector<8x32xbf16>
    %cst_44 = arith.constant dense<0.000000e+00> : vector<8x8xf32>
    %116 = tpu.matmul %113, %114, %cst_44 {dimension_numbers = #tpu.dot_dimension_numbers<[1], [1], [0], [0], [0, 0, 1, 0], [], []>} : vector<8x32xbf16>, vector<8x32xbf16>, vector<8x8xf32> -> vector<8x8xf32>
    %117 = vector.broadcast %67 : vector<1x8xf32> to vector<8x8xf32>
    %118 = arith.addf %116, %117 : vector<8x8xf32>
    %cst_45 = arith.constant dense<0xFF800000> : vector<8xf32>
    %119 = vector.multi_reduction <maximumf>, %118, %cst_45 [1] : vector<8x8xf32> to vector<8xf32>
    %120 = vector.shape_cast %119 : vector<8xf32> to vector<8x1xf32>
    %121 = vector.broadcast %120 : vector<8x1xf32> to vector<8x8xf32>
    %122 = arith.subf %118, %121 : vector<8x8xf32>
    %123 = math.exp %122 : vector<8x8xf32>
    %cst_46 = arith.constant dense<0.000000e+00> : vector<8xf32>
    %124 = vector.multi_reduction <add>, %123, %cst_46 [1] : vector<8x8xf32> to vector<8xf32>
    %125 = vector.shape_cast %124 : vector<8xf32> to vector<8x1xf32>
    %126 = tpu.reciprocal %125 {approx = true} : vector<8x1xf32> -> vector<8x1xf32>
    %127 = vector.broadcast %126 : vector<8x1xf32> to vector<8x8xf32>
    %128 = arith.mulf %123, %127 : vector<8x8xf32>
    %129 = arith.truncf %128 : vector<8x8xf32> to vector<8x8xbf16>
    %cst_47 = arith.constant dense<0.000000e+00> : vector<8x32xf32>
    %130 = tpu.matmul %129, %115, %cst_47 {dimension_numbers = #tpu.dot_dimension_numbers<[1], [0], [0], [1], [0, 0, 1, 1], [], []>} : vector<8x8xbf16>, vector<8x32xbf16>, vector<8x32xf32> -> vector<8x32xf32>
    %131 = arith.truncf %130 : vector<8x32xf32> to vector<8x32xbf16>
    %132 = vector.extract_strided_slice %45 {offsets = [64, 0], sizes = [32, 128], strides = [1, 1]} : vector<128x128xbf16> to vector<32x128xbf16>
    %cst_48 = arith.constant dense<0.000000e+00> : vector<8x128xf32>
    %133 = tpu.matmul %131, %132, %cst_48 {dimension_numbers = #tpu.dot_dimension_numbers<[1], [0], [0], [1], [0, 0, 1, 1], [], []>} : vector<8x32xbf16>, vector<32x128xbf16>, vector<8x128xf32> -> vector<8x128xf32>
    %134 = arith.addf %112, %133 : vector<8x128xf32>
    %135 = vector.extract_strided_slice %56 {offsets = [0, 96], sizes = [8, 32], strides = [1, 1]} : vector<16x128xbf16> to vector<8x32xbf16>
    %136 = vector.extract_strided_slice %61 {offsets = [0, 96], sizes = [8, 32], strides = [1, 1]} : vector<16x128xbf16> to vector<8x32xbf16>
    %137 = vector.extract_strided_slice %66 {offsets = [0, 96], sizes = [8, 32], strides = [1, 1]} : vector<16x128xbf16> to vector<8x32xbf16>
    %cst_49 = arith.constant dense<0.000000e+00> : vector<8x8xf32>
    %138 = tpu.matmul %135, %136, %cst_49 {dimension_numbers = #tpu.dot_dimension_numbers<[1], [1], [0], [0], [0, 0, 1, 0], [], []>} : vector<8x32xbf16>, vector<8x32xbf16>, vector<8x8xf32> -> vector<8x8xf32>
    %139 = vector.broadcast %67 : vector<1x8xf32> to vector<8x8xf32>
    %140 = arith.addf %138, %139 : vector<8x8xf32>
    %cst_50 = arith.constant dense<0xFF800000> : vector<8xf32>
    %141 = vector.multi_reduction <maximumf>, %140, %cst_50 [1] : vector<8x8xf32> to vector<8xf32>
    %142 = vector.shape_cast %141 : vector<8xf32> to vector<8x1xf32>
    %143 = vector.broadcast %142 : vector<8x1xf32> to vector<8x8xf32>
    %144 = arith.subf %140, %143 : vector<8x8xf32>
    %145 = math.exp %144 : vector<8x8xf32>
    %cst_51 = arith.constant dense<0.000000e+00> : vector<8xf32>
    %146 = vector.multi_reduction <add>, %145, %cst_51 [1] : vector<8x8xf32> to vector<8xf32>
    %147 = vector.shape_cast %146 : vector<8xf32> to vector<8x1xf32>
    %148 = tpu.reciprocal %147 {approx = true} : vector<8x1xf32> -> vector<8x1xf32>
    %149 = vector.broadcast %148 : vector<8x1xf32> to vector<8x8xf32>
    %150 = arith.mulf %145, %149 : vector<8x8xf32>
    %151 = arith.truncf %150 : vector<8x8xf32> to vector<8x8xbf16>
    %cst_52 = arith.constant dense<0.000000e+00> : vector<8x32xf32>
    %152 = tpu.matmul %151, %137, %cst_52 {dimension_numbers = #tpu.dot_dimension_numbers<[1], [0], [0], [1], [0, 0, 1, 1], [], []>} : vector<8x8xbf16>, vector<8x32xbf16>, vector<8x32xf32> -> vector<8x32xf32>
    %153 = arith.truncf %152 : vector<8x32xf32> to vector<8x32xbf16>
    %154 = vector.extract_strided_slice %45 {offsets = [96, 0], sizes = [32, 128], strides = [1, 1]} : vector<128x128xbf16> to vector<32x128xbf16>
    %cst_53 = arith.constant dense<0.000000e+00> : vector<8x128xf32>
    %155 = tpu.matmul %153, %154, %cst_53 {dimension_numbers = #tpu.dot_dimension_numbers<[1], [0], [0], [1], [0, 0, 1, 1], [], []>} : vector<8x32xbf16>, vector<32x128xbf16>, vector<8x128xf32> -> vector<8x128xf32>
    %156 = arith.addf %134, %155 : vector<8x128xf32>
    %157 = vector.extract_strided_slice %41 {offsets = [1, 0], sizes = [1, 8], strides = [1, 1]} : vector<2x8xf32> to vector<1x8xf32>
    %cst_54 = arith.constant 0.000000e+00 : f32
    %158 = vector.broadcast %cst_54 : f32 to vector<8x128xf32>
    %159 = vector.extract_strided_slice %56 {offsets = [8, 0], sizes = [8, 32], strides = [1, 1]} : vector<16x128xbf16> to vector<8x32xbf16>
    %160 = vector.extract_strided_slice %61 {offsets = [8, 0], sizes = [8, 32], strides = [1, 1]} : vector<16x128xbf16> to vector<8x32xbf16>
    %161 = vector.extract_strided_slice %66 {offsets = [8, 0], sizes = [8, 32], strides = [1, 1]} : vector<16x128xbf16> to vector<8x32xbf16>
    %cst_55 = arith.constant dense<0.000000e+00> : vector<8x8xf32>
    %162 = tpu.matmul %159, %160, %cst_55 {dimension_numbers = #tpu.dot_dimension_numbers<[1], [1], [0], [0], [0, 0, 1, 0], [], []>} : vector<8x32xbf16>, vector<8x32xbf16>, vector<8x8xf32> -> vector<8x8xf32>
    %163 = vector.broadcast %157 : vector<1x8xf32> to vector<8x8xf32>
    %164 = arith.addf %162, %163 : vector<8x8xf32>
    %cst_56 = arith.constant dense<0xFF800000> : vector<8xf32>
    %165 = vector.multi_reduction <maximumf>, %164, %cst_56 [1] : vector<8x8xf32> to vector<8xf32>
    %166 = vector.shape_cast %165 : vector<8xf32> to vector<8x1xf32>
    %167 = vector.broadcast %166 : vector<8x1xf32> to vector<8x8xf32>
    %168 = arith.subf %164, %167 : vector<8x8xf32>
    %169 = math.exp %168 : vector<8x8xf32>
    %cst_57 = arith.constant dense<0.000000e+00> : vector<8xf32>
    %170 = vector.multi_reduction <add>, %169, %cst_57 [1] : vector<8x8xf32> to vector<8xf32>
    %171 = vector.shape_cast %170 : vector<8xf32> to vector<8x1xf32>
    %172 = tpu.reciprocal %171 {approx = true} : vector<8x1xf32> -> vector<8x1xf32>
    %173 = vector.broadcast %172 : vector<8x1xf32> to vector<8x8xf32>
    %174 = arith.mulf %169, %173 : vector<8x8xf32>
    %175 = arith.truncf %174 : vector<8x8xf32> to vector<8x8xbf16>
    %cst_58 = arith.constant dense<0.000000e+00> : vector<8x32xf32>
    %176 = tpu.matmul %175, %161, %cst_58 {dimension_numbers = #tpu.dot_dimension_numbers<[1], [0], [0], [1], [0, 0, 1, 1], [], []>} : vector<8x8xbf16>, vector<8x32xbf16>, vector<8x32xf32> -> vector<8x32xf32>
    %177 = arith.truncf %176 : vector<8x32xf32> to vector<8x32xbf16>
    %178 = vector.extract_strided_slice %45 {offsets = [0, 0], sizes = [32, 128], strides = [1, 1]} : vector<128x128xbf16> to vector<32x128xbf16>
    %cst_59 = arith.constant dense<0.000000e+00> : vector<8x128xf32>
    %179 = tpu.matmul %177, %178, %cst_59 {dimension_numbers = #tpu.dot_dimension_numbers<[1], [0], [0], [1], [0, 0, 1, 1], [], []>} : vector<8x32xbf16>, vector<32x128xbf16>, vector<8x128xf32> -> vector<8x128xf32>
    %180 = arith.addf %158, %179 : vector<8x128xf32>
    %181 = vector.extract_strided_slice %56 {offsets = [8, 32], sizes = [8, 32], strides = [1, 1]} : vector<16x128xbf16> to vector<8x32xbf16>
    %182 = vector.extract_strided_slice %61 {offsets = [8, 32], sizes = [8, 32], strides = [1, 1]} : vector<16x128xbf16> to vector<8x32xbf16>
    %183 = vector.extract_strided_slice %66 {offsets = [8, 32], sizes = [8, 32], strides = [1, 1]} : vector<16x128xbf16> to vector<8x32xbf16>
    %cst_60 = arith.constant dense<0.000000e+00> : vector<8x8xf32>
    %184 = tpu.matmul %181, %182, %cst_60 {dimension_numbers = #tpu.dot_dimension_numbers<[1], [1], [0], [0], [0, 0, 1, 0], [], []>} : vector<8x32xbf16>, vector<8x32xbf16>, vector<8x8xf32> -> vector<8x8xf32>
    %185 = vector.broadcast %157 : vector<1x8xf32> to vector<8x8xf32>
    %186 = arith.addf %184, %185 : vector<8x8xf32>
    %cst_61 = arith.constant dense<0xFF800000> : vector<8xf32>
    %187 = vector.multi_reduction <maximumf>, %186, %cst_61 [1] : vector<8x8xf32> to vector<8xf32>
    %188 = vector.shape_cast %187 : vector<8xf32> to vector<8x1xf32>
    %189 = vector.broadcast %188 : vector<8x1xf32> to vector<8x8xf32>
    %190 = arith.subf %186, %189 : vector<8x8xf32>
    %191 = math.exp %190 : vector<8x8xf32>
    %cst_62 = arith.constant dense<0.000000e+00> : vector<8xf32>
    %192 = vector.multi_reduction <add>, %191, %cst_62 [1] : vector<8x8xf32> to vector<8xf32>
    %193 = vector.shape_cast %192 : vector<8xf32> to vector<8x1xf32>
    %194 = tpu.reciprocal %193 {approx = true} : vector<8x1xf32> -> vector<8x1xf32>
    %195 = vector.broadcast %194 : vector<8x1xf32> to vector<8x8xf32>
    %196 = arith.mulf %191, %195 : vector<8x8xf32>
    %197 = arith.truncf %196 : vector<8x8xf32> to vector<8x8xbf16>
    %cst_63 = arith.constant dense<0.000000e+00> : vector<8x32xf32>
    %198 = tpu.matmul %197, %183, %cst_63 {dimension_numbers = #tpu.dot_dimension_numbers<[1], [0], [0], [1], [0, 0, 1, 1], [], []>} : vector<8x8xbf16>, vector<8x32xbf16>, vector<8x32xf32> -> vector<8x32xf32>
    %199 = arith.truncf %198 : vector<8x32xf32> to vector<8x32xbf16>
    %200 = vector.extract_strided_slice %45 {offsets = [32, 0], sizes = [32, 128], strides = [1, 1]} : vector<128x128xbf16> to vector<32x128xbf16>
    %cst_64 = arith.constant dense<0.000000e+00> : vector<8x128xf32>
    %201 = tpu.matmul %199, %200, %cst_64 {dimension_numbers = #tpu.dot_dimension_numbers<[1], [0], [0], [1], [0, 0, 1, 1], [], []>} : vector<8x32xbf16>, vector<32x128xbf16>, vector<8x128xf32> -> vector<8x128xf32>
    %202 = arith.addf %180, %201 : vector<8x128xf32>
    %203 = vector.extract_strided_slice %56 {offsets = [8, 64], sizes = [8, 32], strides = [1, 1]} : vector<16x128xbf16> to vector<8x32xbf16>
    %204 = vector.extract_strided_slice %61 {offsets = [8, 64], sizes = [8, 32], strides = [1, 1]} : vector<16x128xbf16> to vector<8x32xbf16>
    %205 = vector.extract_strided_slice %66 {offsets = [8, 64], sizes = [8, 32], strides = [1, 1]} : vector<16x128xbf16> to vector<8x32xbf16>
    %cst_65 = arith.constant dense<0.000000e+00> : vector<8x8xf32>
    %206 = tpu.matmul %203, %204, %cst_65 {dimension_numbers = #tpu.dot_dimension_numbers<[1], [1], [0], [0], [0, 0, 1, 0], [], []>} : vector<8x32xbf16>, vector<8x32xbf16>, vector<8x8xf32> -> vector<8x8xf32>
    %207 = vector.broadcast %157 : vector<1x8xf32> to vector<8x8xf32>
    %208 = arith.addf %206, %207 : vector<8x8xf32>
    %cst_66 = arith.constant dense<0xFF800000> : vector<8xf32>
    %209 = vector.multi_reduction <maximumf>, %208, %cst_66 [1] : vector<8x8xf32> to vector<8xf32>
    %210 = vector.shape_cast %209 : vector<8xf32> to vector<8x1xf32>
    %211 = vector.broadcast %210 : vector<8x1xf32> to vector<8x8xf32>
    %212 = arith.subf %208, %211 : vector<8x8xf32>
    %213 = math.exp %212 : vector<8x8xf32>
    %cst_67 = arith.constant dense<0.000000e+00> : vector<8xf32>
    %214 = vector.multi_reduction <add>, %213, %cst_67 [1] : vector<8x8xf32> to vector<8xf32>
    %215 = vector.shape_cast %214 : vector<8xf32> to vector<8x1xf32>
    %216 = tpu.reciprocal %215 {approx = true} : vector<8x1xf32> -> vector<8x1xf32>
    %217 = vector.broadcast %216 : vector<8x1xf32> to vector<8x8xf32>
    %218 = arith.mulf %213, %217 : vector<8x8xf32>
    %219 = arith.truncf %218 : vector<8x8xf32> to vector<8x8xbf16>
    %cst_68 = arith.constant dense<0.000000e+00> : vector<8x32xf32>
    %220 = tpu.matmul %219, %205, %cst_68 {dimension_numbers = #tpu.dot_dimension_numbers<[1], [0], [0], [1], [0, 0, 1, 1], [], []>} : vector<8x8xbf16>, vector<8x32xbf16>, vector<8x32xf32> -> vector<8x32xf32>
    %221 = arith.truncf %220 : vector<8x32xf32> to vector<8x32xbf16>
    %222 = vector.extract_strided_slice %45 {offsets = [64, 0], sizes = [32, 128], strides = [1, 1]} : vector<128x128xbf16> to vector<32x128xbf16>
    %cst_69 = arith.constant dense<0.000000e+00> : vector<8x128xf32>
    %223 = tpu.matmul %221, %222, %cst_69 {dimension_numbers = #tpu.dot_dimension_numbers<[1], [0], [0], [1], [0, 0, 1, 1], [], []>} : vector<8x32xbf16>, vector<32x128xbf16>, vector<8x128xf32> -> vector<8x128xf32>
    %224 = arith.addf %202, %223 : vector<8x128xf32>
    %225 = vector.extract_strided_slice %56 {offsets = [8, 96], sizes = [8, 32], strides = [1, 1]} : vector<16x128xbf16> to vector<8x32xbf16>
    %226 = vector.extract_strided_slice %61 {offsets = [8, 96], sizes = [8, 32], strides = [1, 1]} : vector<16x128xbf16> to vector<8x32xbf16>
    %227 = vector.extract_strided_slice %66 {offsets = [8, 96], sizes = [8, 32], strides = [1, 1]} : vector<16x128xbf16> to vector<8x32xbf16>
    %cst_70 = arith.constant dense<0.000000e+00> : vector<8x8xf32>
    %228 = tpu.matmul %225, %226, %cst_70 {dimension_numbers = #tpu.dot_dimension_numbers<[1], [1], [0], [0], [0, 0, 1, 0], [], []>} : vector<8x32xbf16>, vector<8x32xbf16>, vector<8x8xf32> -> vector<8x8xf32>
    %229 = vector.broadcast %157 : vector<1x8xf32> to vector<8x8xf32>
    %230 = arith.addf %228, %229 : vector<8x8xf32>
    %cst_71 = arith.constant dense<0xFF800000> : vector<8xf32>
    %231 = vector.multi_reduction <maximumf>, %230, %cst_71 [1] : vector<8x8xf32> to vector<8xf32>
    %232 = vector.shape_cast %231 : vector<8xf32> to vector<8x1xf32>
    %233 = vector.broadcast %232 : vector<8x1xf32> to vector<8x8xf32>
    %234 = arith.subf %230, %233 : vector<8x8xf32>
    %235 = math.exp %234 : vector<8x8xf32>
    %cst_72 = arith.constant dense<0.000000e+00> : vector<8xf32>
    %236 = vector.multi_reduction <add>, %235, %cst_72 [1] : vector<8x8xf32> to vector<8xf32>
    %237 = vector.shape_cast %236 : vector<8xf32> to vector<8x1xf32>
    %238 = tpu.reciprocal %237 {approx = true} : vector<8x1xf32> -> vector<8x1xf32>
    %239 = vector.broadcast %238 : vector<8x1xf32> to vector<8x8xf32>
    %240 = arith.mulf %235, %239 : vector<8x8xf32>
    %241 = arith.truncf %240 : vector<8x8xf32> to vector<8x8xbf16>
    %cst_73 = arith.constant dense<0.000000e+00> : vector<8x32xf32>
    %242 = tpu.matmul %241, %227, %cst_73 {dimension_numbers = #tpu.dot_dimension_numbers<[1], [0], [0], [1], [0, 0, 1, 1], [], []>} : vector<8x8xbf16>, vector<8x32xbf16>, vector<8x32xf32> -> vector<8x32xf32>
    %243 = arith.truncf %242 : vector<8x32xf32> to vector<8x32xbf16>
    %244 = vector.extract_strided_slice %45 {offsets = [96, 0], sizes = [32, 128], strides = [1, 1]} : vector<128x128xbf16> to vector<32x128xbf16>
    %cst_74 = arith.constant dense<0.000000e+00> : vector<8x128xf32>
    %245 = tpu.matmul %243, %244, %cst_74 {dimension_numbers = #tpu.dot_dimension_numbers<[1], [0], [0], [1], [0, 0, 1, 1], [], []>} : vector<8x32xbf16>, vector<32x128xbf16>, vector<8x128xf32> -> vector<8x128xf32>
    %246 = arith.addf %224, %245 : vector<8x128xf32>
    %247 = tpu.concatenate %156, %246 in 0 : vector<8x128xf32>, vector<8x128xf32> -> vector<16x128xf32>
    %c5 = arith.constant 5 : index
    %c0_75 = arith.constant 0 : index
    %248 = vector.load %arg5[%c5, %c0_75] : memref<21x128xf32, #tpu.memory_space<vmem>>, vector<1x128xf32>
    %249 = vector.broadcast %248 : vector<1x128xf32> to vector<16x128xf32>
    %250 = arith.addf %247, %249 : vector<16x128xf32>
    %251 = arith.addf %250, %35 : vector<16x128xf32>
    %c6 = arith.constant 6 : index
    %c0_76 = arith.constant 0 : index
    %252 = vector.load %arg5[%c6, %c0_76] : memref<21x128xf32, #tpu.memory_space<vmem>>, vector<1x128xf32>
    %c7 = arith.constant 7 : index
    %c0_77 = arith.constant 0 : index
    %253 = vector.load %arg5[%c7, %c0_77] : memref<21x128xf32, #tpu.memory_space<vmem>>, vector<1x128xf32>
    %cst_78 = arith.constant dense<0.000000e+00> : vector<16xf32>
    %254 = vector.multi_reduction <add>, %251, %cst_78 [1] : vector<16x128xf32> to vector<16xf32>
    %255 = vector.shape_cast %254 : vector<16xf32> to vector<16x1xf32>
    %cst_79 = arith.constant 1.280000e+02 : f32
    %256 = vector.broadcast %cst_79 : f32 to vector<16x1xf32>
    %257 = arith.divf %255, %256 : vector<16x1xf32>
    %258 = vector.broadcast %257 : vector<16x1xf32> to vector<16x128xf32>
    %259 = arith.subf %251, %258 : vector<16x128xf32>
    %260 = arith.mulf %259, %259 : vector<16x128xf32>
    %cst_80 = arith.constant dense<0.000000e+00> : vector<16xf32>
    %261 = vector.multi_reduction <add>, %260, %cst_80 [1] : vector<16x128xf32> to vector<16xf32>
    %262 = vector.shape_cast %261 : vector<16xf32> to vector<16x1xf32>
    %cst_81 = arith.constant 1.280000e+02 : f32
    %263 = vector.broadcast %cst_81 : f32 to vector<16x1xf32>
    %264 = arith.divf %262, %263 : vector<16x1xf32>
    %265 = vector.broadcast %257 : vector<16x1xf32> to vector<16x128xf32>
    %266 = arith.subf %251, %265 : vector<16x128xf32>
    %cst_82 = arith.constant 9.99999996E-13 : f32
    %267 = vector.broadcast %cst_82 : f32 to vector<16x1xf32>
    %268 = arith.addf %264, %267 : vector<16x1xf32>
    %269 = math.rsqrt %268 : vector<16x1xf32>
    %270 = vector.broadcast %269 : vector<16x1xf32> to vector<16x128xf32>
    %271 = arith.mulf %266, %270 : vector<16x128xf32>
    %272 = vector.broadcast %252 : vector<1x128xf32> to vector<16x128xf32>
    %273 = arith.mulf %271, %272 : vector<16x128xf32>
    %274 = vector.broadcast %253 : vector<1x128xf32> to vector<16x128xf32>
    %275 = arith.addf %273, %274 : vector<16x128xf32>
    %276 = arith.truncf %275 : vector<16x128xf32> to vector<16x128xbf16>
    %cst_83 = arith.constant dense<0.000000e+00> : vector<16x256xf32>
    %277 = tpu.matmul %276, %47, %cst_83 {dimension_numbers = #tpu.dot_dimension_numbers<[1], [0], [0], [1], [0, 0, 1, 1], [], []>} : vector<16x128xbf16>, vector<128x256xbf16>, vector<16x256xf32> -> vector<16x256xf32>
    %c0_84 = arith.constant 0 : index
    %c0_85 = arith.constant 0 : index
    %278 = vector.load %arg6[%c0_84, %c0_85] : memref<2x256xf32, #tpu.memory_space<vmem>>, vector<1x256xf32>
    %279 = vector.broadcast %278 : vector<1x256xf32> to vector<16x256xf32>
    %280 = arith.addf %277, %279 : vector<16x256xf32>
    %cst_86 = arith.constant 5.000000e-01 : f32
    %281 = vector.broadcast %cst_86 : f32 to vector<16x256xf32>
    %282 = arith.mulf %281, %280 : vector<16x256xf32>
    %cst_87 = arith.constant 4.471500e-02 : f32
    %283 = vector.broadcast %cst_87 : f32 to vector<16x256xf32>
    %284 = arith.mulf %283, %280 : vector<16x256xf32>
    %285 = arith.mulf %284, %280 : vector<16x256xf32>
    %286 = arith.mulf %285, %280 : vector<16x256xf32>
    %287 = arith.addf %280, %286 : vector<16x256xf32>
    %cst_88 = arith.constant 0.797884583 : f32
    %288 = vector.broadcast %cst_88 : f32 to vector<16x256xf32>
    %289 = arith.mulf %288, %287 : vector<16x256xf32>
    %290 = math.tanh %289 : vector<16x256xf32>
    %cst_89 = arith.constant 1.000000e+00 : f32
    %291 = vector.broadcast %cst_89 : f32 to vector<16x256xf32>
    %292 = arith.addf %291, %290 : vector<16x256xf32>
    %293 = arith.mulf %282, %292 : vector<16x256xf32>
    %294 = arith.truncf %293 : vector<16x256xf32> to vector<16x256xbf16>
    %cst_90 = arith.constant dense<0.000000e+00> : vector<16x128xf32>
    %295 = tpu.matmul %294, %49, %cst_90 {dimension_numbers = #tpu.dot_dimension_numbers<[1], [0], [0], [1], [0, 0, 1, 1], [], []>} : vector<16x256xbf16>, vector<256x128xbf16>, vector<16x128xf32> -> vector<16x128xf32>
    %c8 = arith.constant 8 : index
    %c0_91 = arith.constant 0 : index
    %296 = vector.load %arg5[%c8, %c0_91] : memref<21x128xf32, #tpu.memory_space<vmem>>, vector<1x128xf32>
    %297 = vector.broadcast %296 : vector<1x128xf32> to vector<16x128xf32>
    %298 = arith.addf %295, %297 : vector<16x128xf32>
    %299 = arith.addf %298, %275 : vector<16x128xf32>
    %c9 = arith.constant 9 : index
    %c0_92 = arith.constant 0 : index
    %300 = vector.load %arg5[%c9, %c0_92] : memref<21x128xf32, #tpu.memory_space<vmem>>, vector<1x128xf32>
    %c10 = arith.constant 10 : index
    %c0_93 = arith.constant 0 : index
    %301 = vector.load %arg5[%c10, %c0_93] : memref<21x128xf32, #tpu.memory_space<vmem>>, vector<1x128xf32>
    %cst_94 = arith.constant dense<0.000000e+00> : vector<16xf32>
    %302 = vector.multi_reduction <add>, %299, %cst_94 [1] : vector<16x128xf32> to vector<16xf32>
    %303 = vector.shape_cast %302 : vector<16xf32> to vector<16x1xf32>
    %cst_95 = arith.constant 1.280000e+02 : f32
    %304 = vector.broadcast %cst_95 : f32 to vector<16x1xf32>
    %305 = arith.divf %303, %304 : vector<16x1xf32>
    %306 = vector.broadcast %305 : vector<16x1xf32> to vector<16x128xf32>
    %307 = arith.subf %299, %306 : vector<16x128xf32>
    %308 = arith.mulf %307, %307 : vector<16x128xf32>
    %cst_96 = arith.constant dense<0.000000e+00> : vector<16xf32>
    %309 = vector.multi_reduction <add>, %308, %cst_96 [1] : vector<16x128xf32> to vector<16xf32>
    %310 = vector.shape_cast %309 : vector<16xf32> to vector<16x1xf32>
    %cst_97 = arith.constant 1.280000e+02 : f32
    %311 = vector.broadcast %cst_97 : f32 to vector<16x1xf32>
    %312 = arith.divf %310, %311 : vector<16x1xf32>
    %313 = vector.broadcast %305 : vector<16x1xf32> to vector<16x128xf32>
    %314 = arith.subf %299, %313 : vector<16x128xf32>
    %cst_98 = arith.constant 9.99999996E-13 : f32
    %315 = vector.broadcast %cst_98 : f32 to vector<16x1xf32>
    %316 = arith.addf %312, %315 : vector<16x1xf32>
    %317 = math.rsqrt %316 : vector<16x1xf32>
    %318 = vector.broadcast %317 : vector<16x1xf32> to vector<16x128xf32>
    %319 = arith.mulf %314, %318 : vector<16x128xf32>
    %320 = vector.broadcast %300 : vector<1x128xf32> to vector<16x128xf32>
    %321 = arith.mulf %319, %320 : vector<16x128xf32>
    %322 = vector.broadcast %301 : vector<1x128xf32> to vector<16x128xf32>
    %323 = arith.addf %321, %322 : vector<16x128xf32>
    %c1_99 = arith.constant 1 : index
    %c0_100 = arith.constant 0 : index
    %c0_101 = arith.constant 0 : index
    %324 = vector.load %arg7[%c1_99, %c0_100, %c0_101] : memref<2x128x384xbf16, #tpu.memory_space<vmem>>, vector<1x128x384xbf16>
    %325 = vector.shape_cast %324 : vector<1x128x384xbf16> to vector<128x384xbf16>
    %c1_102 = arith.constant 1 : index
    %c0_103 = arith.constant 0 : index
    %c0_104 = arith.constant 0 : index
    %326 = vector.load %arg8[%c1_102, %c0_103, %c0_104] : memref<2x128x128xbf16, #tpu.memory_space<vmem>>, vector<1x128x128xbf16>
    %327 = vector.shape_cast %326 : vector<1x128x128xbf16> to vector<128x128xbf16>
    %c1_105 = arith.constant 1 : index
    %c0_106 = arith.constant 0 : index
    %c0_107 = arith.constant 0 : index
    %328 = vector.load %arg9[%c1_105, %c0_106, %c0_107] : memref<2x128x256xbf16, #tpu.memory_space<vmem>>, vector<1x128x256xbf16>
    %329 = vector.shape_cast %328 : vector<1x128x256xbf16> to vector<128x256xbf16>
    %c1_108 = arith.constant 1 : index
    %c0_109 = arith.constant 0 : index
    %c0_110 = arith.constant 0 : index
    %330 = vector.load %arg10[%c1_108, %c0_109, %c0_110] : memref<2x256x128xbf16, #tpu.memory_space<vmem>>, vector<1x256x128xbf16>
    %331 = vector.shape_cast %330 : vector<1x256x128xbf16> to vector<256x128xbf16>
    %332 = arith.truncf %323 : vector<16x128xf32> to vector<16x128xbf16>
    %cst_111 = arith.constant dense<0.000000e+00> : vector<16x384xf32>
    %333 = tpu.matmul %332, %325, %cst_111 {dimension_numbers = #tpu.dot_dimension_numbers<[1], [0], [0], [1], [0, 0, 1, 1], [], []>} : vector<16x128xbf16>, vector<128x384xbf16>, vector<16x384xf32> -> vector<16x384xf32>
    %334 = vector.extract_strided_slice %333 {offsets = [0, 0], sizes = [16, 128], strides = [1, 1]} : vector<16x384xf32> to vector<16x128xf32>
    %c11 = arith.constant 11 : index
    %c0_112 = arith.constant 0 : index
    %335 = vector.load %arg5[%c11, %c0_112] : memref<21x128xf32, #tpu.memory_space<vmem>>, vector<1x128xf32>
    %336 = vector.broadcast %335 : vector<1x128xf32> to vector<16x128xf32>
    %337 = arith.addf %334, %336 : vector<16x128xf32>
    %338 = arith.truncf %337 : vector<16x128xf32> to vector<16x128xbf16>
    %339 = vector.extract_strided_slice %333 {offsets = [0, 128], sizes = [16, 128], strides = [1, 1]} : vector<16x384xf32> to vector<16x128xf32>
    %c12 = arith.constant 12 : index
    %c0_113 = arith.constant 0 : index
    %340 = vector.load %arg5[%c12, %c0_113] : memref<21x128xf32, #tpu.memory_space<vmem>>, vector<1x128xf32>
    %341 = vector.broadcast %340 : vector<1x128xf32> to vector<16x128xf32>
    %342 = arith.addf %339, %341 : vector<16x128xf32>
    %343 = arith.truncf %342 : vector<16x128xf32> to vector<16x128xbf16>
    %344 = vector.extract_strided_slice %333 {offsets = [0, 256], sizes = [16, 128], strides = [1, 1]} : vector<16x384xf32> to vector<16x128xf32>
    %c13 = arith.constant 13 : index
    %c0_114 = arith.constant 0 : index
    %345 = vector.load %arg5[%c13, %c0_114] : memref<21x128xf32, #tpu.memory_space<vmem>>, vector<1x128xf32>
    %346 = vector.broadcast %345 : vector<1x128xf32> to vector<16x128xf32>
    %347 = arith.addf %344, %346 : vector<16x128xf32>
    %348 = arith.truncf %347 : vector<16x128xf32> to vector<16x128xbf16>
    %349 = vector.extract_strided_slice %41 {offsets = [0, 0], sizes = [1, 8], strides = [1, 1]} : vector<2x8xf32> to vector<1x8xf32>
    %cst_115 = arith.constant 0.000000e+00 : f32
    %350 = vector.broadcast %cst_115 : f32 to vector<8x128xf32>
    %351 = vector.extract_strided_slice %338 {offsets = [0, 0], sizes = [8, 32], strides = [1, 1]} : vector<16x128xbf16> to vector<8x32xbf16>
    %352 = vector.extract_strided_slice %343 {offsets = [0, 0], sizes = [8, 32], strides = [1, 1]} : vector<16x128xbf16> to vector<8x32xbf16>
    %353 = vector.extract_strided_slice %348 {offsets = [0, 0], sizes = [8, 32], strides = [1, 1]} : vector<16x128xbf16> to vector<8x32xbf16>
    %cst_116 = arith.constant dense<0.000000e+00> : vector<8x8xf32>
    %354 = tpu.matmul %351, %352, %cst_116 {dimension_numbers = #tpu.dot_dimension_numbers<[1], [1], [0], [0], [0, 0, 1, 0], [], []>} : vector<8x32xbf16>, vector<8x32xbf16>, vector<8x8xf32> -> vector<8x8xf32>
    %355 = vector.broadcast %349 : vector<1x8xf32> to vector<8x8xf32>
    %356 = arith.addf %354, %355 : vector<8x8xf32>
    %cst_117 = arith.constant dense<0xFF800000> : vector<8xf32>
    %357 = vector.multi_reduction <maximumf>, %356, %cst_117 [1] : vector<8x8xf32> to vector<8xf32>
    %358 = vector.shape_cast %357 : vector<8xf32> to vector<8x1xf32>
    %359 = vector.broadcast %358 : vector<8x1xf32> to vector<8x8xf32>
    %360 = arith.subf %356, %359 : vector<8x8xf32>
    %361 = math.exp %360 : vector<8x8xf32>
    %cst_118 = arith.constant dense<0.000000e+00> : vector<8xf32>
    %362 = vector.multi_reduction <add>, %361, %cst_118 [1] : vector<8x8xf32> to vector<8xf32>
    %363 = vector.shape_cast %362 : vector<8xf32> to vector<8x1xf32>
    %364 = tpu.reciprocal %363 {approx = true} : vector<8x1xf32> -> vector<8x1xf32>
    %365 = vector.broadcast %364 : vector<8x1xf32> to vector<8x8xf32>
    %366 = arith.mulf %361, %365 : vector<8x8xf32>
    %367 = arith.truncf %366 : vector<8x8xf32> to vector<8x8xbf16>
    %cst_119 = arith.constant dense<0.000000e+00> : vector<8x32xf32>
    %368 = tpu.matmul %367, %353, %cst_119 {dimension_numbers = #tpu.dot_dimension_numbers<[1], [0], [0], [1], [0, 0, 1, 1], [], []>} : vector<8x8xbf16>, vector<8x32xbf16>, vector<8x32xf32> -> vector<8x32xf32>
    %369 = arith.truncf %368 : vector<8x32xf32> to vector<8x32xbf16>
    %370 = vector.extract_strided_slice %327 {offsets = [0, 0], sizes = [32, 128], strides = [1, 1]} : vector<128x128xbf16> to vector<32x128xbf16>
    %cst_120 = arith.constant dense<0.000000e+00> : vector<8x128xf32>
    %371 = tpu.matmul %369, %370, %cst_120 {dimension_numbers = #tpu.dot_dimension_numbers<[1], [0], [0], [1], [0, 0, 1, 1], [], []>} : vector<8x32xbf16>, vector<32x128xbf16>, vector<8x128xf32> -> vector<8x128xf32>
    %372 = arith.addf %350, %371 : vector<8x128xf32>
    %373 = vector.extract_strided_slice %338 {offsets = [0, 32], sizes = [8, 32], strides = [1, 1]} : vector<16x128xbf16> to vector<8x32xbf16>
    %374 = vector.extract_strided_slice %343 {offsets = [0, 32], sizes = [8, 32], strides = [1, 1]} : vector<16x128xbf16> to vector<8x32xbf16>
    %375 = vector.extract_strided_slice %348 {offsets = [0, 32], sizes = [8, 32], strides = [1, 1]} : vector<16x128xbf16> to vector<8x32xbf16>
    %cst_121 = arith.constant dense<0.000000e+00> : vector<8x8xf32>
    %376 = tpu.matmul %373, %374, %cst_121 {dimension_numbers = #tpu.dot_dimension_numbers<[1], [1], [0], [0], [0, 0, 1, 0], [], []>} : vector<8x32xbf16>, vector<8x32xbf16>, vector<8x8xf32> -> vector<8x8xf32>
    %377 = vector.broadcast %349 : vector<1x8xf32> to vector<8x8xf32>
    %378 = arith.addf %376, %377 : vector<8x8xf32>
    %cst_122 = arith.constant dense<0xFF800000> : vector<8xf32>
    %379 = vector.multi_reduction <maximumf>, %378, %cst_122 [1] : vector<8x8xf32> to vector<8xf32>
    %380 = vector.shape_cast %379 : vector<8xf32> to vector<8x1xf32>
    %381 = vector.broadcast %380 : vector<8x1xf32> to vector<8x8xf32>
    %382 = arith.subf %378, %381 : vector<8x8xf32>
    %383 = math.exp %382 : vector<8x8xf32>
    %cst_123 = arith.constant dense<0.000000e+00> : vector<8xf32>
    %384 = vector.multi_reduction <add>, %383, %cst_123 [1] : vector<8x8xf32> to vector<8xf32>
    %385 = vector.shape_cast %384 : vector<8xf32> to vector<8x1xf32>
    %386 = tpu.reciprocal %385 {approx = true} : vector<8x1xf32> -> vector<8x1xf32>
    %387 = vector.broadcast %386 : vector<8x1xf32> to vector<8x8xf32>
    %388 = arith.mulf %383, %387 : vector<8x8xf32>
    %389 = arith.truncf %388 : vector<8x8xf32> to vector<8x8xbf16>
    %cst_124 = arith.constant dense<0.000000e+00> : vector<8x32xf32>
    %390 = tpu.matmul %389, %375, %cst_124 {dimension_numbers = #tpu.dot_dimension_numbers<[1], [0], [0], [1], [0, 0, 1, 1], [], []>} : vector<8x8xbf16>, vector<8x32xbf16>, vector<8x32xf32> -> vector<8x32xf32>
    %391 = arith.truncf %390 : vector<8x32xf32> to vector<8x32xbf16>
    %392 = vector.extract_strided_slice %327 {offsets = [32, 0], sizes = [32, 128], strides = [1, 1]} : vector<128x128xbf16> to vector<32x128xbf16>
    %cst_125 = arith.constant dense<0.000000e+00> : vector<8x128xf32>
    %393 = tpu.matmul %391, %392, %cst_125 {dimension_numbers = #tpu.dot_dimension_numbers<[1], [0], [0], [1], [0, 0, 1, 1], [], []>} : vector<8x32xbf16>, vector<32x128xbf16>, vector<8x128xf32> -> vector<8x128xf32>
    %394 = arith.addf %372, %393 : vector<8x128xf32>
    %395 = vector.extract_strided_slice %338 {offsets = [0, 64], sizes = [8, 32], strides = [1, 1]} : vector<16x128xbf16> to vector<8x32xbf16>
    %396 = vector.extract_strided_slice %343 {offsets = [0, 64], sizes = [8, 32], strides = [1, 1]} : vector<16x128xbf16> to vector<8x32xbf16>
    %397 = vector.extract_strided_slice %348 {offsets = [0, 64], sizes = [8, 32], strides = [1, 1]} : vector<16x128xbf16> to vector<8x32xbf16>
    %cst_126 = arith.constant dense<0.000000e+00> : vector<8x8xf32>
    %398 = tpu.matmul %395, %396, %cst_126 {dimension_numbers = #tpu.dot_dimension_numbers<[1], [1], [0], [0], [0, 0, 1, 0], [], []>} : vector<8x32xbf16>, vector<8x32xbf16>, vector<8x8xf32> -> vector<8x8xf32>
    %399 = vector.broadcast %349 : vector<1x8xf32> to vector<8x8xf32>
    %400 = arith.addf %398, %399 : vector<8x8xf32>
    %cst_127 = arith.constant dense<0xFF800000> : vector<8xf32>
    %401 = vector.multi_reduction <maximumf>, %400, %cst_127 [1] : vector<8x8xf32> to vector<8xf32>
    %402 = vector.shape_cast %401 : vector<8xf32> to vector<8x1xf32>
    %403 = vector.broadcast %402 : vector<8x1xf32> to vector<8x8xf32>
    %404 = arith.subf %400, %403 : vector<8x8xf32>
    %405 = math.exp %404 : vector<8x8xf32>
    %cst_128 = arith.constant dense<0.000000e+00> : vector<8xf32>
    %406 = vector.multi_reduction <add>, %405, %cst_128 [1] : vector<8x8xf32> to vector<8xf32>
    %407 = vector.shape_cast %406 : vector<8xf32> to vector<8x1xf32>
    %408 = tpu.reciprocal %407 {approx = true} : vector<8x1xf32> -> vector<8x1xf32>
    %409 = vector.broadcast %408 : vector<8x1xf32> to vector<8x8xf32>
    %410 = arith.mulf %405, %409 : vector<8x8xf32>
    %411 = arith.truncf %410 : vector<8x8xf32> to vector<8x8xbf16>
    %cst_129 = arith.constant dense<0.000000e+00> : vector<8x32xf32>
    %412 = tpu.matmul %411, %397, %cst_129 {dimension_numbers = #tpu.dot_dimension_numbers<[1], [0], [0], [1], [0, 0, 1, 1], [], []>} : vector<8x8xbf16>, vector<8x32xbf16>, vector<8x32xf32> -> vector<8x32xf32>
    %413 = arith.truncf %412 : vector<8x32xf32> to vector<8x32xbf16>
    %414 = vector.extract_strided_slice %327 {offsets = [64, 0], sizes = [32, 128], strides = [1, 1]} : vector<128x128xbf16> to vector<32x128xbf16>
    %cst_130 = arith.constant dense<0.000000e+00> : vector<8x128xf32>
    %415 = tpu.matmul %413, %414, %cst_130 {dimension_numbers = #tpu.dot_dimension_numbers<[1], [0], [0], [1], [0, 0, 1, 1], [], []>} : vector<8x32xbf16>, vector<32x128xbf16>, vector<8x128xf32> -> vector<8x128xf32>
    %416 = arith.addf %394, %415 : vector<8x128xf32>
    %417 = vector.extract_strided_slice %338 {offsets = [0, 96], sizes = [8, 32], strides = [1, 1]} : vector<16x128xbf16> to vector<8x32xbf16>
    %418 = vector.extract_strided_slice %343 {offsets = [0, 96], sizes = [8, 32], strides = [1, 1]} : vector<16x128xbf16> to vector<8x32xbf16>
    %419 = vector.extract_strided_slice %348 {offsets = [0, 96], sizes = [8, 32], strides = [1, 1]} : vector<16x128xbf16> to vector<8x32xbf16>
    %cst_131 = arith.constant dense<0.000000e+00> : vector<8x8xf32>
    %420 = tpu.matmul %417, %418, %cst_131 {dimension_numbers = #tpu.dot_dimension_numbers<[1], [1], [0], [0], [0, 0, 1, 0], [], []>} : vector<8x32xbf16>, vector<8x32xbf16>, vector<8x8xf32> -> vector<8x8xf32>
    %421 = vector.broadcast %349 : vector<1x8xf32> to vector<8x8xf32>
    %422 = arith.addf %420, %421 : vector<8x8xf32>
    %cst_132 = arith.constant dense<0xFF800000> : vector<8xf32>
    %423 = vector.multi_reduction <maximumf>, %422, %cst_132 [1] : vector<8x8xf32> to vector<8xf32>
    %424 = vector.shape_cast %423 : vector<8xf32> to vector<8x1xf32>
    %425 = vector.broadcast %424 : vector<8x1xf32> to vector<8x8xf32>
    %426 = arith.subf %422, %425 : vector<8x8xf32>
    %427 = math.exp %426 : vector<8x8xf32>
    %cst_133 = arith.constant dense<0.000000e+00> : vector<8xf32>
    %428 = vector.multi_reduction <add>, %427, %cst_133 [1] : vector<8x8xf32> to vector<8xf32>
    %429 = vector.shape_cast %428 : vector<8xf32> to vector<8x1xf32>
    %430 = tpu.reciprocal %429 {approx = true} : vector<8x1xf32> -> vector<8x1xf32>
    %431 = vector.broadcast %430 : vector<8x1xf32> to vector<8x8xf32>
    %432 = arith.mulf %427, %431 : vector<8x8xf32>
    %433 = arith.truncf %432 : vector<8x8xf32> to vector<8x8xbf16>
    %cst_134 = arith.constant dense<0.000000e+00> : vector<8x32xf32>
    %434 = tpu.matmul %433, %419, %cst_134 {dimension_numbers = #tpu.dot_dimension_numbers<[1], [0], [0], [1], [0, 0, 1, 1], [], []>} : vector<8x8xbf16>, vector<8x32xbf16>, vector<8x32xf32> -> vector<8x32xf32>
    %435 = arith.truncf %434 : vector<8x32xf32> to vector<8x32xbf16>
    %436 = vector.extract_strided_slice %327 {offsets = [96, 0], sizes = [32, 128], strides = [1, 1]} : vector<128x128xbf16> to vector<32x128xbf16>
    %cst_135 = arith.constant dense<0.000000e+00> : vector<8x128xf32>
    %437 = tpu.matmul %435, %436, %cst_135 {dimension_numbers = #tpu.dot_dimension_numbers<[1], [0], [0], [1], [0, 0, 1, 1], [], []>} : vector<8x32xbf16>, vector<32x128xbf16>, vector<8x128xf32> -> vector<8x128xf32>
    %438 = arith.addf %416, %437 : vector<8x128xf32>
    %439 = vector.extract_strided_slice %41 {offsets = [1, 0], sizes = [1, 8], strides = [1, 1]} : vector<2x8xf32> to vector<1x8xf32>
    %cst_136 = arith.constant 0.000000e+00 : f32
    %440 = vector.broadcast %cst_136 : f32 to vector<8x128xf32>
    %441 = vector.extract_strided_slice %338 {offsets = [8, 0], sizes = [8, 32], strides = [1, 1]} : vector<16x128xbf16> to vector<8x32xbf16>
    %442 = vector.extract_strided_slice %343 {offsets = [8, 0], sizes = [8, 32], strides = [1, 1]} : vector<16x128xbf16> to vector<8x32xbf16>
    %443 = vector.extract_strided_slice %348 {offsets = [8, 0], sizes = [8, 32], strides = [1, 1]} : vector<16x128xbf16> to vector<8x32xbf16>
    %cst_137 = arith.constant dense<0.000000e+00> : vector<8x8xf32>
    %444 = tpu.matmul %441, %442, %cst_137 {dimension_numbers = #tpu.dot_dimension_numbers<[1], [1], [0], [0], [0, 0, 1, 0], [], []>} : vector<8x32xbf16>, vector<8x32xbf16>, vector<8x8xf32> -> vector<8x8xf32>
    %445 = vector.broadcast %439 : vector<1x8xf32> to vector<8x8xf32>
    %446 = arith.addf %444, %445 : vector<8x8xf32>
    %cst_138 = arith.constant dense<0xFF800000> : vector<8xf32>
    %447 = vector.multi_reduction <maximumf>, %446, %cst_138 [1] : vector<8x8xf32> to vector<8xf32>
    %448 = vector.shape_cast %447 : vector<8xf32> to vector<8x1xf32>
    %449 = vector.broadcast %448 : vector<8x1xf32> to vector<8x8xf32>
    %450 = arith.subf %446, %449 : vector<8x8xf32>
    %451 = math.exp %450 : vector<8x8xf32>
    %cst_139 = arith.constant dense<0.000000e+00> : vector<8xf32>
    %452 = vector.multi_reduction <add>, %451, %cst_139 [1] : vector<8x8xf32> to vector<8xf32>
    %453 = vector.shape_cast %452 : vector<8xf32> to vector<8x1xf32>
    %454 = tpu.reciprocal %453 {approx = true} : vector<8x1xf32> -> vector<8x1xf32>
    %455 = vector.broadcast %454 : vector<8x1xf32> to vector<8x8xf32>
    %456 = arith.mulf %451, %455 : vector<8x8xf32>
    %457 = arith.truncf %456 : vector<8x8xf32> to vector<8x8xbf16>
    %cst_140 = arith.constant dense<0.000000e+00> : vector<8x32xf32>
    %458 = tpu.matmul %457, %443, %cst_140 {dimension_numbers = #tpu.dot_dimension_numbers<[1], [0], [0], [1], [0, 0, 1, 1], [], []>} : vector<8x8xbf16>, vector<8x32xbf16>, vector<8x32xf32> -> vector<8x32xf32>
    %459 = arith.truncf %458 : vector<8x32xf32> to vector<8x32xbf16>
    %460 = vector.extract_strided_slice %327 {offsets = [0, 0], sizes = [32, 128], strides = [1, 1]} : vector<128x128xbf16> to vector<32x128xbf16>
    %cst_141 = arith.constant dense<0.000000e+00> : vector<8x128xf32>
    %461 = tpu.matmul %459, %460, %cst_141 {dimension_numbers = #tpu.dot_dimension_numbers<[1], [0], [0], [1], [0, 0, 1, 1], [], []>} : vector<8x32xbf16>, vector<32x128xbf16>, vector<8x128xf32> -> vector<8x128xf32>
    %462 = arith.addf %440, %461 : vector<8x128xf32>
    %463 = vector.extract_strided_slice %338 {offsets = [8, 32], sizes = [8, 32], strides = [1, 1]} : vector<16x128xbf16> to vector<8x32xbf16>
    %464 = vector.extract_strided_slice %343 {offsets = [8, 32], sizes = [8, 32], strides = [1, 1]} : vector<16x128xbf16> to vector<8x32xbf16>
    %465 = vector.extract_strided_slice %348 {offsets = [8, 32], sizes = [8, 32], strides = [1, 1]} : vector<16x128xbf16> to vector<8x32xbf16>
    %cst_142 = arith.constant dense<0.000000e+00> : vector<8x8xf32>
    %466 = tpu.matmul %463, %464, %cst_142 {dimension_numbers = #tpu.dot_dimension_numbers<[1], [1], [0], [0], [0, 0, 1, 0], [], []>} : vector<8x32xbf16>, vector<8x32xbf16>, vector<8x8xf32> -> vector<8x8xf32>
    %467 = vector.broadcast %439 : vector<1x8xf32> to vector<8x8xf32>
    %468 = arith.addf %466, %467 : vector<8x8xf32>
    %cst_143 = arith.constant dense<0xFF800000> : vector<8xf32>
    %469 = vector.multi_reduction <maximumf>, %468, %cst_143 [1] : vector<8x8xf32> to vector<8xf32>
    %470 = vector.shape_cast %469 : vector<8xf32> to vector<8x1xf32>
    %471 = vector.broadcast %470 : vector<8x1xf32> to vector<8x8xf32>
    %472 = arith.subf %468, %471 : vector<8x8xf32>
    %473 = math.exp %472 : vector<8x8xf32>
    %cst_144 = arith.constant dense<0.000000e+00> : vector<8xf32>
    %474 = vector.multi_reduction <add>, %473, %cst_144 [1] : vector<8x8xf32> to vector<8xf32>
    %475 = vector.shape_cast %474 : vector<8xf32> to vector<8x1xf32>
    %476 = tpu.reciprocal %475 {approx = true} : vector<8x1xf32> -> vector<8x1xf32>
    %477 = vector.broadcast %476 : vector<8x1xf32> to vector<8x8xf32>
    %478 = arith.mulf %473, %477 : vector<8x8xf32>
    %479 = arith.truncf %478 : vector<8x8xf32> to vector<8x8xbf16>
    %cst_145 = arith.constant dense<0.000000e+00> : vector<8x32xf32>
    %480 = tpu.matmul %479, %465, %cst_145 {dimension_numbers = #tpu.dot_dimension_numbers<[1], [0], [0], [1], [0, 0, 1, 1], [], []>} : vector<8x8xbf16>, vector<8x32xbf16>, vector<8x32xf32> -> vector<8x32xf32>
    %481 = arith.truncf %480 : vector<8x32xf32> to vector<8x32xbf16>
    %482 = vector.extract_strided_slice %327 {offsets = [32, 0], sizes = [32, 128], strides = [1, 1]} : vector<128x128xbf16> to vector<32x128xbf16>
    %cst_146 = arith.constant dense<0.000000e+00> : vector<8x128xf32>
    %483 = tpu.matmul %481, %482, %cst_146 {dimension_numbers = #tpu.dot_dimension_numbers<[1], [0], [0], [1], [0, 0, 1, 1], [], []>} : vector<8x32xbf16>, vector<32x128xbf16>, vector<8x128xf32> -> vector<8x128xf32>
    %484 = arith.addf %462, %483 : vector<8x128xf32>
    %485 = vector.extract_strided_slice %338 {offsets = [8, 64], sizes = [8, 32], strides = [1, 1]} : vector<16x128xbf16> to vector<8x32xbf16>
    %486 = vector.extract_strided_slice %343 {offsets = [8, 64], sizes = [8, 32], strides = [1, 1]} : vector<16x128xbf16> to vector<8x32xbf16>
    %487 = vector.extract_strided_slice %348 {offsets = [8, 64], sizes = [8, 32], strides = [1, 1]} : vector<16x128xbf16> to vector<8x32xbf16>
    %cst_147 = arith.constant dense<0.000000e+00> : vector<8x8xf32>
    %488 = tpu.matmul %485, %486, %cst_147 {dimension_numbers = #tpu.dot_dimension_numbers<[1], [1], [0], [0], [0, 0, 1, 0], [], []>} : vector<8x32xbf16>, vector<8x32xbf16>, vector<8x8xf32> -> vector<8x8xf32>
    %489 = vector.broadcast %439 : vector<1x8xf32> to vector<8x8xf32>
    %490 = arith.addf %488, %489 : vector<8x8xf32>
    %cst_148 = arith.constant dense<0xFF800000> : vector<8xf32>
    %491 = vector.multi_reduction <maximumf>, %490, %cst_148 [1] : vector<8x8xf32> to vector<8xf32>
    %492 = vector.shape_cast %491 : vector<8xf32> to vector<8x1xf32>
    %493 = vector.broadcast %492 : vector<8x1xf32> to vector<8x8xf32>
    %494 = arith.subf %490, %493 : vector<8x8xf32>
    %495 = math.exp %494 : vector<8x8xf32>
    %cst_149 = arith.constant dense<0.000000e+00> : vector<8xf32>
    %496 = vector.multi_reduction <add>, %495, %cst_149 [1] : vector<8x8xf32> to vector<8xf32>
    %497 = vector.shape_cast %496 : vector<8xf32> to vector<8x1xf32>
    %498 = tpu.reciprocal %497 {approx = true} : vector<8x1xf32> -> vector<8x1xf32>
    %499 = vector.broadcast %498 : vector<8x1xf32> to vector<8x8xf32>
    %500 = arith.mulf %495, %499 : vector<8x8xf32>
    %501 = arith.truncf %500 : vector<8x8xf32> to vector<8x8xbf16>
    %cst_150 = arith.constant dense<0.000000e+00> : vector<8x32xf32>
    %502 = tpu.matmul %501, %487, %cst_150 {dimension_numbers = #tpu.dot_dimension_numbers<[1], [0], [0], [1], [0, 0, 1, 1], [], []>} : vector<8x8xbf16>, vector<8x32xbf16>, vector<8x32xf32> -> vector<8x32xf32>
    %503 = arith.truncf %502 : vector<8x32xf32> to vector<8x32xbf16>
    %504 = vector.extract_strided_slice %327 {offsets = [64, 0], sizes = [32, 128], strides = [1, 1]} : vector<128x128xbf16> to vector<32x128xbf16>
    %cst_151 = arith.constant dense<0.000000e+00> : vector<8x128xf32>
    %505 = tpu.matmul %503, %504, %cst_151 {dimension_numbers = #tpu.dot_dimension_numbers<[1], [0], [0], [1], [0, 0, 1, 1], [], []>} : vector<8x32xbf16>, vector<32x128xbf16>, vector<8x128xf32> -> vector<8x128xf32>
    %506 = arith.addf %484, %505 : vector<8x128xf32>
    %507 = vector.extract_strided_slice %338 {offsets = [8, 96], sizes = [8, 32], strides = [1, 1]} : vector<16x128xbf16> to vector<8x32xbf16>
    %508 = vector.extract_strided_slice %343 {offsets = [8, 96], sizes = [8, 32], strides = [1, 1]} : vector<16x128xbf16> to vector<8x32xbf16>
    %509 = vector.extract_strided_slice %348 {offsets = [8, 96], sizes = [8, 32], strides = [1, 1]} : vector<16x128xbf16> to vector<8x32xbf16>
    %cst_152 = arith.constant dense<0.000000e+00> : vector<8x8xf32>
    %510 = tpu.matmul %507, %508, %cst_152 {dimension_numbers = #tpu.dot_dimension_numbers<[1], [1], [0], [0], [0, 0, 1, 0], [], []>} : vector<8x32xbf16>, vector<8x32xbf16>, vector<8x8xf32> -> vector<8x8xf32>
    %511 = vector.broadcast %439 : vector<1x8xf32> to vector<8x8xf32>
    %512 = arith.addf %510, %511 : vector<8x8xf32>
    %cst_153 = arith.constant dense<0xFF800000> : vector<8xf32>
    %513 = vector.multi_reduction <maximumf>, %512, %cst_153 [1] : vector<8x8xf32> to vector<8xf32>
    %514 = vector.shape_cast %513 : vector<8xf32> to vector<8x1xf32>
    %515 = vector.broadcast %514 : vector<8x1xf32> to vector<8x8xf32>
    %516 = arith.subf %512, %515 : vector<8x8xf32>
    %517 = math.exp %516 : vector<8x8xf32>
    %cst_154 = arith.constant dense<0.000000e+00> : vector<8xf32>
    %518 = vector.multi_reduction <add>, %517, %cst_154 [1] : vector<8x8xf32> to vector<8xf32>
    %519 = vector.shape_cast %518 : vector<8xf32> to vector<8x1xf32>
    %520 = tpu.reciprocal %519 {approx = true} : vector<8x1xf32> -> vector<8x1xf32>
    %521 = vector.broadcast %520 : vector<8x1xf32> to vector<8x8xf32>
    %522 = arith.mulf %517, %521 : vector<8x8xf32>
    %523 = arith.truncf %522 : vector<8x8xf32> to vector<8x8xbf16>
    %cst_155 = arith.constant dense<0.000000e+00> : vector<8x32xf32>
    %524 = tpu.matmul %523, %509, %cst_155 {dimension_numbers = #tpu.dot_dimension_numbers<[1], [0], [0], [1], [0, 0, 1, 1], [], []>} : vector<8x8xbf16>, vector<8x32xbf16>, vector<8x32xf32> -> vector<8x32xf32>
    %525 = arith.truncf %524 : vector<8x32xf32> to vector<8x32xbf16>
    %526 = vector.extract_strided_slice %327 {offsets = [96, 0], sizes = [32, 128], strides = [1, 1]} : vector<128x128xbf16> to vector<32x128xbf16>
    %cst_156 = arith.constant dense<0.000000e+00> : vector<8x128xf32>
    %527 = tpu.matmul %525, %526, %cst_156 {dimension_numbers = #tpu.dot_dimension_numbers<[1], [0], [0], [1], [0, 0, 1, 1], [], []>} : vector<8x32xbf16>, vector<32x128xbf16>, vector<8x128xf32> -> vector<8x128xf32>
    %528 = arith.addf %506, %527 : vector<8x128xf32>
    %529 = tpu.concatenate %438, %528 in 0 : vector<8x128xf32>, vector<8x128xf32> -> vector<16x128xf32>
    %c14 = arith.constant 14 : index
    %c0_157 = arith.constant 0 : index
    %530 = vector.load %arg5[%c14, %c0_157] : memref<21x128xf32, #tpu.memory_space<vmem>>, vector<1x128xf32>
    %531 = vector.broadcast %530 : vector<1x128xf32> to vector<16x128xf32>
    %532 = arith.addf %529, %531 : vector<16x128xf32>
    %533 = arith.addf %532, %323 : vector<16x128xf32>
    %c15 = arith.constant 15 : index
    %c0_158 = arith.constant 0 : index
    %534 = vector.load %arg5[%c15, %c0_158] : memref<21x128xf32, #tpu.memory_space<vmem>>, vector<1x128xf32>
    %c16 = arith.constant 16 : index
    %c0_159 = arith.constant 0 : index
    %535 = vector.load %arg5[%c16, %c0_159] : memref<21x128xf32, #tpu.memory_space<vmem>>, vector<1x128xf32>
    %cst_160 = arith.constant dense<0.000000e+00> : vector<16xf32>
    %536 = vector.multi_reduction <add>, %533, %cst_160 [1] : vector<16x128xf32> to vector<16xf32>
    %537 = vector.shape_cast %536 : vector<16xf32> to vector<16x1xf32>
    %cst_161 = arith.constant 1.280000e+02 : f32
    %538 = vector.broadcast %cst_161 : f32 to vector<16x1xf32>
    %539 = arith.divf %537, %538 : vector<16x1xf32>
    %540 = vector.broadcast %539 : vector<16x1xf32> to vector<16x128xf32>
    %541 = arith.subf %533, %540 : vector<16x128xf32>
    %542 = arith.mulf %541, %541 : vector<16x128xf32>
    %cst_162 = arith.constant dense<0.000000e+00> : vector<16xf32>
    %543 = vector.multi_reduction <add>, %542, %cst_162 [1] : vector<16x128xf32> to vector<16xf32>
    %544 = vector.shape_cast %543 : vector<16xf32> to vector<16x1xf32>
    %cst_163 = arith.constant 1.280000e+02 : f32
    %545 = vector.broadcast %cst_163 : f32 to vector<16x1xf32>
    %546 = arith.divf %544, %545 : vector<16x1xf32>
    %547 = vector.broadcast %539 : vector<16x1xf32> to vector<16x128xf32>
    %548 = arith.subf %533, %547 : vector<16x128xf32>
    %cst_164 = arith.constant 9.99999996E-13 : f32
    %549 = vector.broadcast %cst_164 : f32 to vector<16x1xf32>
    %550 = arith.addf %546, %549 : vector<16x1xf32>
    %551 = math.rsqrt %550 : vector<16x1xf32>
    %552 = vector.broadcast %551 : vector<16x1xf32> to vector<16x128xf32>
    %553 = arith.mulf %548, %552 : vector<16x128xf32>
    %554 = vector.broadcast %534 : vector<1x128xf32> to vector<16x128xf32>
    %555 = arith.mulf %553, %554 : vector<16x128xf32>
    %556 = vector.broadcast %535 : vector<1x128xf32> to vector<16x128xf32>
    %557 = arith.addf %555, %556 : vector<16x128xf32>
    %558 = arith.truncf %557 : vector<16x128xf32> to vector<16x128xbf16>
    %cst_165 = arith.constant dense<0.000000e+00> : vector<16x256xf32>
    %559 = tpu.matmul %558, %329, %cst_165 {dimension_numbers = #tpu.dot_dimension_numbers<[1], [0], [0], [1], [0, 0, 1, 1], [], []>} : vector<16x128xbf16>, vector<128x256xbf16>, vector<16x256xf32> -> vector<16x256xf32>
    %c1_166 = arith.constant 1 : index
    %c0_167 = arith.constant 0 : index
    %560 = vector.load %arg6[%c1_166, %c0_167] : memref<2x256xf32, #tpu.memory_space<vmem>>, vector<1x256xf32>
    %561 = vector.broadcast %560 : vector<1x256xf32> to vector<16x256xf32>
    %562 = arith.addf %559, %561 : vector<16x256xf32>
    %cst_168 = arith.constant 5.000000e-01 : f32
    %563 = vector.broadcast %cst_168 : f32 to vector<16x256xf32>
    %564 = arith.mulf %563, %562 : vector<16x256xf32>
    %cst_169 = arith.constant 4.471500e-02 : f32
    %565 = vector.broadcast %cst_169 : f32 to vector<16x256xf32>
    %566 = arith.mulf %565, %562 : vector<16x256xf32>
    %567 = arith.mulf %566, %562 : vector<16x256xf32>
    %568 = arith.mulf %567, %562 : vector<16x256xf32>
    %569 = arith.addf %562, %568 : vector<16x256xf32>
    %cst_170 = arith.constant 0.797884583 : f32
    %570 = vector.broadcast %cst_170 : f32 to vector<16x256xf32>
    %571 = arith.mulf %570, %569 : vector<16x256xf32>
    %572 = math.tanh %571 : vector<16x256xf32>
    %cst_171 = arith.constant 1.000000e+00 : f32
    %573 = vector.broadcast %cst_171 : f32 to vector<16x256xf32>
    %574 = arith.addf %573, %572 : vector<16x256xf32>
    %575 = arith.mulf %564, %574 : vector<16x256xf32>
    %576 = arith.truncf %575 : vector<16x256xf32> to vector<16x256xbf16>
    %cst_172 = arith.constant dense<0.000000e+00> : vector<16x128xf32>
    %577 = tpu.matmul %576, %331, %cst_172 {dimension_numbers = #tpu.dot_dimension_numbers<[1], [0], [0], [1], [0, 0, 1, 1], [], []>} : vector<16x256xbf16>, vector<256x128xbf16>, vector<16x128xf32> -> vector<16x128xf32>
    %c17 = arith.constant 17 : index
    %c0_173 = arith.constant 0 : index
    %578 = vector.load %arg5[%c17, %c0_173] : memref<21x128xf32, #tpu.memory_space<vmem>>, vector<1x128xf32>
    %579 = vector.broadcast %578 : vector<1x128xf32> to vector<16x128xf32>
    %580 = arith.addf %577, %579 : vector<16x128xf32>
    %581 = arith.addf %580, %557 : vector<16x128xf32>
    %c18 = arith.constant 18 : index
    %c0_174 = arith.constant 0 : index
    %582 = vector.load %arg5[%c18, %c0_174] : memref<21x128xf32, #tpu.memory_space<vmem>>, vector<1x128xf32>
    %c19 = arith.constant 19 : index
    %c0_175 = arith.constant 0 : index
    %583 = vector.load %arg5[%c19, %c0_175] : memref<21x128xf32, #tpu.memory_space<vmem>>, vector<1x128xf32>
    %cst_176 = arith.constant dense<0.000000e+00> : vector<16xf32>
    %584 = vector.multi_reduction <add>, %581, %cst_176 [1] : vector<16x128xf32> to vector<16xf32>
    %585 = vector.shape_cast %584 : vector<16xf32> to vector<16x1xf32>
    %cst_177 = arith.constant 1.280000e+02 : f32
    %586 = vector.broadcast %cst_177 : f32 to vector<16x1xf32>
    %587 = arith.divf %585, %586 : vector<16x1xf32>
    %588 = vector.broadcast %587 : vector<16x1xf32> to vector<16x128xf32>
    %589 = arith.subf %581, %588 : vector<16x128xf32>
    %590 = arith.mulf %589, %589 : vector<16x128xf32>
    %cst_178 = arith.constant dense<0.000000e+00> : vector<16xf32>
    %591 = vector.multi_reduction <add>, %590, %cst_178 [1] : vector<16x128xf32> to vector<16xf32>
    %592 = vector.shape_cast %591 : vector<16xf32> to vector<16x1xf32>
    %cst_179 = arith.constant 1.280000e+02 : f32
    %593 = vector.broadcast %cst_179 : f32 to vector<16x1xf32>
    %594 = arith.divf %592, %593 : vector<16x1xf32>
    %595 = vector.broadcast %587 : vector<16x1xf32> to vector<16x128xf32>
    %596 = arith.subf %581, %595 : vector<16x128xf32>
    %cst_180 = arith.constant 9.99999996E-13 : f32
    %597 = vector.broadcast %cst_180 : f32 to vector<16x1xf32>
    %598 = arith.addf %594, %597 : vector<16x1xf32>
    %599 = math.rsqrt %598 : vector<16x1xf32>
    %600 = vector.broadcast %599 : vector<16x1xf32> to vector<16x128xf32>
    %601 = arith.mulf %596, %600 : vector<16x128xf32>
    %602 = vector.broadcast %582 : vector<1x128xf32> to vector<16x128xf32>
    %603 = arith.mulf %601, %602 : vector<16x128xf32>
    %604 = vector.broadcast %583 : vector<1x128xf32> to vector<16x128xf32>
    %605 = arith.addf %603, %604 : vector<16x128xf32>
    %c20 = arith.constant 20 : index
    %c0_181 = arith.constant 0 : index
    %606 = vector.load %arg5[%c20, %c0_181] : memref<21x128xf32, #tpu.memory_space<vmem>>, vector<1x128xf32>
    %607 = arith.truncf %605 : vector<16x128xf32> to vector<16x128xbf16>
    %c0_182 = arith.constant 0 : index
    %c0_183 = arith.constant 0 : index
    %608 = vector.load %arg11[%c0_182, %c0_183] : memref<128x128xbf16, #tpu.memory_space<vmem>>, vector<128x128xbf16>
    %cst_184 = arith.constant dense<0.000000e+00> : vector<16x128xf32>
    %609 = tpu.matmul %607, %608, %cst_184 {dimension_numbers = #tpu.dot_dimension_numbers<[1], [0], [0], [1], [0, 0, 1, 1], [], []>} : vector<16x128xbf16>, vector<128x128xbf16>, vector<16x128xf32> -> vector<16x128xf32>
    %610 = vector.broadcast %606 : vector<1x128xf32> to vector<16x128xf32>
    %611 = arith.addf %609, %610 : vector<16x128xf32>
    %cst_185 = arith.constant 0.000000e+00 : f32
    %612 = vector.broadcast %cst_185 : f32 to vector<16x128xf32>
    %613 = arith.maximumf %611, %612 : vector<16x128xf32>
    %c0_186 = arith.constant 0 : index
    %c0_187 = arith.constant 0 : index
    %614 = vector.load %arg12[%c0_186, %c0_187] : memref<16x128xf32, #tpu.memory_space<vmem>>, vector<16x128xf32>
    tpu.vector_store %arg12[%c0_186, %c0_187], %613 {strides = array<i32>} : memref<16x128xf32, #tpu.memory_space<vmem>>, vector<16x128xf32>,
    return
  }
  func.func @transform_0(%arg0: i32) -> (i32, i32) {
    %c0_i32 = arith.constant 0 : i32
    %c0_i32_0 = arith.constant 0 : i32
    %c0_i32_1 = arith.constant 0 : i32
    return %c0_i32, %c0_i32_0 : i32, i32
  }
  func.func @transform_1(%arg0: i32) -> (i32, i32) {
    %c0_i32 = arith.constant 0 : i32
    %c0_i32_0 = arith.constant 0 : i32
    %c0_i32_1 = arith.constant 0 : i32
    return %c0_i32, %c0_i32_0 : i32, i32
  }
  func.func @transform_2(%arg0: i32) -> (i32, i32) {
    %c0_i32 = arith.constant 0 : i32
    %c0_i32_0 = arith.constant 0 : i32
    %c0_i32_1 = arith.constant 0 : i32
    return %c0_i32, %c0_i32_0 : i32, i32
  }
  func.func @transform_3(%arg0: i32) -> (i32, i32) {
    %c0_i32 = arith.constant 0 : i32
    %c0_i32_0 = arith.constant 0 : i32
    %c0_i32_1 = arith.constant 0 : i32
    return %c0_i32, %c0_i32_0 : i32, i32
  }
  func.func @transform_4(%arg0: i32) -> (i32, i32) {
    %c0_i32 = arith.constant 0 : i32
    %c0_i32_0 = arith.constant 0 : i32
    %c0_i32_1 = arith.constant 0 : i32
    return %c0_i32, %c0_i32_0 : i32, i32
  }
  func.func @transform_5(%arg0: i32) -> (i32, i32) {
    %c0_i32 = arith.constant 0 : i32
    %c0_i32_0 = arith.constant 0 : i32
    %c0_i32_1 = arith.constant 0 : i32
    return %c0_i32, %c0_i32_0 : i32, i32
  }
  func.func @transform_6(%arg0: i32) -> (i32, i32, i32) {
    %c0_i32 = arith.constant 0 : i32
    %c0_i32_0 = arith.constant 0 : i32
    %c0_i32_1 = arith.constant 0 : i32
    %c0_i32_2 = arith.constant 0 : i32
    return %c0_i32, %c0_i32_0, %c0_i32_1 : i32, i32, i32
  }
  func.func @transform_7(%arg0: i32) -> (i32, i32, i32) {
    %c0_i32 = arith.constant 0 : i32
    %c0_i32_0 = arith.constant 0 : i32
    %c0_i32_1 = arith.constant 0 : i32
    %c0_i32_2 = arith.constant 0 : i32
    return %c0_i32, %c0_i32_0, %c0_i32_1 : i32, i32, i32
  }
  func.func @transform_8(%arg0: i32) -> (i32, i32, i32) {
    %c0_i32 = arith.constant 0 : i32
    %c0_i32_0 = arith.constant 0 : i32
    %c0_i32_1 = arith.constant 0 : i32
    %c0_i32_2 = arith.constant 0 : i32
    return %c0_i32, %c0_i32_0, %c0_i32_1 : i32, i32, i32
  }
  func.func @transform_9(%arg0: i32) -> (i32, i32, i32) {
    %c0_i32 = arith.constant 0 : i32
    %c0_i32_0 = arith.constant 0 : i32
    %c0_i32_1 = arith.constant 0 : i32
    %c0_i32_2 = arith.constant 0 : i32
    return %c0_i32, %c0_i32_0, %c0_i32_1 : i32, i32, i32
  }
  func.func @transform_10(%arg0: i32) -> (i32, i32) {
    %c0_i32 = arith.constant 0 : i32
    %c0_i32_0 = arith.constant 0 : i32
    %c0_i32_1 = arith.constant 0 : i32
    return %c0_i32, %c0_i32_0 : i32, i32
  }
  func.func @transform_11(%arg0: i32) -> (i32, i32) {
    %c0_i32 = arith.constant 0 : i32
    %c0_i32_0 = arith.constant 0 : i32
    %c0_i32_1 = arith.constant 0 : i32
    return %c0_i32, %c0_i32_0 : i32, i32
  }
}

</mosaic_0001>

<bundles_post_ra>
// kernel: bert_sequence_model_forward.1
= control target key start
LH: loop header
LB: loop body
LE: loop exit
PB: predicated region body
PF: predicated region fallthrough
CT: control target
= control target key end

     0   :  { %v5498_v0 = vmov 0   ;;  %v5499_v2 = vmov 0.0   ;;  %vm5500_vm0 = vmmov 0   ;;  %v41_v8 = vlaneseq  ;;  %s5501_s23 = smov 96   ;;  %s5504_s13 = smov 32   ;;  %s6676_s0 = inlined_call_operand.vmem [shape: s32[16,1], index: 0, kind: input, shape index: {}]   ;;  %s6677_s2 = inlined_call_operand.vmem [shape: bf16[64,128], index: 2, kind: input, shape index: {}]   ;;  %s6678_s3 = inlined_call_operand.vmem [shape: f32[16,128], index: 3, kind: input, shape index: {}]   ;;  %s6679_s6 = inlined_call_operand.vmem [shape: bf16[2,128,384], index: 6, kind: input, shape index: {}]   ;;  %s6680_s4 = inlined_call_operand.vmem [shape: f32[21,128], index: 4, kind: input, shape index: {}]   ;;  %s6681_s1 = inlined_call_operand.vmem [shape: s32[2,8], index: 1, kind: input, shape index: {}]   ;;  %s6682_s7 = inlined_call_operand.vmem [shape: bf16[2,128,128], index: 7, kind: input, shape index: {}]   ;;  %s6683_s8 = inlined_call_operand.vmem [shape: bf16[2,128,256], index: 8, kind: input, shape index: {}]   ;;  %s6684_s9 = inlined_call_operand.vmem [shape: bf16[2,256,128], index: 9, kind: input, shape index: {}]   ;;  %s6685_s5 = inlined_call_operand.vmem [shape: f32[2,256], index: 5, kind: input, shape index: {}]   ;;  %s6686_s10 = inlined_call_operand.vmem [shape: bf16[128,128], index: 10, kind: input, shape index: {}]   ;;  %s6687_s11 = inlined_call_operand.vmem [shape: f32[16,128], index: 11, kind: output, shape index: {}]  }
   0x1   :  { %5225 = vset.pattern.permute.xlu0 %v5498_v0  ;;  %v39_v1 = vld [vmem:[%s6676_s0] sm:$0xff]  ;;  %4826 = vmatprep.subr.bf16.mxu1 %v5499_v2  ;;  %v40_v4 = vld [vmem:[%s6676_s0 + $0x8] sm:$0xff]  ;;  %v5228_v6 = vld [vmem:[%s6677_s2 + $0x10] sm:$0xff]   ;;  %vm89_vm3 = vcmask 523264   ;;  %vm511_vm4 = vcmask 261120   ;;  %vm574_vm5 = vcmask 1043456  }
   0x2   :  { %44 = vperm.xlu0 %5225, %v39_v1   ;;  %v5226_v3 = vld [vmem:[%s6677_s2] sm:$0xff]   ;;  %4838 = vmatprep.subr.bf16.mxu0 %v5499_v2  ;;  %v5227_v5 = vld [vmem:[%s6677_s2 + $0x8] sm:$0xff]   ;;  %v5229_v7 = vld [vmem:[%s6677_s2 + $0x18] sm:$0xff]   ;;  %v42_v9 = vand.u32 127, %v41_v8  ;;  %vm558_vm7 = vcmask 64512  }
   0x3   :  { %4827 = vmatpush3.bf16.msra.mxu1 %v5226_v3  ;;  %4834 = vmatprep.mubr.msk.bf16.mxu1 %vm5500_vm0, %v5499_v2  ;;  %v64_v15 = vld [vmem:[%s6678_s3] sm:$0xff]  ;;  %v5233_v24 = vld [vmem:[%s6679_s6 + $0x8] ss:$12 sps:$4 sm:$0xff]   ;;  %v5238_v37 = vld [vmem:[%s6679_s6 + $0x30] ss:$12 sps:$4 sm:$0xff]  }
   0x4   :  { %4828 = vmatprep.subr.bf16.mxu1 %v5499_v2  ;;  %4854 = vmatprep.mubr.msk.bf16.mxu0 %vm5500_vm0, %v5499_v2  ;;  %v5230_v22 = vld [vmem:[%s6679_s6] ss:$12 sps:$4 sm:$0xff]   ;;  %v5232_v23 = vld [vmem:[%s6679_s6 + $0x4] ss:$12 sps:$4 sm:$0xff]   ;;  %v5236_v26 = vld [vmem:[%s6679_s6 + $0x1c] ss:$12 sps:$4 sm:$0xff]  }
   0x5   :  { %v5234_v25 = vld [vmem:[%s6679_s6 + $0x18] ss:$12 sps:$4 sm:$0xff]   ;;  %4839 = vmatpush3.bf16.msra.mxu0 %v5233_v24  ;;  %v5237_v35 = vld [vmem:[%s6679_s6 + $0x20] ss:$12 sps:$4 sm:$0xff]   ;;  %v5242_v40 = vld [vmem:[%s6679_s6 + $0x48] ss:$12 sps:$4 sm:$0xff]  }
   0x6   :  { %47 = vperm.xlu0 %5225, %v40_v4   ;;  %4840 = vmatprep.subr.bf16.mxu0 %v5499_v2  ;;  %v5240_v36 = vld [vmem:[%s6679_s6 + $0x34] ss:$12 sps:$4 sm:$0xff]   ;;  %v5241_v38 = vld [vmem:[%s6679_s6 + $0x38] ss:$12 sps:$4 sm:$0xff]   ;;  %v5245_v41 = vld [vmem:[%s6679_s6 + $0x50] ss:$12 sps:$4 sm:$0xff]  }
   0x7   :  { %4829 = vmatpush3.bf16.msra.mxu1 %v5227_v5  ;;  %v5244_v39 = vld [vmem:[%s6679_s6 + $0x4c] ss:$12 sps:$4 sm:$0xff]   ;;  %v5248_v42 = vld [vmem:[%s6679_s6 + $0x64] ss:$12 sps:$4 sm:$0xff]   ;;  %v5249_v44 = vld [vmem:[%s6679_s6 + $0x68] ss:$12 sps:$4 sm:$0xff]  }
   0x8   :  { %4830 = vmatprep.subr.bf16.mxu1 %v5499_v2  ;;  %v5246_v43 = vld [vmem:[%s6679_s6 + $0x60] ss:$12 sps:$4 sm:$0xff]   ;;  %v5252_v45 = vld [vmem:[%s6679_s6 + $0x7c] ss:$12 sps:$4 sm:$0xff]   ;;  %v5250_v46 = vld [vmem:[%s6679_s6 + $0x78] ss:$12 sps:$4 sm:$0xff]  }
   0x9   :  { %4841 = vmatpush3.bf16.msra.mxu0 %v5237_v35  ;;  %v5253_v47 = vld [vmem:[%s6679_s6 + $0x80] ss:$12 sps:$4 sm:$0xff]   ;;  %v5254_v49 = vld [vmem:[%s6679_s6 + $0x90] ss:$12 sps:$4 sm:$0xff]   ;;  %v5257_v50 = vld [vmem:[%s6679_s6 + $0x98] ss:$12 sps:$4 sm:$0xff]  }
   0xa   :  { %4842 = vmatprep.subr.bf16.mxu0 %v5499_v2  ;;  %v5256_v48 = vld [vmem:[%s6679_s6 + $0x94] ss:$12 sps:$4 sm:$0xff]   ;;  %v5260_v51 = vld [vmem:[%s6679_s6 + $0xac] ss:$12 sps:$4 sm:$0xff]   ;;  %v5261_v53 = vld [vmem:[%s6679_s6 + $0xb0] ss:$12 sps:$4 sm:$0xff]  }
   0xb   :  { %4831 = vmatpush3.bf16.msra.mxu1 %v5228_v6  ;;  %v5258_v52 = vld [vmem:[%s6679_s6 + $0xa8] ss:$12 sps:$4 sm:$0xff]   ;;  %v4336_v62 = vld [vmem:[%s6680_s4] ss:$0 sm:$0xff]  ;;  %v4337_v4 = vld [vmem:[%s6680_s4 + $0x1] ss:$0 sm:$0xff] }
   0xc   :  { %4832 = vmatprep.subr.bf16.mxu1 %v5499_v2  ;;  %v171_v35 = vld [vmem:[%s6681_s1] sm:$0x3]  ;;  %s5503_s1 = smov 64  }
   0xd   :  { %4843 = vmatpush3.bf16.msra.mxu0 %v5241_v38  ;;  %vm172_vm6 = vcmp.ne.s32.totalorder %v171_v35, 0  ;;  %v5502_v38 = vmov -10000.0  }
   0xe   :  { %4844 = vmatprep.subr.bf16.mxu0 %v5499_v2 }
   0xf   :  { %4833 = vmatpush3.bf16.msra.mxu1 %v5229_v7 }
  0x10   :  { %399 = vmatprep.subr.bf16.mxu1 %v5232_v23 }
  0x11   :  { %4845 = vmatpush3.bf16.msra.mxu0 %v5245_v41 }
  0x12   :  { %4846 = vmatprep.subr.bf16.mxu0 %v5499_v2 }
  0x15   :  { %4847 = vmatpush3.bf16.msra.mxu0 %v5249_v44 }
  0x16   :  { %4848 = vmatprep.subr.bf16.mxu0 %v5499_v2 }
  0x19   :  { %4849 = vmatpush3.bf16.msra.mxu0 %v5253_v47 }
  0x1a   :  { %4850 = vmatprep.subr.bf16.mxu0 %v5499_v2 }
  0x1d   :  { %4851 = vmatpush3.bf16.msra.mxu0 %v5257_v50 }
  0x1e   :  { %4852 = vmatprep.subr.bf16.mxu0 %v5499_v2 }
  0x21   :  { %4853 = vmatpush3.bf16.msra.mxu0 %v5261_v53 }
  0x22   :  { %4870 = vmatprep.subr.bf16.mxu0 %v5499_v2 }
  0x81   :  { %v45_v10 = vpop.permute.xlu0 %44 }
  0x82   :  { %vm49_vm1 = vcmp.eq.s32.totalorder %v45_v10, %v42_v9 }
  0x83   :  { %v4329_v12 = vsel %vm49_vm1, 1.0, %v5499_v2 }
  0x85   :  { %v48_v11 = vpop.permute.xlu0 %47 }
  0x86   :  { %vm50_vm2 = vcmp.eq.s32.totalorder %v48_v11, %v42_v9  ;;  %v4362_v11 = vld [vmem:[%s6680_s4 + $0x2] ss:$0 sm:$0xff] }
  0x87   :  { %v4330_v13 = vsel %vm50_vm2, 1.0, %v5499_v2 }
  0x88   :  { %v55_v14 = vpack.c.bf16 %v4330_v13, %v4329_v12  ;;  %v4364_v13 = vld [vmem:[%s6680_s4 + $0x4] ss:$0 sm:$0xff] }
  0x8a   :  { %4835 = vmatmul.mubr.msk.bf16.vlgmr.msra.gmra.mrb[0].mxu1 %vm89_vm3, %v55_v14 }
  0x8b   :  { %431 = vmatprep.mubr.bf16.mxu1 %v5498_v0  ;;  %400 = vmatpush1.bf16.msra.mxu1 %v5230_v22 }
  0x8c   :  { %401 = vmatprep.subr.bf16.mxu1 %v5236_v26 }
  0x8f   :  { %402 = vmatpush1.bf16.msra.mxu1 %v5234_v25 }
  0x90   :  { %403 = vmatprep.subr.bf16.mxu1 %v5240_v36  ;;  %v5745_v36 = vshrl.u32 %v41_v8, 7 }
  0x93   :  { %404 = vmatpush1.bf16.msra.mxu1 %v5238_v37  ;;  %v5748_v37 = vsub.s32 0, %v5745_v36 }
  0x94   :  { %405 = vmatprep.subr.bf16.mxu1 %v5244_v39  ;;  %v5750_v39 = vsel %vm172_vm6, 0.0, %v5502_v38 }
  0x97   :  { %406 = vmatpush1.bf16.msra.mxu1 %v5242_v40  ;;  %v5754_v40 = vrot.slane %v5750_v39, %v5748_v37 }
  0x98   :  { %407 = vmatprep.subr.bf16.mxu1 %v5248_v42 }
  0x9b   :  { %408 = vmatpush1.bf16.msra.mxu1 %v5246_v43 }
  0x9c   :  { %409 = vmatprep.subr.bf16.mxu1 %v5252_v45 }
  0x9f   :  { %410 = vmatpush1.bf16.msra.mxu1 %v5250_v46 }
  0xa0   :  { %411 = vmatprep.subr.bf16.mxu1 %v5256_v48 }
  0xa3   :  { %412 = vmatpush1.bf16.msra.mxu1 %v5254_v49 }
  0xa4   :  { %413 = vmatprep.subr.bf16.mxu1 %v5260_v51 }
  0xa7   :  { %414 = vmatpush1.bf16.msra.mxu1 %v5258_v52 }
  0xa8   :  { %4858 = vmatprep.subr.bf16.mxu1 %v5499_v2 }
 0x15d   :  { %v127_v16 = vpop.f32.mrb[0].mxu1 }
 0x15e   :  { %v128_v17 = vadd.f32 %v127_v16, %v64_v15  ;;  %v4836_v18 = vpop.f32.mrb[1].mxu1 }
 0x15f   :  { %v130_v19 = vpop.f32.mrb[2].mxu1 }
 0x160   :  { %136 = vadd.xlane.f32.xlu1 %v128_v17  ;;  %v4837_v20 = vpop.f32.mrb[3].mxu1  ;;  %v131_v21 = vadd.f32 %v130_v19, %v64_v15  ;;  %v4363_v15 = vld [vmem:[%s6680_s4 + $0x3] ss:$0 sm:$0xff] }
 0x164   :  { %138 = vadd.xlane.f32.xlu1 %v131_v21 }
 0x1ed   :  { %v137_v27 = vpop.xlane.xlu1 %136 }
 0x1ee   :  { %v141_v28 = vmul.f32 0.0078125, %v137_v27 }
 0x1f0   :  { %v5616_v29 = vsub.f32 %v128_v17, %v141_v28 }
 0x1f1   :  { %v139_v30 = vpop.xlane.xlu1 %138 }
 0x1f2   :  { %v142_v31 = vmul.f32 0.0078125, %v139_v30  ;;  %v145_v32 = vmul.f32 %v5616_v29, %v5616_v29 }
 0x1f4   :  { %v5620_v33 = vsub.f32 %v131_v21, %v142_v31  ;;  %147 = vadd.xlane.f32.xlu0 %v145_v32 }
 0x1f6   :  { %v146_v34 = vmul.f32 %v5620_v33, %v5620_v33 }
 0x1f8   :  { %149 = vadd.xlane.f32.xlu1 %v146_v34 }
 0x281   :  { %v148_v54 = vpop.xlane.xlu0 %147 }
 0x282   :  { %v151_v55 = vmul.f32 0.0078125, %v148_v54 }
 0x284   :  { %v153_v56 = vadd.f32 1e-12, %v151_v55 }
 0x285   :  { %v150_v57 = vpop.xlane.xlu1 %149 }
 0x286   :  { %5398 = vrsqrt.f32 %v153_v56  ;;  %v152_v58 = vmul.f32 0.0078125, %v150_v57 }
 0x288   :  { %v154_v59 = vadd.f32 1e-12, %v152_v58 }
 0x28a   :  { %5400 = vrsqrt.f32 %v154_v59 }
 0x290   :  { %v5399_v60 = vpop.eup %5398 }
 0x291   :  { %v157_v61 = vmul.f32 %v5399_v60, %v5616_v29 }
 0x293   :  { %v163_v3 = vmul.f32 %v4336_v62, %v157_v61 }
 0x294   :  { %v5401_v63 = vpop.eup %5400 }
 0x295   :  { %v158_v1 = vmul.f32 %v5401_v63, %v5620_v33  ;;  %v5697_v6 = vadd.f32 %v4337_v4, %v163_v3 }
 0x297   :  { %v164_v5 = vmul.f32 %v4336_v62, %v158_v1 }
 0x299   :  { %v5699_v7 = vadd.f32 %v4337_v4, %v164_v5  ;;  %v5774_v4 = vld [vmem:[%s6682_s7 + $0x10] sm:$0xff]   ;;  %v5780_v5 = vld [vmem:[%s6682_s7 + $0x18] sm:$0xff]  }
 0x29b   :  { %v270_v9 = vpack.c.bf16 %v5699_v7, %v5697_v6 }
 0x29d   :  { %432 = vmatmul.mubr.bf16.vlgmr.msra.gmra.mrb[4].mxu1 %v270_v9  ;;  %4855 = vmatmul.mubr.bf16.vlgmr.msra.gmra.mrb[0].mxu0 %v270_v9 }
 0x29e   :  { %4860 = vmatprep.mubr.msk.bf16.mxu1 %vm5500_vm0, %v5499_v2  ;;  %4872 = vmatprep.mubr.msk.bf16.mxu0 %vm5500_vm0, %v5499_v2 }
 0x370   :  { %v433_v10 = vpop.f32.mrb[4].mxu1  ;;  %v476_v12 = vpop.f32.mrb[0].mxu0 }
 0x371   :  { %v435_v14 = vpop.f32.mrb[5].mxu1  ;;  %v4856_v16 = vpop.f32.mrb[1].mxu0  ;;  %v488_v19 = vadd.f32 %v4362_v11, %v433_v10  ;;  %v504_v20 = vadd.f32 %v4364_v13, %v476_v12 }
 0x372   :  { %v437_v17 = vpop.f32.mrb[6].mxu1  ;;  %v479_v18 = vpop.f32.mrb[2].mxu0  ;;  %v496_v25 = vadd.f32 %v4363_v15, %v435_v14  ;;  %v5790_v14 = vld [vmem:[%s6682_s7] sm:$0xff]   ;;  %v5797_v16 = vld [vmem:[%s6682_s7 + $0x8] sm:$0xff]  }
 0x373   :  { %v489_v21 = vadd.f32 %v4362_v11, %v437_v17  ;;  %v505_v22 = vadd.f32 %v4364_v13, %v479_v18  ;;  %v439_v23 = vpop.f32.mrb[7].mxu1  ;;  %v4857_v24 = vpop.f32.mrb[3].mxu0 }
 0x374   :  { %v497_v26 = vadd.f32 %v4363_v15, %v439_v23 }
 0x375   :  { %v5716_v27 = vpack.c.bf16 %v489_v21, %v488_v19  ;;  %v5718_v28 = vpack.c.bf16 %v505_v22, %v504_v20 }
 0x376   :  { %v5720_v29 = vpack.c.bf16 %v497_v26, %v496_v25 }
 0x377   :  { %v576_v31 = vsel %vm574_vm5, %v5718_v28, 0 }
 0x378   :  { %623 = vrot.lane.b32.xlu1 %v5720_v29, %s5501_s23  ;;  %v516_v30 = vsel %vm511_vm4, %v5720_v29, 0 }
 0x379   :  { %4859 = vmatpush3.bf16.xpose.msra.mxu1 %v516_v30 }
 0x37a   :  { %4864 = vmatprep.subr.bf16.mxu1 %v5499_v2 }
 0x37c   :  { %620 = vrot.lane.b32.xlu1 %v5716_v27, %s5501_s23 }
 0x380   :  { %4861 = vmatmul.mubr.msk.bf16.vlgmr.msra.gmra.mrb[8].mxu1 %vm511_vm4, %v5716_v27 }
 0x381   :  { %4865 = vmatpush3.bf16.msra.mxu1 %v576_v31  ;;  %4866 = vmatprep.mubr.msk.bf16.mxu1 %vm5500_vm0, %v5499_v2 }
 0x382   :  { %4876 = vmatprep.subr.bf16.mxu1 %v5499_v2 }
 0x3ea   :  { %v624_v32 = vpop.permute.xlu1 %623 }
 0x3eb   :  { %v629_v33 = vsel %vm511_vm4, %v624_v32, 0 }
 0x3ec   :  { %4871 = vmatpush3.bf16.xpose.msra.mxu0 %v629_v33 }
 0x3ed   :  { %4882 = vmatprep.subr.bf16.mxu0 %v5499_v2 }
 0x3ee   :  { %v621_v34 = vpop.permute.xlu1 %620 }
 0x3f3   :  { %4873 = vmatmul.mubr.msk.bf16.vlgmr.msra.gmra.mrb[4].mxu0 %vm511_vm4, %v621_v34 }
 0x3f4   :  { %4886 = vmatprep.mubr.msk.bf16.mxu0 %vm5500_vm0, %v5499_v2  ;;  %4883 = vmatpush3.bf16.msra.mxu0 %v5774_v4 }
 0x3f5   :  { %4884 = vmatprep.subr.bf16.mxu0 %v5499_v2 }
 0x3f8   :  { %4885 = vmatpush3.bf16.msra.mxu0 %v5780_v5 }
 0x3f9   :  { %4898 = vmatprep.subr.bf16.mxu0 %v5499_v2 }
 0x453   :  { %v552_v41 = vpop.f32.mrb[8].mxu1 }
 0x454   :  { %v553_v42 = vadd.f32 %v552_v41, %v5754_v40  ;;  %v4862_v43 = vpop.f32.mrb[9].mxu1 }
 0x455   :  { %v555_v44 = vpop.f32.mrb[10].mxu1 }
 0x456   :  { %v4863_v45 = vpop.f32.mrb[11].mxu1  ;;  %v559_v8 = vsel %vm558_vm7, %v553_v42, -inf }
 0x457   :  { %560 = vmax.xlane.f32.xlu1 %v559_v8 }
 0x468   :  { %845 = vrot.lane.b32.xlu1 %v5720_v29, %s5503_s1 }
 0x4c6   :  { %v665_v46 = vpop.f32.mrb[4].mxu0 }
 0x4c7   :  { %v666_v47 = vadd.f32 %v665_v46, %v5754_v40  ;;  %v4874_v48 = vpop.f32.mrb[5].mxu0 }
 0x4c8   :  { %v668_v49 = vpop.f32.mrb[6].mxu0 }
 0x4c9   :  { %v4875_v50 = vpop.f32.mrb[7].mxu0  ;;  %v671_v51 = vsel %vm558_vm7, %v666_v47, -inf }
 0x4ca   :  { %672 = vmax.xlane.f32.xlu0 %v671_v51 }
 0x4e4   :  { %v561_v52 = vpop.xlane.xlu1 %560 }
 0x4e5   :  { %v562_v53 = vsub.f32 %v553_v42, %v561_v52 }
 0x4e7   :  { %v563_v54 = vmul.f32 1.442695, %v562_v53 }
 0x4e8   :  { %v846_v22 = vpop.permute.xlu1 %845 }
 0x4e9   :  { %5402 = vpow2.f32 %v563_v54  ;;  %v851_v30 = vsel %vm511_vm4, %v846_v22, 0 }
 0x4f3   :  { %v5403_v55 = vpop.eup %5402 }
 0x4f4   :  { %v565_v56 = vsel %vm558_vm7, %v5403_v55, 0.0 }
 0x4f5   :  { %566 = vadd.xlane.f32.xlu0 %v565_v56 }
 0x557   :  { %v673_v57 = vpop.xlane.xlu0 %672 }
 0x558   :  { %v674_v58 = vsub.f32 %v666_v47, %v673_v57 }
 0x55a   :  { %v675_v59 = vmul.f32 1.442695, %v674_v58  ;;  %v5831_v58 = vld [vmem:[%s6682_s7 + $0x20] sm:$0xff]  }
 0x55c   :  { %5404 = vpow2.f32 %v675_v59 }
 0x566   :  { %v5405_v60 = vpop.eup %5404 }
 0x567   :  { %v677_v61 = vsel %vm558_vm7, %v5405_v60, 0.0 }
 0x568   :  { %678 = vadd.xlane.f32.xlu0 %v677_v61 }
 0x57e   :  { %684 = vrot.lane.b32.xlu0 %v5718_v28, %s5501_s23 }
 0x582   :  { %843 = vrot.lane.b32.xlu0 %v5716_v27, %s5503_s1  ;;  %v567_v62 = vpop.xlane.xlu0 %566 }
 0x583   :  { %5406 = vrcp.f32 %v567_v62 }
 0x58d   :  { %v5407_v63 = vpop.eup %5406 }
 0x58e   :  { %v569_v1 = vmul.f32 %v5407_v63, %v5403_v55 }
 0x590   :  { %v570_v3 = vpack.c.bf16 %v569_v1, %v569_v1 }
 0x592   :  { %4867 = vmatmul.mubr.msk.bf16.vlgmr.msra.gmra.mrb[12].mxu1 %vm558_vm7, %v570_v3 }
 0x593   :  { %4878 = vmatprep.mubr.msk.bf16.mxu1 %vm5500_vm0, %v5499_v2 }
 0x5f5   :  { %v679_v9 = vpop.xlane.xlu0 %678 }
 0x5f6   :  { %5408 = vrcp.f32 %v679_v9  ;;  %v5846_v9 = vld [vmem:[%s6682_s7 + $0x28] sm:$0xff]  }
 0x5f9   :  { %v685_v10 = vpop.permute.xlu0 %684 }
 0x5fa   :  { %v690_v11 = vsel %vm574_vm5, %v685_v10, 0 }
 0x5fb   :  { %4877 = vmatpush3.bf16.msra.mxu1 %v690_v11 }
 0x5fc   :  { %4890 = vmatprep.subr.bf16.mxu1 %v5499_v2 }
 0x5fd   :  { %v844_v32 = vpop.permute.xlu0 %843 }
 0x600   :  { %v5409_v12 = vpop.eup %5408 }
 0x601   :  { %v681_v13 = vmul.f32 %v5409_v12, %v5405_v60 }
 0x603   :  { %v682_v15 = vpack.c.bf16 %v681_v13, %v681_v13 }
 0x605   :  { %4879 = vmatmul.mubr.msk.bf16.vlgmr.msra.gmra.mrb[16].mxu1 %vm558_vm7, %v682_v15 }
 0x606   :  { %4891 = vmatpush3.bf16.msra.mxu1 %v5790_v14  ;;  %4894 = vmatprep.mubr.msk.bf16.mxu1 %vm5500_vm0, %v5499_v2 }
 0x607   :  { %4892 = vmatprep.subr.bf16.mxu1 %v5499_v2 }
 0x60a   :  { %4893 = vmatpush3.bf16.msra.mxu1 %v5797_v16 }
 0x60b   :  { %4904 = vmatprep.subr.bf16.mxu1 %v5499_v2 }
 0x665   :  { %v612_v17 = vpop.f32.mrb[12].mxu1 }
 0x666   :  { %v618_v18 = vpack.c.bf16 %v612_v17, %v612_v17  ;;  %v4868_v19 = vpop.f32.mrb[13].mxu1 }
 0x667   :  { %v615_v20 = vpop.f32.mrb[14].mxu1 }
 0x668   :  { %v4869_v21 = vpop.f32.mrb[15].mxu1  ;;  %4895 = vmatmul.mubr.msk.bf16.vlgmr.msra.gmra.mrb[20].mxu1 %vm511_vm4, %v618_v18 }
 0x669   :  { %4906 = vmatprep.mubr.msk.bf16.mxu1 %vm5500_vm0, %v5499_v2 }
 0x6d8   :  { %v726_v23 = vpop.f32.mrb[16].mxu1 }
 0x6d9   :  { %v732_v24 = vpack.c.bf16 %v726_v23, %v726_v23  ;;  %v4880_v25 = vpop.f32.mrb[17].mxu1  ;;  %v5858_v23 = vrot.slane %v5716_v27, 4 }
 0x6da   :  { %v729_v26 = vpop.f32.mrb[18].mxu1 }
 0x6db   :  { %v4881_v31 = vpop.f32.mrb[19].mxu1  ;;  %4887 = vmatmul.mubr.msk.bf16.vlgmr.msra.gmra.mrb[8].mxu0 %vm511_vm4, %v732_v24 }
 0x6dc   :  { %4899 = vmatpush3.bf16.xpose.msra.mxu0 %v851_v30  ;;  %4900 = vmatprep.mubr.msk.bf16.mxu0 %vm5500_vm0, %v5499_v2 }
 0x6dd   :  { %4910 = vmatprep.subr.bf16.mxu0 %v5499_v2 }
 0x6e3   :  { %4901 = vmatmul.mubr.msk.bf16.vlgmr.msra.gmra.mrb[12].mxu0 %vm511_vm4, %v844_v32 }
 0x6e4   :  { %4914 = vmatprep.mubr.msk.bf16.mxu0 %vm5500_vm0, %v5499_v2  ;;  %4911 = vmatpush3.bf16.msra.mxu0 %v5831_v58 }
 0x6e5   :  { %4912 = vmatprep.subr.bf16.mxu0 %v5499_v2 }
 0x6e8   :  { %4913 = vmatpush3.bf16.msra.mxu0 %v5846_v9 }
 0x6e9   :  { %4924 = vmatprep.subr.bf16.mxu0 %v5499_v2 }
 0x73b   :  { %v837_v33 = vpop.f32.mrb[20].mxu1 }
 0x73c   :  { %v4896_v34 = vpop.f32.mrb[21].mxu1 }
 0x73d   :  { %v840_v35 = vpop.f32.mrb[22].mxu1 }
 0x73e   :  { %v4897_v38 = vpop.f32.mrb[23].mxu1 }
 0x7ae   :  { %v782_v41 = vpop.f32.mrb[8].mxu0 }
 0x7af   :  { %v5815_v42 = vadd.f32 %v837_v33, %v782_v41  ;;  %v4888_v43 = vpop.f32.mrb[9].mxu0  ;;  %v5876_v41 = vld [vmem:[%s6682_s7 + $0x30] sm:$0xff]  }
 0x7b0   :  { %v785_v44 = vpop.f32.mrb[10].mxu0 }
 0x7b1   :  { %v4889_v45 = vpop.f32.mrb[11].mxu0 }
 0x7b6   :  { %v887_v8 = vpop.f32.mrb[12].mxu0 }
 0x7b7   :  { %v888_v46 = vadd.f32 %v887_v8, %v5754_v40  ;;  %v4902_v47 = vpop.f32.mrb[13].mxu0 }
 0x7b8   :  { %v890_v48 = vpop.f32.mrb[14].mxu0 }
 0x7b9   :  { %v4903_v49 = vpop.f32.mrb[15].mxu0  ;;  %v893_v50 = vsel %vm558_vm7, %v888_v46, -inf }
 0x7ba   :  { %894 = vmax.xlane.f32.xlu0 %v893_v50 }
 0x7d0   :  { %905 = vrot.lane.b32.xlu0 %v5718_v28, %s5503_s1 }
 0x7d4   :  { %1010 = vrot.lane.b32.xlu0 %v5716_v27, %s5504_s13  ;;  %v5866_v27 = vrot.slane %v5720_v29, 4 }
 0x7d6   :  { %v1187_v47 = vsel %vm511_vm4, %v5866_v27, 0 }
 0x847   :  { %v895_v51 = vpop.xlane.xlu0 %894 }
 0x848   :  { %v896_v52 = vsub.f32 %v888_v46, %v895_v51  ;;  %v5907_v51 = vrot.slane %v5718_v28, 4 }
 0x84a   :  { %v897_v53 = vmul.f32 1.442695, %v896_v52 }
 0x84b   :  { %v906_v54 = vpop.permute.xlu0 %905 }
 0x84c   :  { %5410 = vpow2.f32 %v897_v53  ;;  %v911_v55 = vsel %vm574_vm5, %v906_v54, 0  ;;  %v5910_v53 = vsub.s32 1, %v5745_v36 }
 0x84d   :  { %4905 = vmatpush3.bf16.msra.mxu1 %v911_v55 }
 0x84e   :  { %4918 = vmatprep.subr.bf16.mxu1 %v5499_v2 }
 0x84f   :  { %v1011_v3 = vpop.permute.xlu0 %1010 }
 0x856   :  { %v5411_v56 = vpop.eup %5410 }
 0x857   :  { %v899_v57 = vsel %vm558_vm7, %v5411_v56, 0.0 }
 0x858   :  { %900 = vadd.xlane.f32.xlu1 %v899_v57  ;;  %v1246_v57 = vsel %vm574_vm5, %v5907_v51, 0 }
 0x869   :  { %1012 = vrot.lane.b32.xlu1 %v5720_v29, %s5504_s13  ;;  %v5882_v29 = vld [vmem:[%s6682_s7 + $0x38] sm:$0xff]  }
 0x8e5   :  { %v901_v59 = vpop.xlane.xlu1 %900 }
 0x8e6   :  { %5412 = vrcp.f32 %v901_v59 }
 0x8e9   :  { %v1013_v62 = vpop.permute.xlu1 %1012 }
 0x8ea   :  { %v1018_v1 = vsel %vm511_vm4, %v1013_v62, 0 }
 0x8f0   :  { %v5413_v60 = vpop.eup %5412 }
 0x8f1   :  { %v903_v61 = vmul.f32 %v5413_v60, %v5411_v56 }
 0x8f3   :  { %v904_v63 = vpack.c.bf16 %v903_v61, %v903_v61 }
 0x8f5   :  { %4907 = vmatmul.mubr.msk.bf16.vlgmr.msra.gmra.mrb[24].mxu1 %vm558_vm7, %v904_v63 }
 0x8f6   :  { %4919 = vmatpush3.bf16.xpose.msra.mxu1 %v1018_v1  ;;  %4920 = vmatprep.mubr.msk.bf16.mxu1 %vm5500_vm0, %v5499_v2 }
 0x8f7   :  { %4930 = vmatprep.subr.bf16.mxu1 %v5499_v2 }
 0x8fd   :  { %4921 = vmatmul.mubr.msk.bf16.vlgmr.msra.gmra.mrb[28].mxu1 %vm511_vm4, %v1011_v3 }
 0x8fe   :  { %4934 = vmatprep.mubr.msk.bf16.mxu1 %vm5500_vm0, %v5499_v2  ;;  %4931 = vmatpush3.bf16.msra.mxu1 %v5876_v41 }
 0x8ff   :  { %4932 = vmatprep.subr.bf16.mxu1 %v5499_v2 }
 0x902   :  { %4933 = vmatpush3.bf16.msra.mxu1 %v5882_v29 }
 0x903   :  { %4944 = vmatprep.subr.bf16.mxu1 %v5499_v2 }
 0x9c8   :  { %v947_v10 = vpop.f32.mrb[24].mxu1 }
 0x9c9   :  { %v953_v11 = vpack.c.bf16 %v947_v10, %v947_v10  ;;  %v4908_v12 = vpop.f32.mrb[25].mxu1 }
 0x9ca   :  { %v950_v13 = vpop.f32.mrb[26].mxu1 }
 0x9cb   :  { %v4909_v15 = vpop.f32.mrb[27].mxu1  ;;  %4915 = vmatmul.mubr.msk.bf16.vlgmr.msra.gmra.mrb[16].mxu0 %vm511_vm4, %v953_v11 }
 0x9cc   :  { %4926 = vmatprep.mubr.msk.bf16.mxu0 %vm5500_vm0, %v5499_v2 }
 0x9d0   :  { %v1054_v17 = vpop.f32.mrb[28].mxu1 }
 0x9d1   :  { %v1055_v18 = vadd.f32 %v1054_v17, %v5754_v40  ;;  %v4922_v19 = vpop.f32.mrb[29].mxu1 }
 0x9d2   :  { %v1057_v20 = vpop.f32.mrb[30].mxu1 }
 0x9d3   :  { %v4923_v21 = vpop.f32.mrb[31].mxu1  ;;  %v1060_v22 = vsel %vm558_vm7, %v1055_v18, -inf }
 0x9d4   :  { %1061 = vmax.xlane.f32.xlu0 %v1060_v22 }
 0x9ea   :  { %1072 = vrot.lane.b32.xlu0 %v5718_v28, %s5504_s13  ;;  %v5919_v28 = vrot.slane %v5750_v39, %v5910_v53 }
 0x9ee   :  { %1289 = vrot.lane.b32.xlu0 %v5858_v23, %s5501_s23 }
 0xa61   :  { %v1062_v24 = vpop.xlane.xlu0 %1061 }
 0xa62   :  { %v1063_v25 = vsub.f32 %v1055_v18, %v1062_v24 }
 0xa64   :  { %v1064_v26 = vmul.f32 1.442695, %v1063_v25 }
 0xa65   :  { %v1073_v30 = vpop.permute.xlu0 %1072 }
 0xa66   :  { %5414 = vpow2.f32 %v1064_v26  ;;  %v1078_v31 = vsel %vm574_vm5, %v1073_v30, 0 }
 0xa67   :  { %4925 = vmatpush3.bf16.msra.mxu0 %v1078_v31 }
 0xa68   :  { %4938 = vmatprep.subr.bf16.mxu0 %v5499_v2 }
 0xa69   :  { %v1290_v50 = vpop.permute.xlu0 %1289 }
 0xa70   :  { %v5415_v32 = vpop.eup %5414 }
 0xa71   :  { %v1066_v33 = vsel %vm558_vm7, %v5415_v32, 0.0 }
 0xa72   :  { %1067 = vadd.xlane.f32.xlu1 %v1066_v33 }
 0xa83   :  { %1291 = vrot.lane.b32.xlu1 %v5866_v27, %s5501_s23 }
 0xa9e   :  { %v1003_v34 = vpop.f32.mrb[16].mxu0 }
 0xa9f   :  { %v5871_v35 = vadd.f32 %v1003_v34, %v5815_v42  ;;  %v4916_v38 = vpop.f32.mrb[17].mxu0 }
 0xaa0   :  { %v1006_v43 = vpop.f32.mrb[18].mxu0 }
 0xaa1   :  { %v4917_v44 = vpop.f32.mrb[19].mxu0 }
 0xaff   :  { %v1068_v42 = vpop.xlane.xlu1 %1067 }
 0xb00   :  { %5416 = vrcp.f32 %v1068_v42 }
 0xb03   :  { %v1292_v48 = vpop.permute.xlu1 %1291 }
 0xb04   :  { %v1297_v49 = vsel %vm511_vm4, %v1292_v48, 0 }
 0xb0a   :  { %v5417_v45 = vpop.eup %5416 }
 0xb0b   :  { %v1070_v8 = vmul.f32 %v5417_v45, %v5415_v32 }
 0xb0d   :  { %v1071_v46 = vpack.c.bf16 %v1070_v8, %v1070_v8 }
 0xb0f   :  { %4927 = vmatmul.mubr.msk.bf16.vlgmr.msra.gmra.mrb[20].mxu0 %vm558_vm7, %v1071_v46 }
 0xb10   :  { %4939 = vmatpush3.bf16.xpose.msra.mxu0 %v1187_v47  ;;  %4940 = vmatprep.mubr.msk.bf16.mxu0 %vm5500_vm0, %v5499_v2 }
 0xb11   :  { %4950 = vmatprep.subr.bf16.mxu0 %v5499_v2 }
 0xb17   :  { %4941 = vmatmul.mubr.msk.bf16.vlgmr.msra.gmra.mrb[24].mxu0 %vm511_vm4, %v5858_v23 }
 0xb18   :  { %4951 = vmatpush3.bf16.xpose.msra.mxu0 %v1297_v49  ;;  %4952 = vmatprep.mubr.msk.bf16.mxu0 %vm5500_vm0, %v5499_v2 }
 0xb19   :  { %4962 = vmatprep.subr.bf16.mxu0 %v5499_v2 }
 0xb1f   :  { %4953 = vmatmul.mubr.msk.bf16.vlgmr.msra.gmra.mrb[28].mxu0 %vm511_vm4, %v1290_v50 }
 0xb20   :  { %4963 = vmatpush3.bf16.msra.mxu0 %v5774_v4  ;;  %4966 = vmatprep.mubr.msk.bf16.mxu0 %vm5500_vm0, %v5499_v2 }
 0xb21   :  { %4964 = vmatprep.subr.bf16.mxu0 %v5499_v2 }
 0xb24   :  { %4965 = vmatpush3.bf16.msra.mxu0 %v5780_v5 }
 0xb25   :  { %4978 = vmatprep.subr.bf16.mxu0 %v5499_v2 }
 0xbe2   :  { %v1114_v52 = vpop.f32.mrb[20].mxu0 }
 0xbe3   :  { %v1120_v54 = vpack.c.bf16 %v1114_v52, %v1114_v52  ;;  %v4928_v55 = vpop.f32.mrb[21].mxu0 }
 0xbe4   :  { %v1117_v56 = vpop.f32.mrb[22].mxu0 }
 0xbe5   :  { %v4929_v4 = vpop.f32.mrb[23].mxu0  ;;  %4935 = vmatmul.mubr.msk.bf16.vlgmr.msra.gmra.mrb[32].mxu1 %vm511_vm4, %v1120_v54 }
 0xbe6   :  { %4945 = vmatpush3.bf16.msra.mxu1 %v1246_v57  ;;  %4946 = vmatprep.mubr.msk.bf16.mxu1 %vm5500_vm0, %v5499_v2 }
 0xbe7   :  { %4956 = vmatprep.subr.bf16.mxu1 %v5499_v2 }
 0xbea   :  { %v1223_v36 = vpop.f32.mrb[24].mxu0 }
 0xbeb   :  { %v1224_v5 = vadd.f32 %v1223_v36, %v5919_v28  ;;  %v4942_v59 = vpop.f32.mrb[25].mxu0 }
 0xbec   :  { %v1226_v60 = vpop.f32.mrb[26].mxu0 }
 0xbed   :  { %v4943_v61 = vpop.f32.mrb[27].mxu0  ;;  %v1229_v62 = vsel %vm558_vm7, %v1224_v5, -inf }
 0xbee   :  { %1230 = vmax.xlane.f32.xlu0 %v1229_v62 }
 0xbf2   :  { %v1333_v63 = vpop.f32.mrb[28].mxu0 }
 0xbf3   :  { %v1334_v1 = vadd.f32 %v1333_v63, %v5919_v28  ;;  %v4954_v3 = vpop.f32.mrb[29].mxu0 }
 0xbf4   :  { %v1336_v10 = vpop.f32.mrb[30].mxu0 }
 0xbf5   :  { %v4955_v11 = vpop.f32.mrb[31].mxu0  ;;  %v1339_v39 = vsel %vm558_vm7, %v1334_v1, -inf }
 0xbf6   :  { %1340 = vmax.xlane.f32.xlu1 %v1339_v39 }
 0xc07   :  { %1351 = vrot.lane.b32.xlu1 %v5907_v51, %s5501_s23 }
 0xc0b   :  { %1486 = vrot.lane.b32.xlu1 %v5858_v23, %s5503_s1 }
 0xc7b   :  { %v1231_v12 = vpop.xlane.xlu0 %1230 }
 0xc7c   :  { %v1232_v13 = vsub.f32 %v1224_v5, %v1231_v12 }
 0xc7e   :  { %v1233_v15 = vmul.f32 1.442695, %v1232_v13 }
 0xc80   :  { %5418 = vpow2.f32 %v1233_v15 }
 0xc83   :  { %v1341_v17 = vpop.xlane.xlu1 %1340 }
 0xc84   :  { %v1342_v18 = vsub.f32 %v1334_v1, %v1341_v17 }
 0xc86   :  { %v1343_v19 = vmul.f32 1.442695, %v1342_v18 }
 0xc87   :  { %v1352_v44 = vpop.permute.xlu1 %1351 }
 0xc88   :  { %5420 = vpow2.f32 %v1343_v19  ;;  %v1357_v45 = vsel %vm574_vm5, %v1352_v44, 0 }
 0xc8a   :  { %v5419_v20 = vpop.eup %5418 }
 0xc8b   :  { %v1235_v21 = vsel %vm558_vm7, %v5419_v20, 0.0  ;;  %v1487_v36 = vpop.permute.xlu1 %1486 }
 0xc8c   :  { %1236 = vadd.xlane.f32.xlu0 %v1235_v21 }
 0xc92   :  { %v5421_v22 = vpop.eup %5420 }
 0xc93   :  { %v1345_v24 = vsel %vm558_vm7, %v5421_v22, 0.0 }
 0xc94   :  { %1346 = vadd.xlane.f32.xlu0 %v1345_v24 }
 0xcaa   :  { %1488 = vrot.lane.b32.xlu0 %v5866_v27, %s5503_s1 }
 0xcb8   :  { %v1170_v25 = vpop.f32.mrb[32].mxu1 }
 0xcb9   :  { %v5935_v26 = vadd.f32 %v1170_v25, %v5871_v35  ;;  %v4936_v30 = vpop.f32.mrb[33].mxu1 }
 0xcba   :  { %v1173_v31 = vpop.f32.mrb[34].mxu1 }
 0xcbb   :  { %v4937_v32 = vpop.f32.mrb[35].mxu1 }
 0xd19   :  { %v1237_v33 = vpop.xlane.xlu0 %1236 }
 0xd1a   :  { %5422 = vrcp.f32 %v1237_v33 }
 0xd21   :  { %v1347_v34 = vpop.xlane.xlu0 %1346 }
 0xd22   :  { %5424 = vrcp.f32 %v1347_v34 }
 0xd24   :  { %v5423_v38 = vpop.eup %5422 }
 0xd25   :  { %v1239_v43 = vmul.f32 %v5423_v38, %v5419_v20 }
 0xd27   :  { %v1240_v42 = vpack.c.bf16 %v1239_v43, %v1239_v43 }
 0xd29   :  { %4947 = vmatmul.mubr.msk.bf16.vlgmr.msra.gmra.mrb[36].mxu1 %vm558_vm7, %v1240_v42 }
 0xd2a   :  { %4957 = vmatpush3.bf16.msra.mxu1 %v1357_v45  ;;  %4958 = vmatprep.mubr.msk.bf16.mxu1 %vm5500_vm0, %v5499_v2 }
 0xd2b   :  { %4970 = vmatprep.subr.bf16.mxu1 %v5499_v2 }
 0xd2c   :  { %v5425_v35 = vpop.eup %5424 }
 0xd2d   :  { %v1349_v8 = vmul.f32 %v5425_v35, %v5421_v22 }
 0xd2f   :  { %v1350_v46 = vpack.c.bf16 %v1349_v8, %v1349_v8 }
 0xd31   :  { %4959 = vmatmul.mubr.msk.bf16.vlgmr.msra.gmra.mrb[40].mxu1 %vm558_vm7, %v1350_v46 }
 0xd32   :  { %4971 = vmatpush3.bf16.msra.mxu1 %v5790_v14  ;;  %4974 = vmatprep.mubr.msk.bf16.mxu1 %vm5500_vm0, %v5499_v2  ;;  %v1489_v14 = vpop.permute.xlu0 %1488 }
 0xd33   :  { %4972 = vmatprep.subr.bf16.mxu1 %v5499_v2  ;;  %v1494_v57 = vsel %vm511_vm4, %v1489_v14, 0 }
 0xd36   :  { %4973 = vmatpush3.bf16.msra.mxu1 %v5797_v16 }
 0xd37   :  { %4984 = vmatprep.subr.bf16.mxu1 %v5499_v2 }
 0xdfc   :  { %v1282_v47 = vpop.f32.mrb[36].mxu1 }
 0xdfd   :  { %v1288_v48 = vpack.c.bf16 %v1282_v47, %v1282_v47  ;;  %v4948_v49 = vpop.f32.mrb[37].mxu1 }
 0xdfe   :  { %v1285_v50 = vpop.f32.mrb[38].mxu1 }
 0xdff   :  { %v4949_v52 = vpop.f32.mrb[39].mxu1  ;;  %4975 = vmatmul.mubr.msk.bf16.vlgmr.msra.gmra.mrb[44].mxu1 %vm511_vm4, %v1288_v48 }
 0xe00   :  { %4986 = vmatprep.mubr.msk.bf16.mxu1 %vm5500_vm0, %v5499_v2  ;;  %v4397_v52 = vld [vmem:[%s6680_s4 + $0x5] ss:$0 sm:$0xff] }
 0xe04   :  { %v1393_v54 = vpop.f32.mrb[40].mxu1 }
 0xe05   :  { %v1399_v55 = vpack.c.bf16 %v1393_v54, %v1393_v54  ;;  %v4960_v56 = vpop.f32.mrb[41].mxu1  ;;  %v1801_v54 = vadd.f32 %v4397_v52, %v5935_v26 }
 0xe06   :  { %v1396_v4 = vpop.f32.mrb[42].mxu1 }
 0xe07   :  { %v4961_v16 = vpop.f32.mrb[43].mxu1  ;;  %4967 = vmatmul.mubr.msk.bf16.vlgmr.msra.gmra.mrb[32].mxu0 %vm511_vm4, %v1399_v55 }
 0xe08   :  { %4979 = vmatpush3.bf16.xpose.msra.mxu0 %v1494_v57  ;;  %4980 = vmatprep.mubr.msk.bf16.mxu0 %vm5500_vm0, %v5499_v2 }
 0xe09   :  { %4990 = vmatprep.subr.bf16.mxu0 %v5499_v2 }
 0xe0f   :  { %4981 = vmatmul.mubr.msk.bf16.vlgmr.msra.gmra.mrb[36].mxu0 %vm511_vm4, %v1487_v36 }
 0xe10   :  { %4991 = vmatpush3.bf16.msra.mxu0 %v5831_v58  ;;  %4994 = vmatprep.mubr.msk.bf16.mxu0 %vm5500_vm0, %v5499_v2 }
 0xe11   :  { %4992 = vmatprep.subr.bf16.mxu0 %v5499_v2 }
 0xe14   :  { %4993 = vmatpush3.bf16.msra.mxu0 %v5846_v9 }
 0xe15   :  { %5004 = vmatprep.subr.bf16.mxu0 %v5499_v2 }
 0xed2   :  { %v1480_v5 = vpop.f32.mrb[44].mxu1 }
 0xed3   :  { %v4976_v59 = vpop.f32.mrb[45].mxu1 }
 0xed4   :  { %v1483_v60 = vpop.f32.mrb[46].mxu1 }
 0xed5   :  { %v4977_v61 = vpop.f32.mrb[47].mxu1 }
 0xeda   :  { %v1437_v62 = vpop.f32.mrb[32].mxu0 }
 0xedb   :  { %v5964_v63 = vadd.f32 %v1480_v5, %v1437_v62  ;;  %v4968_v1 = vpop.f32.mrb[33].mxu0 }
 0xedc   :  { %v1440_v3 = vpop.f32.mrb[34].mxu0 }
 0xedd   :  { %v4969_v10 = vpop.f32.mrb[35].mxu0 }
 0xee2   :  { %v1530_v58 = vpop.f32.mrb[36].mxu0 }
 0xee3   :  { %v1531_v11 = vadd.f32 %v1530_v58, %v5919_v28  ;;  %v4982_v39 = vpop.f32.mrb[37].mxu0 }
 0xee4   :  { %v1533_v12 = vpop.f32.mrb[38].mxu0 }
 0xee5   :  { %v4983_v13 = vpop.f32.mrb[39].mxu0  ;;  %v1536_v9 = vsel %vm558_vm7, %v1531_v11, -inf }
 0xee6   :  { %1537 = vmax.xlane.f32.xlu1 %v1536_v9 }
 0xef7   :  { %1643 = vrot.lane.b32.xlu1 %v5866_v27, %s5504_s13 }
 0xefb   :  { %1641 = vrot.lane.b32.xlu1 %v5858_v23, %s5504_s13 }
 0xf73   :  { %v1538_v15 = vpop.xlane.xlu1 %1537 }
 0xf74   :  { %v1539_v17 = vsub.f32 %v1531_v11, %v1538_v15 }
 0xf76   :  { %v1540_v18 = vmul.f32 1.442695, %v1539_v17 }
 0xf77   :  { %v1644_v25 = vpop.permute.xlu1 %1643 }
 0xf78   :  { %5426 = vpow2.f32 %v1540_v18  ;;  %v1649_v31 = vsel %vm511_vm4, %v1644_v25, 0 }
 0xf7b   :  { %v1642_v32 = vpop.permute.xlu1 %1641 }
 0xf82   :  { %v5427_v19 = vpop.eup %5426 }
 0xf83   :  { %v1542_v20 = vsel %vm558_vm7, %v5427_v19, 0.0 }
 0xf84   :  { %1543 = vadd.xlane.f32.xlu0 %v1542_v20  ;;  %v5272_v20 = vld [vmem:[%s6683_s8 + $0x4] ss:$8 sps:$4 sm:$0xff]  }
 0xf9a   :  { %1548 = vrot.lane.b32.xlu0 %v5907_v51, %s5503_s1 }
0x1011   :  { %v1544_v21 = vpop.xlane.xlu0 %1543 }
0x1012   :  { %5428 = vrcp.f32 %v1544_v21  ;;  %v5275_v21 = vld [vmem:[%s6683_s8 + $0x14] ss:$8 sps:$4 sm:$0xff]  }
0x1015   :  { %v1549_v22 = vpop.permute.xlu0 %1548 }
0x1016   :  { %v1554_v24 = vsel %vm574_vm5, %v1549_v22, 0  ;;  %v5278_v22 = vld [vmem:[%s6683_s8 + $0x24] ss:$8 sps:$4 sm:$0xff]  }
0x1017   :  { %4985 = vmatpush3.bf16.msra.mxu1 %v1554_v24  ;;  %v5276_v24 = vld [vmem:[%s6683_s8 + $0x20] ss:$8 sps:$4 sm:$0xff]  }
0x1018   :  { %4998 = vmatprep.subr.bf16.mxu1 %v5499_v2 }
0x101c   :  { %v5429_v23 = vpop.eup %5428 }
0x101d   :  { %v1546_v27 = vmul.f32 %v5429_v23, %v5427_v19  ;;  %v5270_v19 = vld [vmem:[%s6683_s8] ss:$8 sps:$4 sm:$0xff]  }
0x101f   :  { %v1547_v30 = vpack.c.bf16 %v1546_v27, %v1546_v27 }
0x1021   :  { %4987 = vmatmul.mubr.msk.bf16.vlgmr.msra.gmra.mrb[48].mxu1 %vm558_vm7, %v1547_v30 }
0x1022   :  { %4999 = vmatpush3.bf16.xpose.msra.mxu1 %v1649_v31  ;;  %5000 = vmatprep.mubr.msk.bf16.mxu1 %vm5500_vm0, %v5499_v2  ;;  %v5281_v31 = vld [vmem:[%s6683_s8 + $0x34] ss:$8 sps:$4 sm:$0xff]  }
0x1023   :  { %5010 = vmatprep.subr.bf16.mxu1 %v5499_v2 }
0x1029   :  { %5001 = vmatmul.mubr.msk.bf16.vlgmr.msra.gmra.mrb[52].mxu1 %vm511_vm4, %v1642_v32  ;;  %v5279_v32 = vld [vmem:[%s6683_s8 + $0x30] ss:$8 sps:$4 sm:$0xff]  }
0x102a   :  { %5011 = vmatpush3.bf16.msra.mxu1 %v5876_v41  ;;  %5014 = vmatprep.mubr.msk.bf16.mxu1 %vm5500_vm0, %v5499_v2 }
0x102b   :  { %5012 = vmatprep.subr.bf16.mxu1 %v5499_v2 }
0x102e   :  { %5013 = vmatpush3.bf16.msra.mxu1 %v5882_v29 }
0x10f4   :  { %v1590_v33 = vpop.f32.mrb[48].mxu1 }
0x10f5   :  { %v1596_v34 = vpack.c.bf16 %v1590_v33, %v1590_v33  ;;  %v4988_v38 = vpop.f32.mrb[49].mxu1  ;;  %v5284_v33 = vld [vmem:[%s6683_s8 + $0x44] ss:$8 sps:$4 sm:$0xff]  }
0x10f6   :  { %v1593_v43 = vpop.f32.mrb[50].mxu1  ;;  %v5287_v38 = vld [vmem:[%s6683_s8 + $0x54] ss:$8 sps:$4 sm:$0xff]  }
0x10f7   :  { %v4989_v44 = vpop.f32.mrb[51].mxu1  ;;  %4995 = vmatmul.mubr.msk.bf16.vlgmr.msra.gmra.mrb[40].mxu0 %vm511_vm4, %v1596_v34  ;;  %v5282_v34 = vld [vmem:[%s6683_s8 + $0x40] ss:$8 sps:$4 sm:$0xff]   ;;  %v5285_v43 = vld [vmem:[%s6683_s8 + $0x50] ss:$8 sps:$4 sm:$0xff]  }
0x10f8   :  { %5006 = vmatprep.mubr.msk.bf16.mxu0 %vm5500_vm0, %v5499_v2  ;;  %v5290_v44 = vld [vmem:[%s6683_s8 + $0x64] ss:$8 sps:$4 sm:$0xff]  }
0x10fc   :  { %v1685_v42 = vpop.f32.mrb[52].mxu1 }
0x10fd   :  { %v1686_v41 = vadd.f32 %v1685_v42, %v5919_v28  ;;  %v5002_v45 = vpop.f32.mrb[53].mxu1  ;;  %v5288_v42 = vld [vmem:[%s6683_s8 + $0x60] ss:$8 sps:$4 sm:$0xff]  }
0x10fe   :  { %v1688_v35 = vpop.f32.mrb[54].mxu1  ;;  %v5291_v45 = vld [vmem:[%s6683_s8 + $0x70] ss:$8 sps:$4 sm:$0xff]  }
0x10ff   :  { %v5003_v8 = vpop.f32.mrb[55].mxu1  ;;  %v1691_v46 = vsel %vm558_vm7, %v1686_v41, -inf }
0x1100   :  { %1692 = vmax.xlane.f32.xlu0 %v1691_v46 }
0x1116   :  { %1703 = vrot.lane.b32.xlu0 %v5907_v51, %s5504_s13  ;;  %v1803_v51 = vadd.f32 %v1801_v54, %v5697_v6 }
0x118d   :  { %v1693_v29 = vpop.xlane.xlu0 %1692 }
0x118e   :  { %v1694_v47 = vsub.f32 %v1686_v41, %v1693_v29  ;;  %v5293_v41 = vld [vmem:[%s6683_s8 + $0x74] ss:$8 sps:$4 sm:$0xff]  }
0x1190   :  { %v1695_v48 = vmul.f32 1.442695, %v1694_v47 }
0x1191   :  { %v1704_v49 = vpop.permute.xlu0 %1703 }
0x1192   :  { %5430 = vpow2.f32 %v1695_v48  ;;  %v1709_v50 = vsel %vm574_vm5, %v1704_v49, 0 }
0x1193   :  { %5005 = vmatpush3.bf16.msra.mxu0 %v1709_v50 }
0x1194   :  { %1934 = vmatprep.subr.bf16.mxu0 %v5272_v20 }
0x119c   :  { %v5431_v14 = vpop.eup %5430 }
0x119d   :  { %v1697_v55 = vsel %vm558_vm7, %v5431_v14, 0.0 }
0x119e   :  { %1698 = vadd.xlane.f32.xlu1 %v1697_v55 }
0x11a2   :  { %1807 = vadd.xlane.f32.xlu1 %v1803_v51 }
0x11ca   :  { %v1634_v56 = vpop.f32.mrb[40].mxu0 }
0x11cb   :  { %v1640_v4 = vadd.f32 %v1634_v56, %v5964_v63  ;;  %v4996_v57 = vpop.f32.mrb[41].mxu0 }
0x11cc   :  { %v1637_v16 = vpop.f32.mrb[42].mxu0 }
0x11cd   :  { %v4997_v36 = vpop.f32.mrb[43].mxu0 }
0x11ce   :  { %v5294_v36 = vld [vmem:[%s6684_s9 + $0x40] sm:$0xff]  }
0x11cf   :  { %4708 = vmatprep.subr.bf16.mxu1 %v5294_v36 }
0x122b   :  { %v1699_v5 = vpop.xlane.xlu1 %1698 }
0x122c   :  { %5432 = vrcp.f32 %v1699_v5  ;;  %v5295_v5 = vld [vmem:[%s6684_s9] sm:$0xff]  }
0x122f   :  { %v1808_v63 = vpop.xlane.xlu1 %1807 }
0x1230   :  { %v1811_v58 = vmul.f32 0.0078125, %v1808_v63  ;;  %v5304_v63 = vld [vmem:[%s6684_s9 + $0x68] sm:$0xff]  }
0x1232   :  { %v1813_v15 = vsub.f32 %v1803_v51, %v1811_v58  ;;  %v4399_v51 = vld [vmem:[%s6680_s4 + $0x7] ss:$0 sm:$0xff]  ;;  %v5306_v58 = vld [vmem:[%s6684_s9 + $0x70] sm:$0xff]  }
0x1234   :  { %v1815_v18 = vmul.f32 %v1813_v15, %v1813_v15 }
0x1236   :  { %v5433_v59 = vpop.eup %5432 }
0x1237   :  { %v1701_v60 = vmul.f32 %v5433_v59, %v5431_v14  ;;  %v5296_v59 = vld [vmem:[%s6684_s9 + $0x48] sm:$0xff]  }
0x1239   :  { %v1702_v61 = vpack.c.bf16 %v1701_v60, %v1701_v60  ;;  %v5297_v60 = vld [vmem:[%s6684_s9 + $0x8] sm:$0xff]  }
0x123b   :  { %5007 = vmatmul.mubr.msk.bf16.vlgmr.msra.gmra.mrb[44].mxu0 %vm558_vm7, %v1702_v61  ;;  %v5298_v61 = vld [vmem:[%s6684_s9 + $0x50] sm:$0xff]  }
0x123c   :  { %1966 = vmatprep.mubr.bf16.mxu0 %v5498_v0  ;;  %1935 = vmatpush1.bf16.msra.mxu0 %v5270_v19 }
0x123d   :  { %1936 = vmatprep.subr.bf16.mxu0 %v5275_v21 }
0x130e   :  { %v1745_v26 = vpop.f32.mrb[44].mxu0 }
0x130f   :  { %v1751_v62 = vpack.c.bf16 %v1745_v26, %v1745_v26  ;;  %v5008_v1 = vpop.f32.mrb[45].mxu0  ;;  %v5299_v26 = vld [vmem:[%s6684_s9 + $0x10] sm:$0xff]  }
0x1310   :  { %v1748_v6 = vpop.f32.mrb[46].mxu0  ;;  %v5301_v1 = vld [vmem:[%s6684_s9 + $0x18] sm:$0xff]  }
0x1311   :  { %v5009_v3 = vpop.f32.mrb[47].mxu0  ;;  %5015 = vmatmul.mubr.msk.bf16.vlgmr.msra.gmra.mrb[56].mxu1 %vm511_vm4, %v1751_v62  ;;  %v5300_v62 = vld [vmem:[%s6684_s9 + $0x58] sm:$0xff]   ;;  %v5302_v6 = vld [vmem:[%s6684_s9 + $0x60] sm:$0xff]  }
0x1312   :  { %4709 = vmatpush3.bf16.msra.mxu1 %v5295_v5  ;;  %v5303_v3 = vld [vmem:[%s6684_s9 + $0x20] sm:$0xff]  }
0x1313   :  { %4710 = vmatprep.subr.bf16.mxu1 %v5296_v59 }
0x1316   :  { %4711 = vmatpush3.bf16.msra.mxu1 %v5297_v60 }
0x1317   :  { %4712 = vmatprep.subr.bf16.mxu1 %v5298_v61 }
0x131a   :  { %4713 = vmatpush3.bf16.msra.mxu1 %v5299_v26 }
0x131b   :  { %4714 = vmatprep.subr.bf16.mxu1 %v5300_v62 }
0x131e   :  { %4715 = vmatpush3.bf16.msra.mxu1 %v5301_v1 }
0x131f   :  { %4716 = vmatprep.subr.bf16.mxu1 %v5302_v6 }
0x1322   :  { %4717 = vmatpush3.bf16.msra.mxu1 %v5303_v3 }
0x1323   :  { %4718 = vmatprep.subr.bf16.mxu1 %v5304_v63  ;;  %v4416_v63 = vld [vmem:[%s6680_s4 + $0x8] ss:$0 sm:$0xff] }
0x13e4   :  { %v1789_v10 = vpop.f32.mrb[56].mxu1 }
0x13e5   :  { %v1795_v11 = vadd.f32 %v1789_v10, %v1640_v4  ;;  %v5016_v39 = vpop.f32.mrb[57].mxu1  ;;  %v5305_v10 = vld [vmem:[%s6684_s9 + $0x28] sm:$0xff]  }
0x13e6   :  { %v1792_v12 = vpop.f32.mrb[58].mxu1  ;;  %v5308_v39 = vld [vmem:[%s6684_s9 + $0x78] sm:$0xff]   ;;  %4719 = vmatpush3.bf16.msra.mxu1 %v5305_v10 }
0x13e7   :  { %v1802_v13 = vadd.f32 %v4397_v52, %v1795_v11  ;;  %v5017_v9 = vpop.f32.mrb[59].mxu1  ;;  %v4398_v52 = vld [vmem:[%s6680_s4 + $0x6] ss:$0 sm:$0xff]  ;;  %v5307_v11 = vld [vmem:[%s6684_s9 + $0x30] sm:$0xff]   ;;  %4720 = vmatprep.subr.bf16.mxu1 %v5306_v58  ;;  %v5309_v12 = vld [vmem:[%s6684_s9 + $0x38] sm:$0xff]  }
0x13e9   :  { %v1804_v17 = vadd.f32 %v1802_v13, %v5699_v7  ;;  %v5273_v7 = vld [vmem:[%s6683_s8 + $0x10] ss:$8 sps:$4 sm:$0xff]   ;;  %v1842_v13 = vld [vmem:[%s6685_s5] ss:$2 sm:$0x3] }
0x13ea   :  { %1937 = vmatpush1.bf16.msra.mxu0 %v5273_v7  ;;  %4721 = vmatpush3.bf16.msra.mxu1 %v5307_v11  ;;  %v1847_v9 = vrot.slane %v1842_v13, %v5748_v37 }
0x13eb   :  { %1809 = vadd.xlane.f32.xlu1 %v1804_v17  ;;  %1938 = vmatprep.subr.bf16.mxu0 %v5278_v22 }
0x13ec   :  { %4722 = vmatprep.subr.bf16.mxu1 %v5308_v39 }
0x13ee   :  { %1939 = vmatpush1.bf16.msra.mxu0 %v5276_v24  ;;  %4723 = vmatpush3.bf16.msra.mxu1 %v5309_v12 }
0x13ef   :  { %1817 = vadd.xlane.f32.xlu1 %v1815_v18  ;;  %1940 = vmatprep.subr.bf16.mxu0 %v5281_v31 }
0x13f0   :  { %5018 = vmatprep.subr.bf16.mxu1 %v5499_v2 }
0x13f2   :  { %1941 = vmatpush1.bf16.msra.mxu0 %v5279_v32 }
0x13f3   :  { %1942 = vmatprep.subr.bf16.mxu0 %v5284_v33 }
0x13f6   :  { %1943 = vmatpush1.bf16.msra.mxu0 %v5282_v34 }
0x13f7   :  { %1944 = vmatprep.subr.bf16.mxu0 %v5287_v38 }
0x13fa   :  { %1945 = vmatpush1.bf16.msra.mxu0 %v5285_v43 }
0x13fb   :  { %1946 = vmatprep.subr.bf16.mxu0 %v5290_v44 }
0x13fe   :  { %1947 = vmatpush1.bf16.msra.mxu0 %v5288_v42 }
0x13ff   :  { %1948 = vmatprep.subr.bf16.mxu0 %v5293_v41 }
0x1402   :  { %1949 = vmatpush1.bf16.msra.mxu0 %v5291_v45 }
0x1478   :  { %v1810_v23 = vpop.xlane.xlu1 %1809 }
0x1479   :  { %v1812_v27 = vmul.f32 0.0078125, %v1810_v23 }
0x147b   :  { %v1814_v25 = vsub.f32 %v1804_v17, %v1812_v27 }
0x147c   :  { %v1818_v35 = vpop.xlane.xlu1 %1817 }
0x147d   :  { %v1816_v30 = vmul.f32 %v1814_v25, %v1814_v25  ;;  %v1821_v8 = vmul.f32 0.0078125, %v1818_v35 }
0x147f   :  { %1819 = vadd.xlane.f32.xlu1 %v1816_v30  ;;  %v1823_v46 = vadd.f32 1e-12, %v1821_v8 }
0x1481   :  { %5434 = vrsqrt.f32 %v1823_v46 }
0x148b   :  { %v5435_v49 = vpop.eup %5434 }
0x148c   :  { %v1827_v50 = vmul.f32 %v5435_v49, %v1813_v15  ;;  %v1851_v15 = vrot.slane %v1842_v13, %v5910_v53 }
0x148e   :  { %v1833_v55 = vmul.f32 %v4398_v52, %v1827_v50 }
0x1490   :  { %v6061_v4 = vadd.f32 %v4399_v51, %v1833_v55 }
0x150c   :  { %v1820_v29 = vpop.xlane.xlu1 %1819 }
0x150d   :  { %v1822_v47 = vmul.f32 0.0078125, %v1820_v29 }
0x150f   :  { %v1824_v48 = vadd.f32 1e-12, %v1822_v47 }
0x1511   :  { %5436 = vrsqrt.f32 %v1824_v48 }
0x151b   :  { %v5437_v14 = vpop.eup %5436 }
0x151c   :  { %v1828_v54 = vmul.f32 %v5437_v14, %v1814_v25 }
0x151e   :  { %v1834_v56 = vmul.f32 %v4398_v52, %v1828_v54 }
0x1520   :  { %v6063_v57 = vadd.f32 %v4399_v51, %v1834_v56 }
0x1522   :  { %v1841_v16 = vpack.c.bf16 %v6063_v57, %v6061_v4 }
0x1524   :  { %1967 = vmatmul.mubr.bf16.vlgmr.msra.gmra.mrb[48].mxu0 %v1841_v16 }
0x1525   :  { %2456 = vmatprep.mubr.bf16.mxu0 %v5498_v0 }
0x15f7   :  { %v1968_v17 = vpop.f32.mrb[48].mxu0 }
0x15f8   :  { %v1969_v18 = vadd.f32 %v1968_v17, %v1847_v9  ;;  %v1970_v19 = vpop.f32.mrb[49].mxu0 }
0x15f9   :  { %v1971_v20 = vadd.f32 %v1970_v19, %v1851_v15  ;;  %v1972_v21 = vpop.f32.mrb[50].mxu0  ;;  %v5312_v19 = vld [vmem:[%s6679_s6 + $0xc4] ss:$12 sps:$4 sm:$0xff]  }
0x15fa   :  { %v1981_v7 = vmul.f32 0.044715, %v1969_v18  ;;  %v1973_v22 = vadd.f32 %v1972_v21, %v1847_v9  ;;  %v1974_v24 = vpop.f32.mrb[51].mxu0  ;;  %v1977_v51 = vmul.f32 0.5, %v1969_v18  ;;  %2424 = vmatprep.subr.bf16.mxu0 %v5312_v19 }
0x15fb   :  { %v1982_v23 = vmul.f32 0.044715, %v1971_v20  ;;  %v1975_v27 = vadd.f32 %v1974_v24, %v1851_v15  ;;  %v1978_v36 = vmul.f32 0.5, %v1971_v20 }
0x15fc   :  { %v1985_v25 = vmul.f32 %v1981_v7, %v1969_v18  ;;  %v1983_v30 = vmul.f32 0.044715, %v1973_v22  ;;  %v1979_v56 = vmul.f32 0.5, %v1973_v22 }
0x15fd   :  { %v1986_v31 = vmul.f32 %v1982_v23, %v1971_v20  ;;  %v1984_v32 = vmul.f32 0.044715, %v1975_v27  ;;  %v1980_v5 = vmul.f32 0.5, %v1975_v27 }
0x15fe   :  { %v1989_v33 = vmul.f32 %v1985_v25, %v1969_v18  ;;  %v1987_v34 = vmul.f32 %v1983_v30, %v1973_v22 }
0x15ff   :  { %v1990_v38 = vmul.f32 %v1986_v31, %v1971_v20  ;;  %v1988_v43 = vmul.f32 %v1984_v32, %v1975_v27  ;;  %v5317_v31 = vld [vmem:[%s6679_s6 + $0xe0] ss:$12 sps:$4 sm:$0xff]  }
0x1600   :  { %v1993_v44 = vadd.f32 %v1989_v33, %v1969_v18  ;;  %v1991_v42 = vmul.f32 %v1987_v34, %v1973_v22  ;;  %v5310_v18 = vld [vmem:[%s6679_s6 + $0xc0] ss:$12 sps:$4 sm:$0xff]   ;;  %v5318_v33 = vld [vmem:[%s6679_s6 + $0xf0] ss:$12 sps:$4 sm:$0xff]   ;;  %v5321_v34 = vld [vmem:[%s6679_s6 + $0xf8] ss:$12 sps:$4 sm:$0xff]  }
0x1601   :  { %v1992_v41 = vmul.f32 %v1988_v43, %v1975_v27  ;;  %v1994_v45 = vadd.f32 %v1990_v38, %v1971_v20  ;;  %v5313_v20 = vld [vmem:[%s6679_s6 + $0xc8] ss:$12 sps:$4 sm:$0xff]   ;;  %2425 = vmatpush1.bf16.msra.mxu0 %v5310_v18  ;;  %v5324_v38 = vld [vmem:[%s6679_s6 + $0x10c] ss:$12 sps:$4 sm:$0xff]  }
0x1602   :  { %v1997_v35 = vmul.f32 0.7978846, %v1993_v44  ;;  %v1995_v8 = vadd.f32 %v1991_v42, %v1973_v22  ;;  %v5320_v32 = vld [vmem:[%s6679_s6 + $0xf4] ss:$12 sps:$4 sm:$0xff]   ;;  %v5325_v44 = vld [vmem:[%s6679_s6 + $0x110] ss:$12 sps:$4 sm:$0xff]  }
0x1603   :  { %v1996_v46 = vadd.f32 %v1992_v41, %v1975_v27  ;;  %v1998_v29 = vmul.f32 0.7978846, %v1994_v45  ;;  %v5322_v43 = vld [vmem:[%s6679_s6 + $0x108] ss:$12 sps:$4 sm:$0xff]   ;;  %v5328_v42 = vld [vmem:[%s6679_s6 + $0x124] ss:$12 sps:$4 sm:$0xff]  }
0x1604   :  { %5438 = vtanh.f32 %v1997_v35  ;;  %v1999_v47 = vmul.f32 0.7978846, %v1995_v8  ;;  %v5326_v41 = vld [vmem:[%s6679_s6 + $0x120] ss:$12 sps:$4 sm:$0xff]   ;;  %v5329_v45 = vld [vmem:[%s6679_s6 + $0x128] ss:$12 sps:$4 sm:$0xff]  }
0x1605   :  { %v2000_v48 = vmul.f32 0.7978846, %v1996_v46  ;;  %5440 = vtanh.f32 %v1998_v29  ;;  %v5332_v35 = vld [vmem:[%s6679_s6 + $0x13c] ss:$12 sps:$4 sm:$0xff]   ;;  %v5330_v8 = vld [vmem:[%s6679_s6 + $0x138] ss:$12 sps:$4 sm:$0xff]  }
0x1606   :  { %5442 = vtanh.f32 %v1999_v47  ;;  %v5333_v46 = vld [vmem:[%s6679_s6 + $0x140] ss:$12 sps:$4 sm:$0xff]   ;;  %v5334_v47 = vld [vmem:[%s6679_s6 + $0x150] ss:$12 sps:$4 sm:$0xff]  }
0x1607   :  { %5444 = vtanh.f32 %v2000_v48  ;;  %v5336_v29 = vld [vmem:[%s6679_s6 + $0x154] ss:$12 sps:$4 sm:$0xff]   ;;  %v5337_v48 = vld [vmem:[%s6679_s6 + $0x158] ss:$12 sps:$4 sm:$0xff]  }
0x160e   :  { %v5439_v49 = vpop.eup %5438 }
0x160f   :  { %v5441_v50 = vpop.eup %5440  ;;  %v2005_v52 = vadd.f32 1.0, %v5439_v49  ;;  %v5340_v49 = vld [vmem:[%s6679_s6 + $0x16c] ss:$12 sps:$4 sm:$0xff]  }
0x1610   :  { %v5443_v14 = vpop.eup %5442  ;;  %v2006_v54 = vadd.f32 1.0, %v5441_v50  ;;  %v5338_v50 = vld [vmem:[%s6679_s6 + $0x168] ss:$12 sps:$4 sm:$0xff]  }
0x1611   :  { %v5445_v55 = vpop.eup %5444  ;;  %v2007_v16 = vadd.f32 1.0, %v5443_v14  ;;  %v2009_v60 = vmul.f32 %v2005_v52, %v1977_v51  ;;  %v5341_v52 = vld [vmem:[%s6679_s6 + $0x170] ss:$12 sps:$4 sm:$0xff]  }
0x1612   :  { %v2008_v59 = vadd.f32 1.0, %v5445_v55  ;;  %v2010_v26 = vmul.f32 %v2006_v54, %v1978_v36 }
0x1613   :  { %v2011_v61 = vmul.f32 %v2007_v16, %v1979_v56 }
0x1614   :  { %v2012_v62 = vmul.f32 %v2008_v59, %v1980_v5  ;;  %v4433_v59 = vld [vmem:[%s6680_s4 + $0x9] ss:$0 sm:$0xff] }
0x1615   :  { %v2013_v1 = vpack.c.bf16 %v2011_v61, %v2009_v60 }
0x1616   :  { %v2014_v6 = vpack.c.bf16 %v2012_v62, %v2010_v26  ;;  %v4434_v62 = vld [vmem:[%s6680_s4 + $0xa] ss:$0 sm:$0xff] }
0x1618   :  { %2148 = vmatprep.mubr.bf16.mxu1 %v2014_v6 }
0x1619   :  { %2149 = vmatmul.mubr.bf16.vlgmr.msra.gmra.mrb[60].mxu1 %v2013_v1 }
0x161a   :  { %5034 = vmatprep.mubr.msk.bf16.mxu1 %vm5500_vm0, %v5499_v2  ;;  %5019 = vmatpush3.bf16.msra.mxu1 %v5313_v20 }
0x161b   :  { %5020 = vmatprep.subr.bf16.mxu1 %v5499_v2 }
0x161e   :  { %5021 = vmatpush3.bf16.msra.mxu1 %v5317_v31 }
0x161f   :  { %5022 = vmatprep.subr.bf16.mxu1 %v5499_v2 }
0x1622   :  { %5023 = vmatpush3.bf16.msra.mxu1 %v5321_v34 }
0x1623   :  { %5024 = vmatprep.subr.bf16.mxu1 %v5499_v2 }
0x1626   :  { %5025 = vmatpush3.bf16.msra.mxu1 %v5325_v44 }
0x1627   :  { %5026 = vmatprep.subr.bf16.mxu1 %v5499_v2 }
0x162a   :  { %5027 = vmatpush3.bf16.msra.mxu1 %v5329_v45 }
0x162b   :  { %5028 = vmatprep.subr.bf16.mxu1 %v5499_v2 }
0x162e   :  { %5029 = vmatpush3.bf16.msra.mxu1 %v5333_v46 }
0x162f   :  { %5030 = vmatprep.subr.bf16.mxu1 %v5499_v2 }
0x1632   :  { %5031 = vmatpush3.bf16.msra.mxu1 %v5337_v48 }
0x1633   :  { %5032 = vmatprep.subr.bf16.mxu1 %v5499_v2 }
0x1636   :  { %5033 = vmatpush3.bf16.msra.mxu1 %v5341_v52 }
0x1637   :  { %5044 = vmatprep.subr.bf16.mxu1 %v5499_v2 }
0x16ec   :  { %v4724_v3 = vpop.f32.mrb[60].mxu1 }
0x16ed   :  { %v4725_v10 = vpop.f32.mrb[61].mxu1 }
0x16ee   :  { %v4726_v58 = vadd.f32 %v4725_v10, %v4724_v3  ;;  %v4727_v11 = vpop.f32.mrb[62].mxu1 }
0x16ef   :  { %v4728_v39 = vpop.f32.mrb[63].mxu1 }
0x16f0   :  { %v2151_v12 = vadd.f32 %v4726_v58, %v4416_v63  ;;  %v4729_v13 = vadd.f32 %v4728_v39, %v4727_v11  ;;  %v4555_v58 = vld [vmem:[%s6680_s4 + $0xb] ss:$0 sm:$0xff]  ;;  %v4557_v39 = vld [vmem:[%s6680_s4 + $0xd] ss:$0 sm:$0xff] }
0x16f2   :  { %v2154_v9 = vadd.f32 %v4729_v13, %v4416_v63  ;;  %v2157_v15 = vadd.f32 %v2151_v12, %v6061_v4  ;;  %v5316_v4 = vld [vmem:[%s6679_s6 + $0xdc] ss:$12 sps:$4 sm:$0xff]   ;;  %v4556_v13 = vld [vmem:[%s6680_s4 + $0xc] ss:$0 sm:$0xff] }
0x16f3   :  { %2426 = vmatprep.subr.bf16.mxu0 %v5316_v4 }
0x16f4   :  { %2161 = vadd.xlane.f32.xlu0 %v2157_v15  ;;  %v2158_v17 = vadd.f32 %v2154_v9, %v6063_v57  ;;  %v5314_v57 = vld [vmem:[%s6679_s6 + $0xd8] ss:$12 sps:$4 sm:$0xff]  }
0x16f5   :  { %2427 = vmatpush1.bf16.msra.mxu0 %v5314_v57 }
0x16f6   :  { %2163 = vadd.xlane.f32.xlu1 %v2158_v17  ;;  %2428 = vmatprep.subr.bf16.mxu0 %v5320_v32 }
0x16f9   :  { %2429 = vmatpush1.bf16.msra.mxu0 %v5318_v33 }
0x16fa   :  { %2430 = vmatprep.subr.bf16.mxu0 %v5324_v38 }
0x16fd   :  { %2431 = vmatpush1.bf16.msra.mxu0 %v5322_v43 }
0x16fe   :  { %2432 = vmatprep.subr.bf16.mxu0 %v5328_v42 }
0x1701   :  { %2433 = vmatpush1.bf16.msra.mxu0 %v5326_v41 }
0x1702   :  { %2434 = vmatprep.subr.bf16.mxu0 %v5332_v35 }
0x1705   :  { %2435 = vmatpush1.bf16.msra.mxu0 %v5330_v8 }
0x1706   :  { %2436 = vmatprep.subr.bf16.mxu0 %v5336_v29 }
0x1709   :  { %2437 = vmatpush1.bf16.msra.mxu0 %v5334_v47 }
0x170a   :  { %2438 = vmatprep.subr.bf16.mxu0 %v5340_v49 }
0x170d   :  { %2439 = vmatpush1.bf16.msra.mxu0 %v5338_v50 }
0x170e   :  { %5038 = vmatprep.subr.bf16.mxu0 %v5499_v2 }
0x1781   :  { %v2162_v21 = vpop.xlane.xlu0 %2161 }
0x1782   :  { %v2165_v7 = vmul.f32 0.0078125, %v2162_v21 }
0x1783   :  { %v2164_v22 = vpop.xlane.xlu1 %2163 }
0x1784   :  { %v2167_v24 = vsub.f32 %v2157_v15, %v2165_v7  ;;  %v2166_v23 = vmul.f32 0.0078125, %v2164_v22 }
0x1786   :  { %v6145_v27 = vsub.f32 %v2158_v17, %v2166_v23  ;;  %v2169_v25 = vmul.f32 %v2167_v24, %v2167_v24 }
0x1788   :  { %2171 = vadd.xlane.f32.xlu1 %v2169_v25  ;;  %v2170_v30 = vmul.f32 %v6145_v27, %v6145_v27 }
0x178c   :  { %2173 = vadd.xlane.f32.xlu1 %v2170_v30 }
0x1815   :  { %v2172_v14 = vpop.xlane.xlu1 %2171 }
0x1816   :  { %v2175_v54 = vmul.f32 0.0078125, %v2172_v14 }
0x1818   :  { %v2177_v55 = vadd.f32 1e-12, %v2175_v54 }
0x1819   :  { %v2174_v51 = vpop.xlane.xlu1 %2173 }
0x181a   :  { %5446 = vrsqrt.f32 %v2177_v55  ;;  %v2176_v56 = vmul.f32 0.0078125, %v2174_v51 }
0x181c   :  { %v2178_v16 = vadd.f32 1e-12, %v2176_v56 }
0x181e   :  { %5448 = vrsqrt.f32 %v2178_v16 }
0x1824   :  { %v5447_v36 = vpop.eup %5446 }
0x1825   :  { %v2181_v5 = vmul.f32 %v5447_v36, %v2167_v24 }
0x1827   :  { %v2187_v26 = vmul.f32 %v4433_v59, %v2181_v5 }
0x1828   :  { %v5449_v60 = vpop.eup %5448 }
0x1829   :  { %v2182_v61 = vmul.f32 %v5449_v60, %v6145_v27  ;;  %v6221_v6 = vadd.f32 %v4434_v62, %v2187_v26  ;;  %v6289_v26 = vld [vmem:[%s6682_s7 + $0x58] sm:$0xff]  }
0x182b   :  { %v2188_v1 = vmul.f32 %v4433_v59, %v2182_v61  ;;  %v6283_v61 = vld [vmem:[%s6682_s7 + $0x50] sm:$0xff]  }
0x182d   :  { %v6223_v3 = vadd.f32 %v4434_v62, %v2188_v1 }
0x182f   :  { %v2295_v63 = vpack.c.bf16 %v6223_v3, %v6221_v6 }
0x1831   :  { %2457 = vmatmul.mubr.bf16.vlgmr.msra.gmra.mrb[52].mxu0 %v2295_v63  ;;  %5035 = vmatmul.mubr.bf16.vlgmr.msra.gmra.mrb[64].mxu1 %v2295_v63 }
0x1832   :  { %5040 = vmatprep.mubr.msk.bf16.mxu0 %vm5500_vm0, %v5499_v2  ;;  %5046 = vmatprep.mubr.msk.bf16.mxu1 %vm5500_vm0, %v5499_v2 }
0x1904   :  { %v2458_v10 = vpop.f32.mrb[52].mxu0  ;;  %v2501_v11 = vpop.f32.mrb[64].mxu1 }
0x1905   :  { %v2460_v12 = vpop.f32.mrb[53].mxu0  ;;  %v5036_v9 = vpop.f32.mrb[65].mxu1  ;;  %v2513_v18 = vadd.f32 %v4555_v58, %v2458_v10  ;;  %v2529_v19 = vadd.f32 %v4557_v39, %v2501_v11  ;;  %v6299_v11 = vld [vmem:[%s6682_s7 + $0x40] sm:$0xff]  }
0x1906   :  { %v2462_v15 = vpop.f32.mrb[54].mxu0  ;;  %v2504_v17 = vpop.f32.mrb[66].mxu1  ;;  %v2521_v7 = vadd.f32 %v4556_v13, %v2460_v12  ;;  %v6306_v12 = vld [vmem:[%s6682_s7 + $0x48] sm:$0xff]  }
0x1907   :  { %v2514_v20 = vadd.f32 %v4555_v58, %v2462_v15  ;;  %v2530_v4 = vadd.f32 %v4557_v39, %v2504_v17  ;;  %v2464_v57 = vpop.f32.mrb[55].mxu0  ;;  %v5037_v21 = vpop.f32.mrb[67].mxu1 }
0x1908   :  { %v2522_v22 = vadd.f32 %v4556_v13, %v2464_v57 }
0x1909   :  { %v6240_v24 = vpack.c.bf16 %v2514_v20, %v2513_v18  ;;  %v6242_v23 = vpack.c.bf16 %v2530_v4, %v2529_v19 }
0x190a   :  { %v6244_v27 = vpack.c.bf16 %v2522_v22, %v2521_v7 }
0x190b   :  { %v2594_v25 = vsel %vm574_vm5, %v6242_v23, 0 }
0x190c   :  { %5045 = vmatpush3.bf16.msra.mxu1 %v2594_v25  ;;  %2641 = vrot.lane.b32.xlu1 %v6244_v27, %s5501_s23  ;;  %v2536_v30 = vsel %vm511_vm4, %v6244_v27, 0 }
0x190d   :  { %5039 = vmatpush3.bf16.xpose.msra.mxu0 %v2536_v30  ;;  %5056 = vmatprep.subr.bf16.mxu1 %v5499_v2 }
0x190e   :  { %5050 = vmatprep.subr.bf16.mxu0 %v5499_v2 }
0x1910   :  { %2638 = vrot.lane.b32.xlu1 %v6240_v24, %s5501_s23 }
0x1914   :  { %5041 = vmatmul.mubr.msk.bf16.vlgmr.msra.gmra.mrb[56].mxu0 %vm511_vm4, %v6240_v24 }
0x1915   :  { %5052 = vmatprep.mubr.msk.bf16.mxu0 %vm5500_vm0, %v5499_v2 }
0x197e   :  { %v2642_v31 = vpop.permute.xlu1 %2641 }
0x197f   :  { %v2647_v32 = vsel %vm511_vm4, %v2642_v31, 0 }
0x1980   :  { %5051 = vmatpush3.bf16.xpose.msra.mxu0 %v2647_v32 }
0x1981   :  { %5062 = vmatprep.subr.bf16.mxu0 %v5499_v2 }
0x1982   :  { %v2639_v33 = vpop.permute.xlu1 %2638 }
0x1987   :  { %5053 = vmatmul.mubr.msk.bf16.vlgmr.msra.gmra.mrb[60].mxu0 %vm511_vm4, %v2639_v33 }
0x1988   :  { %5066 = vmatprep.mubr.msk.bf16.mxu0 %vm5500_vm0, %v5499_v2  ;;  %5063 = vmatpush3.bf16.msra.mxu0 %v6283_v61 }
0x1989   :  { %5064 = vmatprep.subr.bf16.mxu0 %v5499_v2 }
0x198c   :  { %5065 = vmatpush3.bf16.msra.mxu0 %v6289_v26 }
0x198d   :  { %5078 = vmatprep.subr.bf16.mxu0 %v5499_v2 }
0x19e7   :  { %v2572_v34 = vpop.f32.mrb[56].mxu0 }
0x19e8   :  { %v2573_v38 = vadd.f32 %v2572_v34, %v5754_v40  ;;  %v5042_v43 = vpop.f32.mrb[57].mxu0 }
0x19e9   :  { %v2575_v44 = vpop.f32.mrb[58].mxu0 }
0x19ea   :  { %v5043_v42 = vpop.f32.mrb[59].mxu0  ;;  %v2578_v41 = vsel %vm558_vm7, %v2573_v38, -inf }
0x19eb   :  { %2579 = vmax.xlane.f32.xlu0 %v2578_v41 }
0x1a5a   :  { %v2683_v45 = vpop.f32.mrb[60].mxu0 }
0x1a5b   :  { %v2684_v35 = vadd.f32 %v2683_v45, %v5754_v40  ;;  %v5054_v8 = vpop.f32.mrb[61].mxu0 }
0x1a5c   :  { %v2686_v46 = vpop.f32.mrb[62].mxu0 }
0x1a5d   :  { %v5055_v29 = vpop.f32.mrb[63].mxu0  ;;  %v2689_v47 = vsel %vm558_vm7, %v2684_v35, -inf }
0x1a5e   :  { %2690 = vmax.xlane.f32.xlu1 %v2689_v47 }
0x1a78   :  { %v2580_v48 = vpop.xlane.xlu0 %2579 }
0x1a79   :  { %v2581_v49 = vsub.f32 %v2573_v38, %v2580_v48 }
0x1a7b   :  { %v2582_v50 = vmul.f32 1.442695, %v2581_v49 }
0x1a7d   :  { %5450 = vpow2.f32 %v2582_v50 }
0x1a87   :  { %v5451_v52 = vpop.eup %5450 }
0x1a88   :  { %v2584_v14 = vsel %vm558_vm7, %v5451_v52, 0.0 }
0x1a89   :  { %2585 = vadd.xlane.f32.xlu0 %v2584_v14 }
0x1aeb   :  { %v2691_v54 = vpop.xlane.xlu1 %2690 }
0x1aec   :  { %v2692_v55 = vsub.f32 %v2684_v35, %v2691_v54 }
0x1aee   :  { %v2693_v51 = vmul.f32 1.442695, %v2692_v55  ;;  %v6340_v55 = vld [vmem:[%s6682_s7 + $0x60] sm:$0xff]  }
0x1af0   :  { %5452 = vpow2.f32 %v2693_v51 }
0x1afa   :  { %v5453_v56 = vpop.eup %5452 }
0x1afb   :  { %v2695_v16 = vsel %vm558_vm7, %v5453_v56, 0.0 }
0x1afc   :  { %2696 = vadd.xlane.f32.xlu0 %v2695_v16 }
0x1b12   :  { %2702 = vrot.lane.b32.xlu0 %v6242_v23, %s5501_s23 }
0x1b16   :  { %v2586_v36 = vpop.xlane.xlu0 %2585  ;;  %2863 = vrot.lane.b32.xlu0 %v6244_v27, %s5503_s1 }
0x1b17   :  { %5454 = vrcp.f32 %v2586_v36 }
0x1b1a   :  { %2861 = vrot.lane.b32.xlu0 %v6240_v24, %s5503_s1 }
0x1b21   :  { %v5455_v5 = vpop.eup %5454 }
0x1b22   :  { %v2588_v59 = vmul.f32 %v5455_v5, %v5451_v52 }
0x1b24   :  { %v2589_v60 = vpack.c.bf16 %v2588_v59, %v2588_v59 }
0x1b26   :  { %5047 = vmatmul.mubr.msk.bf16.vlgmr.msra.gmra.mrb[68].mxu1 %vm558_vm7, %v2589_v60 }
0x1b27   :  { %5058 = vmatprep.mubr.msk.bf16.mxu1 %vm5500_vm0, %v5499_v2 }
0x1b89   :  { %v2697_v62 = vpop.xlane.xlu0 %2696 }
0x1b8a   :  { %5456 = vrcp.f32 %v2697_v62  ;;  %v6355_v62 = vld [vmem:[%s6682_s7 + $0x68] sm:$0xff]  }
0x1b8d   :  { %v2703_v1 = vpop.permute.xlu0 %2702 }
0x1b8e   :  { %v2708_v63 = vsel %vm574_vm5, %v2703_v1, 0 }
0x1b8f   :  { %5057 = vmatpush3.bf16.msra.mxu1 %v2708_v63 }
0x1b90   :  { %5070 = vmatprep.subr.bf16.mxu1 %v5499_v2 }
0x1b91   :  { %v2864_v19 = vpop.permute.xlu0 %2863 }
0x1b92   :  { %v2869_v7 = vsel %vm511_vm4, %v2864_v19, 0 }
0x1b94   :  { %v5457_v10 = vpop.eup %5456 }
0x1b95   :  { %v2699_v58 = vmul.f32 %v5457_v10, %v5453_v56  ;;  %v2862_v25 = vpop.permute.xlu0 %2861 }
0x1b97   :  { %v2700_v39 = vpack.c.bf16 %v2699_v58, %v2699_v58 }
0x1b99   :  { %5059 = vmatmul.mubr.msk.bf16.vlgmr.msra.gmra.mrb[72].mxu1 %vm558_vm7, %v2700_v39 }
0x1b9a   :  { %5071 = vmatpush3.bf16.msra.mxu1 %v6299_v11  ;;  %5074 = vmatprep.mubr.msk.bf16.mxu1 %vm5500_vm0, %v5499_v2 }
0x1b9b   :  { %5072 = vmatprep.subr.bf16.mxu1 %v5499_v2 }
0x1b9e   :  { %5073 = vmatpush3.bf16.msra.mxu1 %v6306_v12 }
0x1b9f   :  { %5084 = vmatprep.subr.bf16.mxu1 %v5499_v2 }
0x1bf9   :  { %v2630_v13 = vpop.f32.mrb[68].mxu1 }
0x1bfa   :  { %v2636_v9 = vpack.c.bf16 %v2630_v13, %v2630_v13  ;;  %v5048_v15 = vpop.f32.mrb[69].mxu1 }
0x1bfb   :  { %v2633_v17 = vpop.f32.mrb[70].mxu1 }
0x1bfc   :  { %v5049_v18 = vpop.f32.mrb[71].mxu1  ;;  %5075 = vmatmul.mubr.msk.bf16.vlgmr.msra.gmra.mrb[76].mxu1 %vm511_vm4, %v2636_v9 }
0x1bfd   :  { %5086 = vmatprep.mubr.msk.bf16.mxu1 %vm5500_vm0, %v5499_v2 }
0x1c6c   :  { %v2744_v20 = vpop.f32.mrb[72].mxu1 }
0x1c6d   :  { %v2750_v4 = vpack.c.bf16 %v2744_v20, %v2744_v20  ;;  %v5060_v57 = vpop.f32.mrb[73].mxu1 }
0x1c6e   :  { %v2747_v21 = vpop.f32.mrb[74].mxu1 }
0x1c6f   :  { %v5061_v22 = vpop.f32.mrb[75].mxu1  ;;  %5067 = vmatmul.mubr.msk.bf16.vlgmr.msra.gmra.mrb[64].mxu0 %vm511_vm4, %v2750_v4 }
0x1c70   :  { %5079 = vmatpush3.bf16.xpose.msra.mxu0 %v2869_v7  ;;  %5080 = vmatprep.mubr.msk.bf16.mxu0 %vm5500_vm0, %v5499_v2  ;;  %v6368_v22 = vrot.slane %v6244_v27, 4 }
0x1c71   :  { %5090 = vmatprep.subr.bf16.mxu0 %v5499_v2 }
0x1c77   :  { %5081 = vmatmul.mubr.msk.bf16.vlgmr.msra.gmra.mrb[68].mxu0 %vm511_vm4, %v2862_v25 }
0x1c78   :  { %5094 = vmatprep.mubr.msk.bf16.mxu0 %vm5500_vm0, %v5499_v2  ;;  %5091 = vmatpush3.bf16.msra.mxu0 %v6340_v55 }
0x1c79   :  { %5092 = vmatprep.subr.bf16.mxu0 %v5499_v2 }
0x1c7c   :  { %5093 = vmatpush3.bf16.msra.mxu0 %v6355_v62 }
0x1c7d   :  { %5104 = vmatprep.subr.bf16.mxu0 %v5499_v2 }
0x1ccf   :  { %v2855_v30 = vpop.f32.mrb[76].mxu1 }
0x1cd0   :  { %v5076_v31 = vpop.f32.mrb[77].mxu1 }
0x1cd1   :  { %v2858_v32 = vpop.f32.mrb[78].mxu1 }
0x1cd2   :  { %v5077_v33 = vpop.f32.mrb[79].mxu1  ;;  %v6383_v32 = vld [vmem:[%s6682_s7 + $0x70] sm:$0xff]  }
0x1d42   :  { %v2800_v34 = vpop.f32.mrb[64].mxu0 }
0x1d43   :  { %v6324_v38 = vadd.f32 %v2855_v30, %v2800_v34  ;;  %v5068_v43 = vpop.f32.mrb[65].mxu0 }
0x1d44   :  { %v2803_v44 = vpop.f32.mrb[66].mxu0 }
0x1d45   :  { %v5069_v42 = vpop.f32.mrb[67].mxu0 }
0x1d4a   :  { %v2905_v41 = vpop.f32.mrb[68].mxu0 }
0x1d4b   :  { %v2906_v45 = vadd.f32 %v2905_v41, %v5754_v40  ;;  %v5082_v35 = vpop.f32.mrb[69].mxu0 }
0x1d4c   :  { %v2908_v8 = vpop.f32.mrb[70].mxu0 }
0x1d4d   :  { %v5083_v46 = vpop.f32.mrb[71].mxu0  ;;  %v2911_v29 = vsel %vm558_vm7, %v2906_v45, -inf }
0x1d4e   :  { %2912 = vmax.xlane.f32.xlu1 %v2911_v29  ;;  %v6416_v29 = vrot.slane %v6242_v23, 4 }
0x1d5f   :  { %2923 = vrot.lane.b32.xlu1 %v6242_v23, %s5503_s1 }
0x1d63   :  { %3030 = vrot.lane.b32.xlu1 %v6244_v27, %s5504_s13 }
0x1d67   :  { %3028 = vrot.lane.b32.xlu1 %v6240_v24, %s5504_s13 }
0x1ddb   :  { %v2913_v47 = vpop.xlane.xlu1 %2912 }
0x1ddc   :  { %v2914_v48 = vsub.f32 %v2906_v45, %v2913_v47  ;;  %v3201_v45 = vsel %vm511_vm4, %v6368_v22, 0 }
0x1dde   :  { %v2915_v49 = vmul.f32 1.442695, %v2914_v48 }
0x1ddf   :  { %v2924_v50 = vpop.permute.xlu1 %2923 }
0x1de0   :  { %5458 = vpow2.f32 %v2915_v49  ;;  %v2929_v52 = vsel %vm574_vm5, %v2924_v50, 0 }
0x1de1   :  { %5085 = vmatpush3.bf16.msra.mxu1 %v2929_v52 }
0x1de2   :  { %5098 = vmatprep.subr.bf16.mxu1 %v5499_v2 }
0x1de3   :  { %v3031_v36 = vpop.permute.xlu1 %3030 }
0x1de4   :  { %v3036_v59 = vsel %vm511_vm4, %v3031_v36, 0 }
0x1de7   :  { %v3029_v60 = vpop.permute.xlu1 %3028 }
0x1dea   :  { %v5459_v14 = vpop.eup %5458 }
0x1deb   :  { %v2917_v54 = vsel %vm558_vm7, %v5459_v14, 0.0 }
0x1dec   :  { %2918 = vadd.xlane.f32.xlu0 %v2917_v54 }
0x1e79   :  { %v2919_v51 = vpop.xlane.xlu0 %2918 }
0x1e7a   :  { %5460 = vrcp.f32 %v2919_v51 }
0x1e84   :  { %v5461_v56 = vpop.eup %5460 }
0x1e85   :  { %v2921_v16 = vmul.f32 %v5461_v56, %v5459_v14 }
0x1e87   :  { %v2922_v5 = vpack.c.bf16 %v2921_v16, %v2921_v16 }
0x1e89   :  { %5087 = vmatmul.mubr.msk.bf16.vlgmr.msra.gmra.mrb[80].mxu1 %vm558_vm7, %v2922_v5 }
0x1e8a   :  { %5099 = vmatpush3.bf16.xpose.msra.mxu1 %v3036_v59  ;;  %5100 = vmatprep.mubr.msk.bf16.mxu1 %vm5500_vm0, %v5499_v2 }
0x1e8b   :  { %5110 = vmatprep.subr.bf16.mxu1 %v5499_v2 }
0x1e91   :  { %5101 = vmatmul.mubr.msk.bf16.vlgmr.msra.gmra.mrb[84].mxu1 %vm511_vm4, %v3029_v60 }
0x1e92   :  { %5114 = vmatprep.mubr.msk.bf16.mxu1 %vm5500_vm0, %v5499_v2  ;;  %5111 = vmatpush3.bf16.msra.mxu1 %v6383_v32 }
0x1e93   :  { %5112 = vmatprep.subr.bf16.mxu1 %v5499_v2 }
0x1f5c   :  { %v2965_v1 = vpop.f32.mrb[80].mxu1 }
0x1f5d   :  { %v2971_v63 = vpack.c.bf16 %v2965_v1, %v2965_v1  ;;  %v5088_v10 = vpop.f32.mrb[81].mxu1 }
0x1f5e   :  { %v2968_v58 = vpop.f32.mrb[82].mxu1 }
0x1f5f   :  { %v5089_v39 = vpop.f32.mrb[83].mxu1  ;;  %5095 = vmatmul.mubr.msk.bf16.vlgmr.msra.gmra.mrb[72].mxu0 %vm511_vm4, %v2971_v63 }
0x1f60   :  { %5106 = vmatprep.mubr.msk.bf16.mxu0 %vm5500_vm0, %v5499_v2 }
0x1f64   :  { %v3072_v13 = vpop.f32.mrb[84].mxu1 }
0x1f65   :  { %v3073_v9 = vadd.f32 %v3072_v13, %v5754_v40  ;;  %v5102_v15 = vpop.f32.mrb[85].mxu1  ;;  %v6373_v40 = vrot.slane %v6240_v24, 4  ;;  %v6389_v24 = vld [vmem:[%s6682_s7 + $0x78] sm:$0xff]  }
0x1f66   :  { %v3075_v17 = vpop.f32.mrb[86].mxu1  ;;  %5113 = vmatpush3.bf16.msra.mxu1 %v6389_v24 }
0x1f67   :  { %v5103_v18 = vpop.f32.mrb[87].mxu1  ;;  %v3078_v19 = vsel %vm558_vm7, %v3073_v9, -inf  ;;  %5124 = vmatprep.subr.bf16.mxu1 %v5499_v2 }
0x1f68   :  { %3079 = vmax.xlane.f32.xlu1 %v3078_v19 }
0x1ff5   :  { %v3080_v20 = vpop.xlane.xlu1 %3079 }
0x1ff6   :  { %v3081_v4 = vsub.f32 %v3073_v9, %v3080_v20 }
0x1ff8   :  { %v3082_v57 = vmul.f32 1.442695, %v3081_v4 }
0x1ffa   :  { %5462 = vpow2.f32 %v3082_v57 }
0x2004   :  { %v5463_v21 = vpop.eup %5462 }
0x2005   :  { %v3084_v7 = vsel %vm558_vm7, %v5463_v21, 0.0 }
0x2006   :  { %3085 = vadd.xlane.f32.xlu0 %v3084_v7 }
0x201c   :  { %3090 = vrot.lane.b32.xlu0 %v6242_v23, %s5504_s13 }
0x2020   :  { %3305 = vrot.lane.b32.xlu0 %v6368_v22, %s5501_s23 }
0x2024   :  { %3303 = vrot.lane.b32.xlu0 %v6373_v40, %s5501_s23 }
0x2032   :  { %v3021_v25 = vpop.f32.mrb[72].mxu0 }
0x2033   :  { %v6378_v30 = vadd.f32 %v3021_v25, %v6324_v38  ;;  %v5096_v31 = vpop.f32.mrb[73].mxu0 }
0x2034   :  { %v3024_v27 = vpop.f32.mrb[74].mxu0 }
0x2035   :  { %v5097_v33 = vpop.f32.mrb[75].mxu0 }
0x2093   :  { %v3086_v34 = vpop.xlane.xlu0 %3085 }
0x2094   :  { %5464 = vrcp.f32 %v3086_v34 }
0x2097   :  { %v3091_v38 = vpop.permute.xlu0 %3090 }
0x2098   :  { %v3096_v43 = vsel %vm574_vm5, %v3091_v38, 0 }
0x2099   :  { %5105 = vmatpush3.bf16.msra.mxu0 %v3096_v43 }
0x209a   :  { %5118 = vmatprep.subr.bf16.mxu0 %v5499_v2 }
0x209b   :  { %v3306_v35 = vpop.permute.xlu0 %3305 }
0x209c   :  { %v3311_v8 = vsel %vm511_vm4, %v3306_v35, 0 }
0x209e   :  { %v5465_v44 = vpop.eup %5464 }
0x209f   :  { %v3088_v42 = vmul.f32 %v5465_v44, %v5463_v21  ;;  %v3304_v46 = vpop.permute.xlu0 %3303 }
0x20a1   :  { %v3089_v41 = vpack.c.bf16 %v3088_v42, %v3088_v42 }
0x20a3   :  { %5107 = vmatmul.mubr.msk.bf16.vlgmr.msra.gmra.mrb[76].mxu0 %vm558_vm7, %v3089_v41 }
0x20a4   :  { %5119 = vmatpush3.bf16.xpose.msra.mxu0 %v3201_v45  ;;  %5120 = vmatprep.mubr.msk.bf16.mxu0 %vm5500_vm0, %v5499_v2 }
0x20a5   :  { %5130 = vmatprep.subr.bf16.mxu0 %v5499_v2 }
0x20ab   :  { %5121 = vmatmul.mubr.msk.bf16.vlgmr.msra.gmra.mrb[80].mxu0 %vm511_vm4, %v6373_v40 }
0x20ac   :  { %5131 = vmatpush3.bf16.xpose.msra.mxu0 %v3311_v8  ;;  %5132 = vmatprep.mubr.msk.bf16.mxu0 %vm5500_vm0, %v5499_v2 }
0x20ad   :  { %5142 = vmatprep.subr.bf16.mxu0 %v5499_v2 }
0x20b3   :  { %5133 = vmatmul.mubr.msk.bf16.vlgmr.msra.gmra.mrb[84].mxu0 %vm511_vm4, %v3304_v46 }
0x20b4   :  { %5143 = vmatpush3.bf16.msra.mxu0 %v6283_v61  ;;  %5146 = vmatprep.mubr.msk.bf16.mxu0 %vm5500_vm0, %v5499_v2  ;;  %v3260_v61 = vsel %vm574_vm5, %v6416_v29, 0 }
0x20b5   :  { %5144 = vmatprep.subr.bf16.mxu0 %v5499_v2 }
0x20b8   :  { %5145 = vmatpush3.bf16.msra.mxu0 %v6289_v26 }
0x20b9   :  { %5158 = vmatprep.subr.bf16.mxu0 %v5499_v2 }
0x2176   :  { %v3132_v47 = vpop.f32.mrb[76].mxu0 }
0x2177   :  { %v3138_v48 = vpack.c.bf16 %v3132_v47, %v3132_v47  ;;  %v5108_v49 = vpop.f32.mrb[77].mxu0 }
0x2178   :  { %v3135_v50 = vpop.f32.mrb[78].mxu0 }
0x2179   :  { %v5109_v52 = vpop.f32.mrb[79].mxu0  ;;  %5115 = vmatmul.mubr.msk.bf16.vlgmr.msra.gmra.mrb[88].mxu1 %vm511_vm4, %v3138_v48 }
0x217a   :  { %5125 = vmatpush3.bf16.msra.mxu1 %v3260_v61  ;;  %5126 = vmatprep.mubr.msk.bf16.mxu1 %vm5500_vm0, %v5499_v2 }
0x217b   :  { %5136 = vmatprep.subr.bf16.mxu1 %v5499_v2 }
0x217e   :  { %v3237_v26 = vpop.f32.mrb[80].mxu0 }
0x217f   :  { %v3238_v23 = vadd.f32 %v3237_v26, %v5919_v28  ;;  %v5122_v14 = vpop.f32.mrb[81].mxu0 }
0x2180   :  { %v3240_v54 = vpop.f32.mrb[82].mxu0 }
0x2181   :  { %v5123_v51 = vpop.f32.mrb[83].mxu0  ;;  %v3243_v56 = vsel %vm558_vm7, %v3238_v23, -inf }
0x2182   :  { %3244 = vmax.xlane.f32.xlu1 %v3243_v56 }
0x2186   :  { %v3347_v16 = vpop.f32.mrb[84].mxu0 }
0x2187   :  { %v3348_v36 = vadd.f32 %v3347_v16, %v5919_v28  ;;  %v5134_v5 = vpop.f32.mrb[85].mxu0 }
0x2188   :  { %v3350_v59 = vpop.f32.mrb[86].mxu0 }
0x2189   :  { %v5135_v60 = vpop.f32.mrb[87].mxu0  ;;  %v3353_v1 = vsel %vm558_vm7, %v3348_v36, -inf }
0x218a   :  { %3354 = vmax.xlane.f32.xlu0 %v3353_v1 }
0x220f   :  { %v3245_v63 = vpop.xlane.xlu1 %3244 }
0x2210   :  { %v3246_v10 = vsub.f32 %v3238_v23, %v3245_v63 }
0x2212   :  { %v3247_v58 = vmul.f32 1.442695, %v3246_v10 }
0x2214   :  { %5466 = vpow2.f32 %v3247_v58 }
0x2217   :  { %v3355_v39 = vpop.xlane.xlu0 %3354 }
0x2218   :  { %v3356_v13 = vsub.f32 %v3348_v36, %v3355_v39 }
0x221a   :  { %v3357_v9 = vmul.f32 1.442695, %v3356_v13 }
0x221c   :  { %5468 = vpow2.f32 %v3357_v9 }
0x221e   :  { %v5467_v15 = vpop.eup %5466 }
0x221f   :  { %v3249_v17 = vsel %vm558_vm7, %v5467_v15, 0.0 }
0x2220   :  { %3250 = vadd.xlane.f32.xlu1 %v3249_v17 }
0x2226   :  { %v5469_v18 = vpop.eup %5468 }
0x2227   :  { %v3359_v19 = vsel %vm558_vm7, %v5469_v18, 0.0 }
0x2228   :  { %3360 = vadd.xlane.f32.xlu1 %v3359_v19 }
0x2239   :  { %3365 = vrot.lane.b32.xlu1 %v6416_v29, %s5501_s23 }
0x223d   :  { %3502 = vrot.lane.b32.xlu1 %v6368_v22, %s5503_s1 }
0x2241   :  { %3500 = vrot.lane.b32.xlu1 %v6373_v40, %s5503_s1 }
0x224c   :  { %v3188_v20 = vpop.f32.mrb[88].mxu1 }
0x224d   :  { %v6437_v4 = vadd.f32 %v3188_v20, %v6378_v30  ;;  %v5116_v57 = vpop.f32.mrb[89].mxu1 }
0x224e   :  { %v3191_v21 = vpop.f32.mrb[90].mxu1 }
0x224f   :  { %v5117_v7 = vpop.f32.mrb[91].mxu1 }
0x22ad   :  { %v3251_v25 = vpop.xlane.xlu1 %3250 }
0x22ae   :  { %5470 = vrcp.f32 %v3251_v25 }
0x22b5   :  { %v3361_v31 = vpop.xlane.xlu1 %3360 }
0x22b6   :  { %5472 = vrcp.f32 %v3361_v31 }
0x22b8   :  { %v5471_v27 = vpop.eup %5470 }
0x22b9   :  { %v3253_v33 = vmul.f32 %v5471_v27, %v5467_v15  ;;  %v3366_v34 = vpop.permute.xlu1 %3365 }
0x22ba   :  { %v3371_v43 = vsel %vm574_vm5, %v3366_v34, 0 }
0x22bb   :  { %v3254_v38 = vpack.c.bf16 %v3253_v33, %v3253_v33 }
0x22bd   :  { %5127 = vmatmul.mubr.msk.bf16.vlgmr.msra.gmra.mrb[92].mxu1 %vm558_vm7, %v3254_v38 }
0x22be   :  { %5137 = vmatpush3.bf16.msra.mxu1 %v3371_v43  ;;  %5138 = vmatprep.mubr.msk.bf16.mxu1 %vm5500_vm0, %v5499_v2 }
0x22bf   :  { %5150 = vmatprep.subr.bf16.mxu1 %v5499_v2 }
0x22c0   :  { %v5473_v30 = vpop.eup %5472 }
0x22c1   :  { %v3363_v44 = vmul.f32 %v5473_v30, %v5469_v18 }
0x22c3   :  { %v3364_v42 = vpack.c.bf16 %v3363_v44, %v3363_v44 }
0x22c5   :  { %5139 = vmatmul.mubr.msk.bf16.vlgmr.msra.gmra.mrb[96].mxu1 %vm558_vm7, %v3364_v42 }
0x22c6   :  { %5151 = vmatpush3.bf16.msra.mxu1 %v6299_v11  ;;  %5154 = vmatprep.mubr.msk.bf16.mxu1 %vm5500_vm0, %v5499_v2  ;;  %v3503_v11 = vpop.permute.xlu1 %3502 }
0x22c7   :  { %5152 = vmatprep.subr.bf16.mxu1 %v5499_v2  ;;  %v3508_v52 = vsel %vm511_vm4, %v3503_v11, 0 }
0x22ca   :  { %5153 = vmatpush3.bf16.msra.mxu1 %v6306_v12  ;;  %v3501_v61 = vpop.permute.xlu1 %3500 }
0x22cb   :  { %5164 = vmatprep.subr.bf16.mxu1 %v5499_v2 }
0x2390   :  { %v3296_v41 = vpop.f32.mrb[92].mxu1 }
0x2391   :  { %v3302_v45 = vpack.c.bf16 %v3296_v41, %v3296_v41  ;;  %v5128_v35 = vpop.f32.mrb[93].mxu1 }
0x2392   :  { %v3299_v8 = vpop.f32.mrb[94].mxu1 }
0x2393   :  { %v5129_v46 = vpop.f32.mrb[95].mxu1  ;;  %5155 = vmatmul.mubr.msk.bf16.vlgmr.msra.gmra.mrb[100].mxu1 %vm511_vm4, %v3302_v45 }
0x2394   :  { %5166 = vmatprep.mubr.msk.bf16.mxu1 %vm5500_vm0, %v5499_v2 }
0x2398   :  { %v3407_v47 = vpop.f32.mrb[96].mxu1 }
0x2399   :  { %v3413_v48 = vpack.c.bf16 %v3407_v47, %v3407_v47  ;;  %v5140_v49 = vpop.f32.mrb[97].mxu1 }
0x239a   :  { %v3410_v50 = vpop.f32.mrb[98].mxu1 }
0x239b   :  { %v5141_v12 = vpop.f32.mrb[99].mxu1  ;;  %5147 = vmatmul.mubr.msk.bf16.vlgmr.msra.gmra.mrb[88].mxu0 %vm511_vm4, %v3413_v48 }
0x239c   :  { %5159 = vmatpush3.bf16.xpose.msra.mxu0 %v3508_v52  ;;  %5160 = vmatprep.mubr.msk.bf16.mxu0 %vm5500_vm0, %v5499_v2 }
0x239d   :  { %5170 = vmatprep.subr.bf16.mxu0 %v5499_v2 }
0x23a3   :  { %5161 = vmatmul.mubr.msk.bf16.vlgmr.msra.gmra.mrb[92].mxu0 %vm511_vm4, %v3501_v61 }
0x23a4   :  { %5171 = vmatpush3.bf16.msra.mxu0 %v6340_v55  ;;  %5174 = vmatprep.mubr.msk.bf16.mxu0 %vm5500_vm0, %v5499_v2 }
0x23a5   :  { %5172 = vmatprep.subr.bf16.mxu0 %v5499_v2 }
0x23a8   :  { %5173 = vmatpush3.bf16.msra.mxu0 %v6355_v62 }
0x23a9   :  { %5184 = vmatprep.subr.bf16.mxu0 %v5499_v2 }
0x2466   :  { %v3494_v26 = vpop.f32.mrb[100].mxu1 }
0x2467   :  { %v5156_v23 = vpop.f32.mrb[101].mxu1 }
0x2468   :  { %v3497_v14 = vpop.f32.mrb[102].mxu1 }
0x2469   :  { %v5157_v54 = vpop.f32.mrb[103].mxu1 }
0x246e   :  { %v3451_v51 = vpop.f32.mrb[88].mxu0 }
0x246f   :  { %v6466_v56 = vadd.f32 %v3494_v26, %v3451_v51  ;;  %v5148_v16 = vpop.f32.mrb[89].mxu0 }
0x2470   :  { %v3454_v36 = vpop.f32.mrb[90].mxu0 }
0x2471   :  { %v5149_v5 = vpop.f32.mrb[91].mxu0 }
0x2476   :  { %v3544_v55 = vpop.f32.mrb[92].mxu0 }
0x2477   :  { %v3545_v59 = vadd.f32 %v3544_v55, %v5919_v28  ;;  %v5162_v60 = vpop.f32.mrb[93].mxu0 }
0x2478   :  { %v3547_v1 = vpop.f32.mrb[94].mxu0 }
0x2479   :  { %v5163_v63 = vpop.f32.mrb[95].mxu0  ;;  %v3550_v62 = vsel %vm558_vm7, %v3545_v59, -inf }
0x247a   :  { %3551 = vmax.xlane.f32.xlu0 %v3550_v62 }
0x2490   :  { %3562 = vrot.lane.b32.xlu0 %v6416_v29, %s5503_s1 }
0x2494   :  { %3657 = vrot.lane.b32.xlu0 %v6368_v22, %s5504_s13 }
0x2498   :  { %3655 = vrot.lane.b32.xlu0 %v6373_v40, %s5504_s13 }
0x2507   :  { %v3552_v10 = vpop.xlane.xlu0 %3551 }
0x2508   :  { %v3553_v58 = vsub.f32 %v3545_v59, %v3552_v10  ;;  %v5350_v10 = vld [vmem:[%s6683_s8 + $0x80] ss:$8 sps:$4 sm:$0xff]  }
0x250a   :  { %v3554_v39 = vmul.f32 1.442695, %v3553_v58  ;;  %v5352_v58 = vld [vmem:[%s6683_s8 + $0x84] ss:$8 sps:$4 sm:$0xff]  }
0x250b   :  { %v3563_v13 = vpop.permute.xlu0 %3562 }
0x250c   :  { %5474 = vpow2.f32 %v3554_v39  ;;  %v3568_v9 = vsel %vm574_vm5, %v3563_v13, 0  ;;  %v5355_v39 = vld [vmem:[%s6683_s8 + $0x94] ss:$8 sps:$4 sm:$0xff]   ;;  %v5358_v13 = vld [vmem:[%s6683_s8 + $0xa4] ss:$8 sps:$4 sm:$0xff]  }
0x250d   :  { %5165 = vmatpush3.bf16.msra.mxu1 %v3568_v9  ;;  %v5356_v9 = vld [vmem:[%s6683_s8 + $0xa0] ss:$8 sps:$4 sm:$0xff]  }
0x250e   :  { %5178 = vmatprep.subr.bf16.mxu1 %v5499_v2 }
0x250f   :  { %v3658_v20 = vpop.permute.xlu0 %3657 }
0x2510   :  { %v3663_v57 = vsel %vm511_vm4, %v3658_v20, 0  ;;  %v5359_v20 = vld [vmem:[%s6683_s8 + $0xb0] ss:$8 sps:$4 sm:$0xff]  }
0x2513   :  { %v3656_v21 = vpop.permute.xlu0 %3655 }
0x2516   :  { %v5475_v15 = vpop.eup %5474 }
0x2517   :  { %v3556_v17 = vsel %vm558_vm7, %v5475_v15, 0.0 }
0x2518   :  { %3557 = vadd.xlane.f32.xlu1 %v3556_v17 }
0x25a5   :  { %v3558_v18 = vpop.xlane.xlu1 %3557 }
0x25a6   :  { %5476 = vrcp.f32 %v3558_v18 }
0x25b0   :  { %v5477_v22 = vpop.eup %5476 }
0x25b1   :  { %v3560_v19 = vmul.f32 %v5477_v22, %v5475_v15 }
0x25b3   :  { %v3561_v40 = vpack.c.bf16 %v3560_v19, %v3560_v19  ;;  %v5361_v19 = vld [vmem:[%s6683_s8 + $0xb4] ss:$8 sps:$4 sm:$0xff]  }
0x25b5   :  { %5167 = vmatmul.mubr.msk.bf16.vlgmr.msra.gmra.mrb[104].mxu1 %vm558_vm7, %v3561_v40  ;;  %v5364_v40 = vld [vmem:[%s6683_s8 + $0xc4] ss:$8 sps:$4 sm:$0xff]  }
0x25b6   :  { %5179 = vmatpush3.bf16.xpose.msra.mxu1 %v3663_v57  ;;  %5180 = vmatprep.mubr.msk.bf16.mxu1 %vm5500_vm0, %v5499_v2  ;;  %v5362_v57 = vld [vmem:[%s6683_s8 + $0xc0] ss:$8 sps:$4 sm:$0xff]  }
0x25b7   :  { %5190 = vmatprep.subr.bf16.mxu1 %v5499_v2 }
0x25bd   :  { %5181 = vmatmul.mubr.msk.bf16.vlgmr.msra.gmra.mrb[108].mxu1 %vm511_vm4, %v3656_v21  ;;  %v5367_v21 = vld [vmem:[%s6683_s8 + $0xd4] ss:$8 sps:$4 sm:$0xff]  }
0x25be   :  { %5191 = vmatpush3.bf16.msra.mxu1 %v6383_v32  ;;  %5194 = vmatprep.mubr.msk.bf16.mxu1 %vm5500_vm0, %v5499_v2 }
0x25bf   :  { %5192 = vmatprep.subr.bf16.mxu1 %v5499_v2 }
0x25c2   :  { %5193 = vmatpush3.bf16.msra.mxu1 %v6389_v24 }
0x2688   :  { %v3604_v7 = vpop.f32.mrb[104].mxu1 }
0x2689   :  { %v3610_v25 = vpack.c.bf16 %v3604_v7, %v3604_v7  ;;  %v5168_v31 = vpop.f32.mrb[105].mxu1  ;;  %v5365_v7 = vld [vmem:[%s6683_s8 + $0xd0] ss:$8 sps:$4 sm:$0xff]  }
0x268a   :  { %v3607_v27 = vpop.f32.mrb[106].mxu1  ;;  %v5368_v31 = vld [vmem:[%s6683_s8 + $0xe0] ss:$8 sps:$4 sm:$0xff]  }
0x268b   :  { %v5169_v33 = vpop.f32.mrb[107].mxu1  ;;  %5175 = vmatmul.mubr.msk.bf16.vlgmr.msra.gmra.mrb[96].mxu0 %vm511_vm4, %v3610_v25  ;;  %v5370_v25 = vld [vmem:[%s6683_s8 + $0xe4] ss:$8 sps:$4 sm:$0xff]   ;;  %v5373_v27 = vld [vmem:[%s6683_s8 + $0xf4] ss:$8 sps:$4 sm:$0xff]  }
0x268c   :  { %5186 = vmatprep.mubr.msk.bf16.mxu0 %vm5500_vm0, %v5499_v2  ;;  %v5371_v33 = vld [vmem:[%s6683_s8 + $0xf0] ss:$8 sps:$4 sm:$0xff]  }
0x2690   :  { %v3699_v34 = vpop.f32.mrb[108].mxu1 }
0x2691   :  { %v3700_v32 = vadd.f32 %v3699_v34, %v5919_v28  ;;  %v5182_v38 = vpop.f32.mrb[109].mxu1  ;;  %v4590_v28 = vld [vmem:[%s6680_s4 + $0xe] ss:$0 sm:$0xff] }
0x2692   :  { %v3702_v43 = vpop.f32.mrb[110].mxu1  ;;  %v3815_v48 = vadd.f32 %v4590_v28, %v6437_v4 }
0x2693   :  { %v5183_v30 = vpop.f32.mrb[111].mxu1  ;;  %v3705_v44 = vsel %vm558_vm7, %v3700_v32, -inf }
0x2694   :  { %3706 = vmax.xlane.f32.xlu0 %v3705_v44  ;;  %v3817_v50 = vadd.f32 %v3815_v48, %v6221_v6 }
0x2721   :  { %v3707_v24 = vpop.xlane.xlu0 %3706 }
0x2722   :  { %v3708_v42 = vsub.f32 %v3700_v32, %v3707_v24 }
0x2724   :  { %v3709_v41 = vmul.f32 1.442695, %v3708_v42 }
0x2726   :  { %5478 = vpow2.f32 %v3709_v41  ;;  %v4591_v41 = vld [vmem:[%s6680_s4 + $0xf] ss:$0 sm:$0xff] }
0x2730   :  { %v5479_v45 = vpop.eup %5478 }
0x2731   :  { %v3711_v35 = vsel %vm558_vm7, %v5479_v45, 0.0 }
0x2732   :  { %3712 = vadd.xlane.f32.xlu1 %v3711_v35 }
0x2743   :  { %3717 = vrot.lane.b32.xlu1 %v6416_v29, %s5504_s13 }
0x275e   :  { %v3648_v8 = vpop.f32.mrb[96].mxu0 }
0x275f   :  { %v3654_v46 = vadd.f32 %v3648_v8, %v6466_v56  ;;  %v5176_v11 = vpop.f32.mrb[97].mxu0  ;;  %v4592_v8 = vld [vmem:[%s6680_s4 + $0x10] ss:$0 sm:$0xff] }
0x2760   :  { %v3651_v47 = vpop.f32.mrb[98].mxu0 }
0x2761   :  { %v5177_v49 = vpop.f32.mrb[99].mxu0 }
0x2762   :  { %v5374_v49 = vld [vmem:[%s6684_s9 + $0xc0] sm:$0xff]  }
0x2763   :  { %4795 = vmatprep.subr.bf16.mxu1 %v5374_v49 }
0x2767   :  { %3821 = vadd.xlane.f32.xlu1 %v3817_v50 }
0x27bf   :  { %v3713_v52 = vpop.xlane.xlu1 %3712 }
0x27c0   :  { %5480 = vrcp.f32 %v3713_v52  ;;  %v5376_v52 = vld [vmem:[%s6684_s9 + $0xc8] sm:$0xff]  }
0x27c3   :  { %v3718_v12 = vpop.permute.xlu1 %3717 }
0x27c4   :  { %v3723_v29 = vsel %vm574_vm5, %v3718_v12, 0  ;;  %v5377_v12 = vld [vmem:[%s6684_s9 + $0x88] sm:$0xff]  }
0x27c5   :  { %5185 = vmatpush3.bf16.msra.mxu0 %v3723_v29  ;;  %v5378_v29 = vld [vmem:[%s6684_s9 + $0xd0] sm:$0xff]  }
0x27c6   :  { %3949 = vmatprep.subr.bf16.mxu0 %v5352_v58 }
0x27ca   :  { %v5481_v61 = vpop.eup %5480 }
0x27cb   :  { %v3715_v26 = vmul.f32 %v5481_v61, %v5479_v45  ;;  %v5379_v61 = vld [vmem:[%s6684_s9 + $0x90] sm:$0xff]  }
0x27cd   :  { %v3716_v23 = vpack.c.bf16 %v3715_v26, %v3715_v26  ;;  %v5380_v26 = vld [vmem:[%s6684_s9 + $0xd8] sm:$0xff]  }
0x27cf   :  { %5187 = vmatmul.mubr.msk.bf16.vlgmr.msra.gmra.mrb[100].mxu0 %vm558_vm7, %v3716_v23  ;;  %v5381_v23 = vld [vmem:[%s6684_s9 + $0x98] sm:$0xff]  }
0x27d0   :  { %3981 = vmatprep.mubr.bf16.mxu0 %v5498_v0  ;;  %3950 = vmatpush1.bf16.msra.mxu0 %v5350_v10 }
0x27d1   :  { %3951 = vmatprep.subr.bf16.mxu0 %v5355_v39 }
0x27f4   :  { %v3822_v6 = vpop.xlane.xlu1 %3821 }
0x27f5   :  { %v3825_v36 = vmul.f32 0.0078125, %v3822_v6  ;;  %v5387_v6 = vld [vmem:[%s6684_s9 + $0xb0] sm:$0xff]  }
0x27f7   :  { %v3827_v63 = vsub.f32 %v3817_v50, %v3825_v36  ;;  %v5375_v50 = vld [vmem:[%s6684_s9 + $0x80] sm:$0xff]   ;;  %v5389_v36 = vld [vmem:[%s6684_s9 + $0xb8] sm:$0xff]  }
0x27f9   :  { %v3829_v0 = vmul.f32 %v3827_v63, %v3827_v63 }
0x28a2   :  { %v3759_v14 = vpop.f32.mrb[100].mxu0 }
0x28a3   :  { %v3765_v54 = vpack.c.bf16 %v3759_v14, %v3759_v14  ;;  %v5188_v4 = vpop.f32.mrb[101].mxu0  ;;  %v5382_v14 = vld [vmem:[%s6684_s9 + $0xe0] sm:$0xff]  }
0x28a4   :  { %v3762_v51 = vpop.f32.mrb[102].mxu0  ;;  %v5384_v4 = vld [vmem:[%s6684_s9 + $0xe8] sm:$0xff]  }
0x28a5   :  { %v5189_v56 = vpop.f32.mrb[103].mxu0  ;;  %5195 = vmatmul.mubr.msk.bf16.vlgmr.msra.gmra.mrb[112].mxu1 %vm511_vm4, %v3765_v54  ;;  %v5383_v54 = vld [vmem:[%s6684_s9 + $0xa0] sm:$0xff]   ;;  %v5385_v51 = vld [vmem:[%s6684_s9 + $0xa8] sm:$0xff]  }
0x28a6   :  { %4796 = vmatpush3.bf16.msra.mxu1 %v5375_v50  ;;  %v5386_v56 = vld [vmem:[%s6684_s9 + $0xf0] sm:$0xff]  }
0x28a7   :  { %4797 = vmatprep.subr.bf16.mxu1 %v5376_v52 }
0x28aa   :  { %4798 = vmatpush3.bf16.msra.mxu1 %v5377_v12 }
0x28ab   :  { %4799 = vmatprep.subr.bf16.mxu1 %v5378_v29 }
0x28ae   :  { %4800 = vmatpush3.bf16.msra.mxu1 %v5379_v61  ;;  %v4610_v61 = vld [vmem:[%s6680_s4 + $0x11] ss:$0 sm:$0xff] }
0x28af   :  { %4801 = vmatprep.subr.bf16.mxu1 %v5380_v26 }
0x28b2   :  { %4802 = vmatpush3.bf16.msra.mxu1 %v5381_v23 }
0x28b3   :  { %4803 = vmatprep.subr.bf16.mxu1 %v5382_v14 }
0x28b6   :  { %4804 = vmatpush3.bf16.msra.mxu1 %v5383_v54 }
0x28b7   :  { %4805 = vmatprep.subr.bf16.mxu1 %v5384_v4 }
0x28ba   :  { %4806 = vmatpush3.bf16.msra.mxu1 %v5385_v51 }
0x28bb   :  { %4807 = vmatprep.subr.bf16.mxu1 %v5386_v56 }
0x28be   :  { %4808 = vmatpush3.bf16.msra.mxu1 %v5387_v6 }
0x2978   :  { %v3803_v16 = vpop.f32.mrb[112].mxu1 }
0x2979   :  { %v3809_v5 = vadd.f32 %v3803_v16, %v3654_v46  ;;  %v5196_v55 = vpop.f32.mrb[113].mxu1  ;;  %v5388_v16 = vld [vmem:[%s6684_s9 + $0xf8] sm:$0xff]  }
0x297a   :  { %v3806_v59 = vpop.f32.mrb[114].mxu1  ;;  %4809 = vmatprep.subr.bf16.mxu1 %v5388_v16 }
0x297b   :  { %v3816_v60 = vadd.f32 %v4590_v28, %v3809_v5  ;;  %v5197_v1 = vpop.f32.mrb[115].mxu1  ;;  %4810 = vmatpush3.bf16.msra.mxu1 %v5389_v36  ;;  %v4593_v5 = vld [vmem:[%s6685_s5 + $0x1] ss:$2 sm:$0x3] }
0x297c   :  { %v3862_v55 = vrot.slane %v4593_v5, %v5748_v37  ;;  %v3866_v59 = vrot.slane %v4593_v5, %v5910_v53  ;;  %v5390_v36 = vld [vmem:[%s6686_s10] sm:$0xff]  }
0x297d   :  { %v3818_v62 = vadd.f32 %v3816_v60, %v6223_v3  ;;  %v5353_v3 = vld [vmem:[%s6683_s8 + $0x90] ss:$8 sps:$4 sm:$0xff]  }
0x297e   :  { %3952 = vmatpush1.bf16.msra.mxu0 %v5353_v3 }
0x297f   :  { %3823 = vadd.xlane.f32.xlu0 %v3818_v62  ;;  %3953 = vmatprep.subr.bf16.mxu0 %v5358_v13 }
0x2982   :  { %3954 = vmatpush1.bf16.msra.mxu0 %v5356_v9 }
0x2983   :  { %3831 = vadd.xlane.f32.xlu0 %v3829_v0  ;;  %3955 = vmatprep.subr.bf16.mxu0 %v5361_v19 }
0x2986   :  { %3956 = vmatpush1.bf16.msra.mxu0 %v5359_v20 }
0x2987   :  { %3957 = vmatprep.subr.bf16.mxu0 %v5364_v40 }
0x298a   :  { %3958 = vmatpush1.bf16.msra.mxu0 %v5362_v57 }
0x298b   :  { %3959 = vmatprep.subr.bf16.mxu0 %v5367_v21 }
0x298e   :  { %3960 = vmatpush1.bf16.msra.mxu0 %v5365_v7 }
0x298f   :  { %3961 = vmatprep.subr.bf16.mxu0 %v5370_v25 }
0x2992   :  { %3962 = vmatpush1.bf16.msra.mxu0 %v5368_v31 }
0x2993   :  { %3963 = vmatprep.subr.bf16.mxu0 %v5373_v27 }
0x2996   :  { %3964 = vmatpush1.bf16.msra.mxu0 %v5371_v33 }
0x2997   :  { %5198 = vmatprep.subr.bf16.mxu0 %v5499_v2 }
0x2a0c   :  { %v3824_v15 = vpop.xlane.xlu0 %3823 }
0x2a0d   :  { %v3826_v17 = vmul.f32 0.0078125, %v3824_v15 }
0x2a0f   :  { %v3828_v18 = vsub.f32 %v3818_v62, %v3826_v17 }
0x2a10   :  { %v3832_v34 = vpop.xlane.xlu0 %3831 }
0x2a11   :  { %v3830_v22 = vmul.f32 %v3828_v18, %v3828_v18  ;;  %v3835_v32 = vmul.f32 0.0078125, %v3832_v34 }
0x2a13   :  { %3833 = vadd.xlane.f32.xlu0 %v3830_v22  ;;  %v3837_v38 = vadd.f32 1e-12, %v3835_v32 }
0x2a15   :  { %5482 = vrsqrt.f32 %v3837_v38 }
0x2a1f   :  { %v5483_v24 = vpop.eup %5482 }
0x2a20   :  { %v3841_v42 = vmul.f32 %v5483_v24, %v3827_v63 }
0x2a22   :  { %v3847_v28 = vmul.f32 %v4591_v41, %v3841_v42 }
0x2a24   :  { %v6564_v11 = vadd.f32 %v4592_v8, %v3847_v28 }
0x2aa0   :  { %v3834_v43 = vpop.xlane.xlu0 %3833 }
0x2aa1   :  { %v3836_v30 = vmul.f32 0.0078125, %v3834_v43 }
0x2aa3   :  { %v3838_v44 = vadd.f32 1e-12, %v3836_v30 }
0x2aa5   :  { %5484 = vrsqrt.f32 %v3838_v44 }
0x2aaf   :  { %v5485_v45 = vpop.eup %5484 }
0x2ab0   :  { %v3842_v35 = vmul.f32 %v5485_v45, %v3828_v18 }
0x2ab2   :  { %v3848_v46 = vmul.f32 %v4591_v41, %v3842_v35 }
0x2ab4   :  { %v6566_v47 = vadd.f32 %v4592_v8, %v3848_v46 }
0x2ab6   :  { %v3855_v48 = vpack.c.bf16 %v6566_v47, %v6564_v11 }
0x2ab8   :  { %3982 = vmatmul.mubr.bf16.vlgmr.msra.gmra.mrb[104].mxu0 %v3855_v48 }
0x2ab9   :  { %5214 = vmatprep.mubr.msk.bf16.mxu0 %vm5500_vm0, %v5499_v2  ;;  %5199 = vmatpush3.bf16.msra.mxu0 %v5390_v36 }
0x2aba   :  { %5200 = vmatprep.subr.bf16.mxu0 %v5499_v2 }
0x2b8b   :  { %v3983_v60 = vpop.f32.mrb[104].mxu0 }
0x2b8c   :  { %v3984_v1 = vadd.f32 %v3983_v60, %v3862_v55  ;;  %v3985_v63 = vpop.f32.mrb[105].mxu0 }
0x2b8d   :  { %v3986_v62 = vadd.f32 %v3985_v63, %v3866_v59  ;;  %v3987_v0 = vpop.f32.mrb[106].mxu0 }
0x2b8e   :  { %v3996_v10 = vmul.f32 0.044715, %v3984_v1  ;;  %v3988_v58 = vadd.f32 %v3987_v0, %v3862_v55  ;;  %v3989_v39 = vpop.f32.mrb[107].mxu0  ;;  %v3992_v42 = vmul.f32 0.5, %v3984_v1  ;;  %v5392_v0 = vld [vmem:[%s6686_s10 + $0x10] sm:$0xff]  }
0x2b8f   :  { %v3997_v3 = vmul.f32 0.044715, %v3986_v62  ;;  %v3990_v13 = vadd.f32 %v3989_v39, %v3866_v59  ;;  %v3993_v35 = vmul.f32 0.5, %v3986_v62  ;;  %v5395_v39 = vld [vmem:[%s6686_s10 + $0x28] sm:$0xff]  }
0x2b90   :  { %v4000_v9 = vmul.f32 %v3996_v10, %v3984_v1  ;;  %v3998_v15 = vmul.f32 0.044715, %v3988_v58  ;;  %v3994_v41 = vmul.f32 0.5, %v3988_v58  ;;  %v5393_v10 = vld [vmem:[%s6686_s10 + $0x18] sm:$0xff]  }
0x2b91   :  { %v4001_v17 = vmul.f32 %v3997_v3, %v3986_v62  ;;  %v3999_v18 = vmul.f32 0.044715, %v3990_v13  ;;  %v3995_v28 = vmul.f32 0.5, %v3990_v13  ;;  %v5396_v3 = vld [vmem:[%s6686_s10 + $0x30] sm:$0xff]  }
0x2b92   :  { %v4004_v22 = vmul.f32 %v4000_v9, %v3984_v1  ;;  %v4002_v19 = vmul.f32 %v3998_v15, %v3988_v58 }
0x2b93   :  { %v4005_v20 = vmul.f32 %v4001_v17, %v3986_v62  ;;  %v4003_v37 = vmul.f32 %v3999_v18, %v3990_v13 }
0x2b94   :  { %v4008_v40 = vadd.f32 %v4004_v22, %v3984_v1  ;;  %v4006_v53 = vmul.f32 %v4002_v19, %v3988_v58 }
0x2b95   :  { %v4007_v57 = vmul.f32 %v4003_v37, %v3990_v13  ;;  %v4009_v21 = vadd.f32 %v4005_v20, %v3986_v62 }
0x2b96   :  { %v4012_v7 = vmul.f32 0.7978846, %v4008_v40  ;;  %v4010_v25 = vadd.f32 %v4006_v53, %v3988_v58  ;;  %v5394_v58 = vld [vmem:[%s6686_s10 + $0x20] sm:$0xff]   ;;  %v4627_v40 = vld [vmem:[%s6680_s4 + $0x12] ss:$0 sm:$0xff] }
0x2b97   :  { %v4011_v31 = vadd.f32 %v4007_v57, %v3990_v13  ;;  %v4013_v27 = vmul.f32 0.7978846, %v4009_v21  ;;  %v5397_v13 = vld [vmem:[%s6686_s10 + $0x38] sm:$0xff]  }
0x2b98   :  { %5486 = vtanh.f32 %v4012_v7  ;;  %v4014_v33 = vmul.f32 0.7978846, %v4010_v25 }
0x2b99   :  { %v4015_v34 = vmul.f32 0.7978846, %v4011_v31  ;;  %5488 = vtanh.f32 %v4013_v27 }
0x2b9a   :  { %5490 = vtanh.f32 %v4014_v33  ;;  %v4629_v33 = vld [vmem:[%s6680_s4 + $0x14] ss:$0 sm:$0xff] }
0x2b9b   :  { %5492 = vtanh.f32 %v4015_v34 }
0x2ba2   :  { %v5487_v32 = vpop.eup %5486 }
0x2ba3   :  { %v5489_v38 = vpop.eup %5488  ;;  %v4020_v43 = vadd.f32 1.0, %v5487_v32 }
0x2ba4   :  { %v5491_v30 = vpop.eup %5490  ;;  %v4021_v44 = vadd.f32 1.0, %v5489_v38 }
0x2ba5   :  { %v5493_v24 = vpop.eup %5492  ;;  %v4022_v45 = vadd.f32 1.0, %v5491_v30  ;;  %v4024_v46 = vmul.f32 %v4020_v43, %v3992_v42 }
0x2ba6   :  { %v4023_v8 = vadd.f32 1.0, %v5493_v24  ;;  %v4025_v49 = vmul.f32 %v4021_v44, %v3993_v35 }
0x2ba7   :  { %v4026_v48 = vmul.f32 %v4022_v45, %v3994_v41 }
0x2ba8   :  { %v4027_v50 = vmul.f32 %v4023_v8, %v3995_v28 }
0x2ba9   :  { %v4028_v52 = vpack.c.bf16 %v4026_v48, %v4024_v46 }
0x2baa   :  { %v4029_v12 = vpack.c.bf16 %v4027_v50, %v4025_v49 }
0x2bac   :  { %4163 = vmatprep.mubr.bf16.mxu1 %v4029_v12 }
0x2bad   :  { %4164 = vmatmul.mubr.bf16.vlgmr.msra.gmra.mrb[116].mxu1 %v4028_v52 }
0x2c80   :  { %v4811_v29 = vpop.f32.mrb[116].mxu1 }
0x2c81   :  { %v4812_v26 = vpop.f32.mrb[117].mxu1 }
0x2c82   :  { %v4813_v23 = vadd.f32 %v4812_v26, %v4811_v29  ;;  %v4814_v14 = vpop.f32.mrb[118].mxu1 }
0x2c83   :  { %v4815_v54 = vpop.f32.mrb[119].mxu1 }
0x2c84   :  { %v4166_v4 = vadd.f32 %v4813_v23, %v4610_v61  ;;  %v4816_v51 = vadd.f32 %v4815_v54, %v4814_v14 }
0x2c86   :  { %v4169_v56 = vadd.f32 %v4816_v51, %v4610_v61  ;;  %v4172_v6 = vadd.f32 %v4166_v4, %v6564_v11 }
0x2c88   :  { %4176 = vadd.xlane.f32.xlu0 %v4172_v6  ;;  %v4173_v16 = vadd.f32 %v4169_v56, %v6566_v47  ;;  %v5391_v47 = vld [vmem:[%s6686_s10 + $0x8] sm:$0xff]  }
0x2c89   :  { %5201 = vmatpush3.bf16.msra.mxu0 %v5391_v47 }
0x2c8a   :  { %5202 = vmatprep.subr.bf16.mxu0 %v5499_v2 }
0x2c8c   :  { %4178 = vadd.xlane.f32.xlu0 %v4173_v16 }
0x2c8d   :  { %5203 = vmatpush3.bf16.msra.mxu0 %v5392_v0 }
0x2c8e   :  { %5204 = vmatprep.subr.bf16.mxu0 %v5499_v2 }
0x2c91   :  { %5205 = vmatpush3.bf16.msra.mxu0 %v5393_v10 }
0x2c92   :  { %5206 = vmatprep.subr.bf16.mxu0 %v5499_v2 }
0x2c95   :  { %5207 = vmatpush3.bf16.msra.mxu0 %v5394_v58 }
0x2c96   :  { %5208 = vmatprep.subr.bf16.mxu0 %v5499_v2 }
0x2c99   :  { %5209 = vmatpush3.bf16.msra.mxu0 %v5395_v39 }
0x2c9a   :  { %5210 = vmatprep.subr.bf16.mxu0 %v5499_v2 }
0x2c9d   :  { %5211 = vmatpush3.bf16.msra.mxu0 %v5396_v3 }
0x2c9e   :  { %5212 = vmatprep.subr.bf16.mxu0 %v5499_v2  ;;  %v4628_v2 = vld [vmem:[%s6680_s4 + $0x13] ss:$0 sm:$0xff] }
0x2ca1   :  { %5213 = vmatpush3.bf16.msra.mxu0 %v5397_v13 }
0x2d15   :  { %v4177_v5 = vpop.xlane.xlu0 %4176 }
0x2d16   :  { %v4180_v55 = vmul.f32 0.0078125, %v4177_v5 }
0x2d18   :  { %v4182_v59 = vsub.f32 %v4172_v6, %v4180_v55 }
0x2d19   :  { %v4179_v60 = vpop.xlane.xlu0 %4178 }
0x2d1a   :  { %v4181_v1 = vmul.f32 0.0078125, %v4179_v60  ;;  %v4184_v63 = vmul.f32 %v4182_v59, %v4182_v59 }
0x2d1c   :  { %v4183_v62 = vsub.f32 %v4173_v16, %v4181_v1  ;;  %4186 = vadd.xlane.f32.xlu0 %v4184_v63 }
0x2d1e   :  { %v4185_v11 = vmul.f32 %v4183_v62, %v4183_v62 }
0x2d20   :  { %4188 = vadd.xlane.f32.xlu0 %v4185_v11 }
0x2da9   :  { %v4187_v9 = vpop.xlane.xlu0 %4186 }
0x2daa   :  { %v4190_v15 = vmul.f32 0.0078125, %v4187_v9 }
0x2dac   :  { %v4192_v17 = vadd.f32 1e-12, %v4190_v15 }
0x2dad   :  { %v4189_v18 = vpop.xlane.xlu0 %4188 }
0x2dae   :  { %5494 = vrsqrt.f32 %v4192_v17  ;;  %v4191_v22 = vmul.f32 0.0078125, %v4189_v18 }
0x2db0   :  { %v4193_v19 = vadd.f32 1e-12, %v4191_v22 }
0x2db2   :  { %5496 = vrsqrt.f32 %v4193_v19 }
0x2db8   :  { %v5495_v20 = vpop.eup %5494 }
0x2db9   :  { %v4196_v37 = vmul.f32 %v5495_v20, %v4182_v59 }
0x2dbb   :  { %v4202_v21 = vmul.f32 %v4627_v40, %v4196_v37 }
0x2dbc   :  { %v5497_v53 = vpop.eup %5496 }
0x2dbd   :  { %v4197_v57 = vmul.f32 %v5497_v53, %v4183_v62  ;;  %v4208_v25 = vadd.f32 %v4628_v2, %v4202_v21 }
0x2dbf   :  { %v4203_v7 = vmul.f32 %v4627_v40, %v4197_v57 }
0x2dc1   :  { %v4209_v31 = vadd.f32 %v4628_v2, %v4203_v7 }
0x2dc3   :  { %v4211_v27 = vpack.c.bf16 %v4209_v31, %v4208_v25 }
0x2dc5   :  { %5215 = vmatmul.mubr.bf16.vlgmr.msra.gmra.mrb[108].mxu0 %v4211_v27 }
0x2e98   :  { %v4314_v34 = vpop.f32.mrb[108].mxu0 }
0x2e99   :  { %v4315_v32 = vadd.f32 %v4629_v33, %v4314_v34  ;;  %v5216_v38 = vpop.f32.mrb[109].mxu0 }
0x2e9a   :  { %v4317_v43 = vpop.f32.mrb[110].mxu0 }
0x2e9b   :  { %v4321_v30 = vmax.f32 %v4315_v32, 0.0  ;;  %v4318_v44 = vadd.f32 %v4629_v33, %v4317_v43  ;;  %v5217_v24 = vpop.f32.mrb[111].mxu0 }
0x2e9d   :  { %4323 = vst [vmem:[%s6687_s11] sm:$0xff] %v4321_v30  ;;  %v4322_v42 = vmax.f32 %v4318_v44, 0.0 }
0x2e9f   :  { %4324 = vst [vmem:[%s6687_s11 + $0x8] sm:$0xff] %v4322_v42 }

</bundles_post_ra>
